<compile_context>
chip_gen: v7x
topology: tpu7x:2x2x1
jax: 0.10.0
libtpu: 0.0.40
codegen_flags: <defaults>
</compile_context>

<pallas_src>
import functools
import math

import jax
import jax.numpy as jnp
from jax.experimental import pallas as pl
from jax.experimental.pallas import tpu as pltpu

_NEG_INF = -1e30


# ---------------------------------------------------------------------------
# Pallas kernel: one (batch-block, S-tile) step of cross-attention + LayerNorm
# ---------------------------------------------------------------------------
def _cross_attn_kernel(tgt_ref, qpos_ref, mem_ref, pos_ref,
                       wq_ref, wk_ref, wv_ref, wo_ref,
                       bq_ref, bk_ref, bv_ref, bo_ref,
                       gamma_ref, beta_ref,
                       out_ref,
                       qh_s, m_s, l_s, acc_s,
                       *, nhead, eps, approx_recip):
    b_blk, T, D = tgt_ref.shape
    S_blk = mem_ref.shape[0]               # mem/pos arrive in native (S_blk, b, D)
    hd = D // nhead
    Z = b_blk * nhead                      # folded (batch, head) axis
    cdt = wq_ref.dtype                     # MXU compute dtype (bf16 or f32)

    s_idx = pl.program_id(1)
    ns = pl.num_programs(1)

    # ---- first S tile: project Q once, zero the online-softmax state --------
    @pl.when(s_idx == 0)
    def _init():
        q_in = tgt_ref[...] + qpos_ref[...]                       # (b,T,D) f32
        q2d = q_in.reshape(b_blk * T, D).astype(cdt)
        # 1/sqrt(hd) scale is folded into wq/bq host-side.
        qp = jnp.dot(q2d, wq_ref[...],
                     preferred_element_type=jnp.float32) + bq_ref[0]
        qh = jnp.transpose(qp.reshape(b_blk, T, nhead, hd), (0, 2, 1, 3))
        qh_s[...] = qh.reshape(Z, T, hd).astype(cdt)
        m_s[...] = jnp.full(m_s.shape, _NEG_INF, dtype=m_s.dtype)
        l_s[...] = jnp.zeros(l_s.shape, dtype=l_s.dtype)
        acc_s[...] = jnp.zeros(acc_s.shape, dtype=acc_s.dtype)

    # ---- K/V projection for this S tile (native (S_blk, b, D) layout) -------
    mem = mem_ref[...]
    k_in = (mem + pos_ref[...]).reshape(S_blk * b_blk, D).astype(cdt)
    v_in = mem.reshape(S_blk * b_blk, D).astype(cdt)
    kp = jnp.dot(k_in, wk_ref[...], preferred_element_type=jnp.float32) + bk_ref[0]
    vp = jnp.dot(v_in, wv_ref[...], preferred_element_type=jnp.float32) + bv_ref[0]

    # K directly to (Z, hd, S_blk): leading-dim shuffle then last-two swap,
    # so the scores contraction below needs no hidden transpose.
    kh = jnp.transpose(kp.reshape(S_blk, b_blk, nhead, hd), (1, 2, 0, 3))
    kh = jnp.swapaxes(kh, -1, -2).reshape(Z, hd, S_blk).astype(cdt)
    # V to (Z, S_blk, hd): leading-dim shuffle only (minor dim preserved).
    vh = jnp.transpose(vp.reshape(S_blk, b_blk, nhead, hd), (1, 2, 0, 3))
    vh = vh.reshape(Z, S_blk, hd).astype(cdt)

    # ---- batched attention scores + online softmax accumulation -------------
    s = jnp.einsum("ztd,zds->zts", qh_s[...], kh,
                   preferred_element_type=jnp.float32)            # (Z,T,S_blk)
    m_prev = m_s[...]                                             # (Z,T)
    m_new = jnp.maximum(m_prev, jnp.max(s, axis=-1))
    alpha = jnp.exp(m_prev - m_new)                               # (Z,T)
    p = jnp.exp(s - m_new[:, :, None])                            # (Z,T,S_blk)
    l_s[...] = alpha * l_s[...] + jnp.sum(p, axis=-1)
    pv = jnp.einsum("zts,zsd->ztd", p.astype(cdt), vh,
                    preferred_element_type=jnp.float32)           # (Z,T,hd)
    acc_s[...] = alpha[:, :, None] * acc_s[...] + pv
    m_s[...] = m_new

    # ---- last S tile: normalize, output proj, residual, LayerNorm -----------
    @pl.when(s_idx == ns - 1)
    def _finalize():
        if approx_recip:
            inv_l = pl.reciprocal(l_s[...], approx=True)
        else:
            inv_l = 1.0 / l_s[...]
        attn = acc_s[...] * inv_l[:, :, None]                      # (Z,T,hd) f32
        attn = attn.reshape(b_blk, nhead, T, hd)
        attn = jnp.transpose(attn, (0, 2, 1, 3)).reshape(b_blk * T, D)
        proj = jnp.dot(attn.astype(cdt), wo_ref[...],
                       preferred_element_type=jnp.float32) + bo_ref[0]
        # residual (dropout p=0.0 -> identity) and LayerNorm in f32
        x = tgt_ref[...].reshape(b_blk * T, D) + proj
        mean = jnp.mean(x, axis=-1, keepdims=True)
        var = jnp.mean((x - mean) ** 2, axis=-1, keepdims=True)
        y = (x - mean) * jax.lax.rsqrt(var + eps)
        y = y * gamma_ref[0] + beta_ref[0]
        out_ref[...] = y.reshape(b_blk, T, D).astype(out_ref.dtype)


# ---------------------------------------------------------------------------
# Tile sizing helpers (per-generation VMEM budget)
# ---------------------------------------------------------------------------
def _vmem_budget_bytes():
    try:
        cap = int(pltpu.get_tpu_info().vmem_capacity_bytes)
    except Exception:
        cap = 64 * 1024 * 1024        # conservative (v7x-sized) default
    return int(cap * 0.75)            # leave headroom for compiler scratch


def _vmem_estimate_bytes(b_block, s_block, T, D, nhead, in_bytes, cdt_bytes):
    hd = D // nhead
    Z = b_block * nhead
    sub = lambda n: -(-n // 8) * 8
    lanes = lambda n: -(-n // 128) * 128
    kv = 2 * 2 * s_block * sub(b_block) * lanes(D) * in_bytes        # mem,pos x2 bufs
    q_res = 2 * 2 * b_block * sub(T) * lanes(D) * 4                  # tgt,qpos
    out_t = 2 * b_block * sub(T) * lanes(D) * 4
    w = 2 * 4 * sub(D) * lanes(D) * cdt_bytes
    vecs = 6 * 8 * lanes(D) * 4
    scratch = (Z * sub(T) * lanes(hd) * cdt_bytes                    # qh_s
               + Z * sub(T) * lanes(hd) * 4                          # acc_s
               + 2 * sub(Z) * lanes(T) * 4)                          # m_s, l_s
    return kv + q_res + out_t + w + vecs + scratch


def _pick_s_block(S, b_block, T, D, nhead, in_bytes, cdt_bytes, budget,
                  requested, max_s_block=512):
    if (requested is not None and requested <= S and S % requested == 0
            and (requested % 8 == 0 or requested == S)):
        return requested

    def fits(sb):
        return _vmem_estimate_bytes(b_block, sb, T, D, nhead,
                                    in_bytes, cdt_bytes) <= budget

    # Prefer lane-dense (multiple-of-128) divisors, then multiples of 8.
    for step in (128, 8):
        cands = [d for d in range(step, min(S, max_s_block) + 1, step)
                 if S % d == 0]
        if not cands:
            continue
        for d in sorted(cands, reverse=True):
            if fits(d):
                return d
        return min(cands)
    # S has no multiple-of-8 divisor <= cap: correctness first, use full S.
    return S


# ---------------------------------------------------------------------------
# Wrapper: parameter plumbing + pallas_call
# ---------------------------------------------------------------------------
def cross_attention_layer(tgt, memory, params, *, nhead,
                          query_pos=None, pos=None, eps=1e-5,
                          compute_dtype=jnp.bfloat16,
                          s_block=None, num_parallel_cores=1,
                          out_dtype=None):
    """tgt: (T, B, D), memory: (S, B, D) — PyTorch MultiheadAttention layout."""
    T, B, D = tgt.shape
    S = memory.shape[0]
    assert D % nhead == 0
    hd = D // nhead

    if query_pos is None:
        query_pos = jnp.zeros_like(tgt)
    if pos is None:
        pos = jnp.zeros_like(memory)
    if out_dtype is None:
        out_dtype = tgt.dtype

    # Small query-side tensors: transpose to (B, T, D) host-side (cheap).
    # memory/pos (the dominant HBM streams) stay in native (S, B, D) layout
    # and native dtype — no extra transpose/cast pass over HBM.
    tgt_b = jnp.transpose(tgt, (1, 0, 2)).astype(jnp.float32)
    qpos_b = jnp.transpose(query_pos, (1, 0, 2)).astype(jnp.float32)

    # Batch blocking: single TensorCore on v5e/v6e -> no split (a split only
    # adds grid-step overhead).  Set num_parallel_cores=2 on v7x to shard the
    # parallel batch axis across both TensorCores.
    b_block = B
    if num_parallel_cores > 1 and B % num_parallel_cores == 0:
        cand = B // num_parallel_cores
        if cand % 8 == 0 or cand == B:      # (8,128) rule on the memory block
            b_block = cand

    in_bytes = jnp.dtype(memory.dtype).itemsize
    cdt_bytes = jnp.dtype(compute_dtype).itemsize
    budget = _vmem_budget_bytes()
    s_block = _pick_s_block(S, b_block, T, D, nhead, in_bytes, cdt_bytes,
                            budget, s_block)
    nb, ns = B // b_block, S // s_block

    # PyTorch: y = x @ W.T + b  -> pre-transpose so the kernel does x @ W.
    # Fold the 1/sqrt(hd) attention scale into the Q projection (host-side).
    scale = 1.0 / math.sqrt(hd)
    wq_t = (params["wq"].T * scale).astype(compute_dtype)
    wk_t = params["wk"].T.astype(compute_dtype)
    wv_t = params["wv"].T.astype(compute_dtype)
    wo_t = params["wo"].T.astype(compute_dtype)
    bq = (params["bq"] * scale).reshape(1, D).astype(jnp.float32)
    bk = params["bk"].reshape(1, D).astype(jnp.float32)
    bv = params["bv"].reshape(1, D).astype(jnp.float32)
    bo = params["bo"].reshape(1, D).astype(jnp.float32)
    gamma = params["gamma"].reshape(1, D).astype(jnp.float32)
    beta = params["beta"].reshape(1, D).astype(jnp.float32)

    Z = b_block * nhead
    approx_recip = jnp.dtype(compute_dtype) != jnp.dtype(jnp.float32)

    kernel = functools.partial(_cross_attn_kernel, nhead=nhead, eps=eps,
                               approx_recip=bool(approx_recip))

    tq_spec = pl.BlockSpec((b_block, T, D), lambda b, s: (b, 0, 0))
    kv_spec = pl.BlockSpec((s_block, b_block, D), lambda b, s: (s, b, 0))
    w_spec = pl.BlockSpec((D, D), lambda b, s: (0, 0))
    vec_spec = pl.BlockSpec((1, D), lambda b, s: (0, 0))

    out_b = pl.pallas_call(
        kernel,
        out_shape=jax.ShapeDtypeStruct((B, T, D), out_dtype),
        grid_spec=pltpu.PrefetchScalarGridSpec(
            num_scalar_prefetch=0,
            grid=(nb, ns),
            in_specs=[
                tq_spec, tq_spec,                    # tgt, query_pos (B,T,D)
                kv_spec, kv_spec,                    # memory, pos (native S,B,D)
                w_spec, w_spec, w_spec, w_spec,      # wq, wk, wv, wo (transposed)
                vec_spec, vec_spec, vec_spec, vec_spec,  # bq, bk, bv, bo
                vec_spec, vec_spec,                  # gamma, beta
            ],
            out_specs=tq_spec,
            scratch_shapes=[
                pltpu.VMEM((Z, T, hd), compute_dtype),   # projected Q heads
                pltpu.VMEM((Z, T), jnp.float32),         # running max
                pltpu.VMEM((Z, T), jnp.float32),         # running denom
                pltpu.VMEM((Z, T, hd), jnp.float32),     # output accumulator
            ]),
        compiler_params=pltpu.CompilerParams(
            dimension_semantics=("parallel", "arbitrary"),
            vmem_limit_bytes=int(budget)),
    )(tgt_b, qpos_b, memory, pos,
      wq_t, wk_t, wv_t, wo_t,
      bq, bk, bv, bo, gamma, beta)

    # back to (T, B, D)
    return jnp.transpose(out_b, (1, 0, 2))


# ---------------------------------------------------------------------------
# Pure-JAX reference (mirrors PyTorch forward_post exactly, all f32)
# ---------------------------------------------------------------------------
def reference(tgt, memory, params, *, nhead, query_pos, pos, eps=1e-5):
    q = tgt + query_pos
    k = memory + pos
    v = memory
    T, B, D = q.shape
    S = k.shape[0]
    hd = D // nhead
    scale = 1.0 / math.sqrt(hd)

    qp = jnp.einsum("tbd,ed->tbe", q, params["wq"]) + params["bq"]
    kp = jnp.einsum("sbd,ed->sbe", k, params["wk"]) + params["bk"]
    vp = jnp.einsum("sbd,ed->sbe", v, params["wv"]) + params["bv"]

    qh = qp.reshape(T, B, nhead, hd) * scale
    kh = kp.reshape(S, B, nhead, hd)
    vh = vp.reshape(S, B, nhead, hd)

    scores = jnp.einsum("tbhe,sbhe->bhts", qh, kh)
    attn = jax.nn.softmax(scores, axis=-1)
    out = jnp.einsum("bhts,sbhe->tbhe", attn, vh).reshape(T, B, D)

    proj = jnp.einsum("tbd,ed->tbe", out, params["wo"]) + params["bo"]
    x = tgt + proj
    mean = jnp.mean(x, axis=-1, keepdims=True)
    var = jnp.mean((x - mean) ** 2, axis=-1, keepdims=True)
    return (x - mean) / jnp.sqrt(var + eps) * params["gamma"] + params["beta"]


# ---------------------------------------------------------------------------
# Deterministic parameter init (shapes from nn.MultiheadAttention / LayerNorm)
# ---------------------------------------------------------------------------
def _xavier_uniform(key, shape):
    fan_out, fan_in = shape
    bound = math.sqrt(6.0 / (fan_in + fan_out))
    return jax.random.uniform(key, shape, jnp.float32, -bound, bound)


def make_params(key, d_model):
    keys = jax.random.split(key, 9)
    in_proj = _xavier_uniform(keys[0], (3 * d_model, d_model))
    wq, wk, wv = jnp.split(in_proj, 3, axis=0)
    wo = _xavier_uniform(keys[1], (d_model, d_model))
    bq = 0.01 * jax.random.normal(keys[2], (d_model,), jnp.float32)
    bk = 0.01 * jax.random.normal(keys[3], (d_model,), jnp.float32)
    bv = 0.01 * jax.random.normal(keys[4], (d_model,), jnp.float32)
    bo = 0.01 * jax.random.normal(keys[5], (d_model,), jnp.float32)
    gamma = 1.0 + 0.01 * jax.random.normal(keys[6], (d_model,), jnp.float32)
    beta = 0.01 * jax.random.normal(keys[7], (d_model,), jnp.float32)
    return dict(wq=wq, wk=wk, wv=wv, wo=wo, bq=bq, bk=bk, bv=bv, bo=bo,
                gamma=gamma, beta=beta)


if __name__ == "__main__":
    # Small shapes: T queries attend over S memory tokens, batch B.
    d_model, nhead = 32, 4
    B, T, S = 2, 8, 64

    key = jax.random.PRNGKey(0)
    k_tgt, k_mem, k_qpos, k_pos, k_par = jax.random.split(key, 5)

    tgt = jax.random.normal(k_tgt, (T, B, d_model), jnp.float32)      # (seq, batch, d)
    memory = jax.random.normal(k_mem, (S, B, d_model), jnp.float32)
    query_pos = jax.random.normal(k_qpos, (T, B, d_model), jnp.float32)
    pos = jax.random.normal(k_pos, (S, B, d_model), jnp.float32)
    params = make_params(k_par, d_model)

    ref = reference(tgt, memory, params, nhead=nhead, query_pos=query_pos, pos=pos)

    # f32 compute path with S tiled into 2 blocks (exercises online softmax).
    out_f32 = cross_attention_layer(tgt, memory, params, nhead=nhead,
                                    query_pos=query_pos, pos=pos,
                                    compute_dtype=jnp.float32, s_block=32)
    out_f32 = jax.block_until_ready(out_f32)
    assert out_f32.shape == (T, B, d_model)
    assert jnp.allclose(out_f32, ref, atol=1e-4, rtol=1e-4), "f32 kernel mismatch"

    # bf16 MXU path (default perf path); looser tolerance for bf16 rounding.
    out_bf16 = cross_attention_layer(tgt, memory, params, nhead=nhead,
                                     query_pos=query_pos, pos=pos,
                                     compute_dtype=jnp.bfloat16, s_block=32)
    out_bf16 = jax.block_until_ready(out_bf16)
    assert out_bf16.shape == (T, B, d_model)
    assert jnp.allclose(out_bf16, ref, atol=1e-1, rtol=1e-1), "bf16 kernel mismatch"

    print("KERNEL_OK")
</pallas_src>

<mosaic_0001>
module attributes {stable_mosaic.version = 11 : i64} {
  func.func @_cross_attn_kernel(%arg0: i32, %arg1: i32, %arg2: memref<2x8x32xf32, #tpu.memory_space<vmem>>, %arg3: memref<2x8x32xf32, #tpu.memory_space<vmem>>, %arg4: memref<32x2x32xf32, #tpu.memory_space<vmem>>, %arg5: memref<32x2x32xf32, #tpu.memory_space<vmem>>, %arg6: memref<32x32xf32, #tpu.memory_space<vmem>>, %arg7: memref<32x32xf32, #tpu.memory_space<vmem>>, %arg8: memref<32x32xf32, #tpu.memory_space<vmem>>, %arg9: memref<32x32xf32, #tpu.memory_space<vmem>>, %arg10: memref<1x32xf32, #tpu.memory_space<vmem>>, %arg11: memref<1x32xf32, #tpu.memory_space<vmem>>, %arg12: memref<1x32xf32, #tpu.memory_space<vmem>>, %arg13: memref<1x32xf32, #tpu.memory_space<vmem>>, %arg14: memref<1x32xf32, #tpu.memory_space<vmem>>, %arg15: memref<1x32xf32, #tpu.memory_space<vmem>>, %arg16: memref<2x8x32xf32, #tpu.memory_space<vmem>>, %arg17: memref<8x8x8xf32, #tpu.memory_space<vmem>>, %arg18: memref<8x8xf32, #tpu.memory_space<vmem>>, %arg19: memref<8x8xf32, #tpu.memory_space<vmem>>, %arg20: memref<8x8x8xf32, #tpu.memory_space<vmem>>) attributes {dimension_semantics = [#tpu.dimension_semantics<parallel>, #tpu.dimension_semantics<arbitrary>], iteration_bounds = array<i64: 1, 2>, scalar_prefetch = 0 : i64, scratch_operands = 4 : i64, tpu.core_type = #tpu.core_type<tc>, window_params = [{transform_indices = @transform_0, window_bounds = array<i64: 2, 8, 32>}, {transform_indices = @transform_1, window_bounds = array<i64: 2, 8, 32>}, {transform_indices = @transform_2, window_bounds = array<i64: 32, 2, 32>}, {transform_indices = @transform_3, window_bounds = array<i64: 32, 2, 32>}, {pipeline_mode = #tpu.pipeline_mode<synchronous>, transform_indices = @transform_4, window_bounds = array<i64: 32, 32>}, {pipeline_mode = #tpu.pipeline_mode<synchronous>, transform_indices = @transform_5, window_bounds = array<i64: 32, 32>}, {pipeline_mode = #tpu.pipeline_mode<synchronous>, transform_indices = @transform_6, window_bounds = array<i64: 32, 32>}, {pipeline_mode = #tpu.pipeline_mode<synchronous>, transform_indices = @transform_7, window_bounds = array<i64: 32, 32>}, {pipeline_mode = #tpu.pipeline_mode<synchronous>, transform_indices = @transform_8, window_bounds = array<i64: 1, 32>}, {pipeline_mode = #tpu.pipeline_mode<synchronous>, transform_indices = @transform_9, window_bounds = array<i64: 1, 32>}, {pipeline_mode = #tpu.pipeline_mode<synchronous>, transform_indices = @transform_10, window_bounds = array<i64: 1, 32>}, {pipeline_mode = #tpu.pipeline_mode<synchronous>, transform_indices = @transform_11, window_bounds = array<i64: 1, 32>}, {pipeline_mode = #tpu.pipeline_mode<synchronous>, transform_indices = @transform_12, window_bounds = array<i64: 1, 32>}, {pipeline_mode = #tpu.pipeline_mode<synchronous>, transform_indices = @transform_13, window_bounds = array<i64: 1, 32>}, {transform_indices = @transform_14, window_bounds = array<i64: 2, 8, 32>}]} {
    %c0_i32 = arith.constant 0 : i32
    %0 = arith.cmpi eq, %arg1, %c0_i32 : i32
    %1 = arith.extui %0 : i1 to i32
    %c0_i32_0 = arith.constant 0 : i32
    %2 = arith.cmpi ne, %1, %c0_i32_0 : i32
    scf.if %2 {
      %c0_37 = arith.constant 0 : index
      %c0_38 = arith.constant 0 : index
      %c0_39 = arith.constant 0 : index
      %56 = vector.load %arg2[%c0_37, %c0_38, %c0_39] : memref<2x8x32xf32, #tpu.memory_space<vmem>>, vector<2x8x32xf32>
      %c0_40 = arith.constant 0 : index
      %c0_41 = arith.constant 0 : index
      %c0_42 = arith.constant 0 : index
      %57 = vector.load %arg3[%c0_40, %c0_41, %c0_42] : memref<2x8x32xf32, #tpu.memory_space<vmem>>, vector<2x8x32xf32>
      %58 = arith.addf %56, %57 : vector<2x8x32xf32>
      %59 = vector.shape_cast %58 : vector<2x8x32xf32> to vector<16x32xf32>
      %c0_43 = arith.constant 0 : index
      %c0_44 = arith.constant 0 : index
      %60 = vector.load %arg6[%c0_43, %c0_44] : memref<32x32xf32, #tpu.memory_space<vmem>>, vector<32x32xf32>
      %cst_45 = arith.constant dense<0.000000e+00> : vector<16x32xf32>
      %61 = tpu.matmul %59, %60, %cst_45 {dimension_numbers = #tpu.dot_dimension_numbers<[1], [0], [0], [1], [0, 0, 1, 1], [], []>} : vector<16x32xf32>, vector<32x32xf32>, vector<16x32xf32> -> vector<16x32xf32>
      %c0_46 = arith.constant 0 : index
      %c0_47 = arith.constant 0 : index
      %62 = vector.load %arg10[%c0_46, %c0_47] : memref<1x32xf32, #tpu.memory_space<vmem>>, vector<1x32xf32>
      %63 = vector.shape_cast %62 : vector<1x32xf32> to vector<32xf32>
      %64 = vector.shape_cast %63 : vector<32xf32> to vector<1x32xf32>
      %65 = vector.broadcast %64 : vector<1x32xf32> to vector<16x32xf32>
      %66 = arith.addf %61, %65 : vector<16x32xf32>
      %67 = vector.shape_cast %66 : vector<16x32xf32> to vector<2x8x4x8xf32>
      %68 = tpu.transpose %67, [0, 2, 1, 3] : vector<2x8x4x8xf32> -> vector<2x4x8x8xf32>
      %69 = vector.shape_cast %68 : vector<2x4x8x8xf32> to vector<8x8x8xf32>
      %c0_48 = arith.constant 0 : index
      %c0_49 = arith.constant 0 : index
      %c0_50 = arith.constant 0 : index
      %70 = vector.load %arg17[%c0_48, %c0_49, %c0_50] : memref<8x8x8xf32, #tpu.memory_space<vmem>>, vector<8x8x8xf32>
      tpu.vector_store %arg17[%c0_48, %c0_49, %c0_50], %69 {strides = array<i32>} : memref<8x8x8xf32, #tpu.memory_space<vmem>>, vector<8x8x8xf32>,
      %cst_51 = arith.constant -1.000000e+30 : f32
      %71 = vector.broadcast %cst_51 : f32 to vector<8x8xf32>
      %c0_52 = arith.constant 0 : index
      %c0_53 = arith.constant 0 : index
      %72 = vector.load %arg18[%c0_52, %c0_53] : memref<8x8xf32, #tpu.memory_space<vmem>>, vector<8x8xf32>
      tpu.vector_store %arg18[%c0_52, %c0_53], %71 {strides = array<i32>} : memref<8x8xf32, #tpu.memory_space<vmem>>, vector<8x8xf32>,
      %cst_54 = arith.constant 0.000000e+00 : f32
      %73 = vector.broadcast %cst_54 : f32 to vector<8x8xf32>
      %c0_55 = arith.constant 0 : index
      %c0_56 = arith.constant 0 : index
      %74 = vector.load %arg19[%c0_55, %c0_56] : memref<8x8xf32, #tpu.memory_space<vmem>>, vector<8x8xf32>
      tpu.vector_store %arg19[%c0_55, %c0_56], %73 {strides = array<i32>} : memref<8x8xf32, #tpu.memory_space<vmem>>, vector<8x8xf32>,
      %cst_57 = arith.constant 0.000000e+00 : f32
      %75 = vector.broadcast %cst_57 : f32 to vector<8x8x8xf32>
      %c0_58 = arith.constant 0 : index
      %c0_59 = arith.constant 0 : index
      %c0_60 = arith.constant 0 : index
      %76 = vector.load %arg20[%c0_58, %c0_59, %c0_60] : memref<8x8x8xf32, #tpu.memory_space<vmem>>, vector<8x8x8xf32>
      tpu.vector_store %arg20[%c0_58, %c0_59, %c0_60], %75 {strides = array<i32>} : memref<8x8x8xf32, #tpu.memory_space<vmem>>, vector<8x8x8xf32>,
    } else {
    }
    %c0 = arith.constant 0 : index
    %c0_1 = arith.constant 0 : index
    %c0_2 = arith.constant 0 : index
    %3 = vector.load %arg4[%c0, %c0_1, %c0_2] : memref<32x2x32xf32, #tpu.memory_space<vmem>>, vector<32x2x32xf32>
    %c0_3 = arith.constant 0 : index
    %c0_4 = arith.constant 0 : index
    %c0_5 = arith.constant 0 : index
    %4 = vector.load %arg5[%c0_3, %c0_4, %c0_5] : memref<32x2x32xf32, #tpu.memory_space<vmem>>, vector<32x2x32xf32>
    %5 = arith.addf %3, %4 : vector<32x2x32xf32>
    %6 = vector.shape_cast %5 : vector<32x2x32xf32> to vector<64x32xf32>
    %7 = vector.shape_cast %3 : vector<32x2x32xf32> to vector<64x32xf32>
    %c0_6 = arith.constant 0 : index
    %c0_7 = arith.constant 0 : index
    %8 = vector.load %arg7[%c0_6, %c0_7] : memref<32x32xf32, #tpu.memory_space<vmem>>, vector<32x32xf32>
    %cst = arith.constant dense<0.000000e+00> : vector<64x32xf32>
    %9 = tpu.matmul %6, %8, %cst {dimension_numbers = #tpu.dot_dimension_numbers<[1], [0], [0], [1], [0, 0, 1, 1], [], []>} : vector<64x32xf32>, vector<32x32xf32>, vector<64x32xf32> -> vector<64x32xf32>
    %c0_8 = arith.constant 0 : index
    %c0_9 = arith.constant 0 : index
    %10 = vector.load %arg11[%c0_8, %c0_9] : memref<1x32xf32, #tpu.memory_space<vmem>>, vector<1x32xf32>
    %11 = vector.shape_cast %10 : vector<1x32xf32> to vector<32xf32>
    %12 = vector.shape_cast %11 : vector<32xf32> to vector<1x32xf32>
    %13 = vector.broadcast %12 : vector<1x32xf32> to vector<64x32xf32>
    %14 = arith.addf %9, %13 : vector<64x32xf32>
    %c0_10 = arith.constant 0 : index
    %c0_11 = arith.constant 0 : index
    %15 = vector.load %arg8[%c0_10, %c0_11] : memref<32x32xf32, #tpu.memory_space<vmem>>, vector<32x32xf32>
    %cst_12 = arith.constant dense<0.000000e+00> : vector<64x32xf32>
    %16 = tpu.matmul %7, %15, %cst_12 {dimension_numbers = #tpu.dot_dimension_numbers<[1], [0], [0], [1], [0, 0, 1, 1], [], []>} : vector<64x32xf32>, vector<32x32xf32>, vector<64x32xf32> -> vector<64x32xf32>
    %c0_13 = arith.constant 0 : index
    %c0_14 = arith.constant 0 : index
    %17 = vector.load %arg12[%c0_13, %c0_14] : memref<1x32xf32, #tpu.memory_space<vmem>>, vector<1x32xf32>
    %18 = vector.shape_cast %17 : vector<1x32xf32> to vector<32xf32>
    %19 = vector.shape_cast %18 : vector<32xf32> to vector<1x32xf32>
    %20 = vector.broadcast %19 : vector<1x32xf32> to vector<64x32xf32>
    %21 = arith.addf %16, %20 : vector<64x32xf32>
    %22 = vector.shape_cast %14 : vector<64x32xf32> to vector<32x2x4x8xf32>
    %23 = tpu.transpose %22, [1, 2, 0, 3] : vector<32x2x4x8xf32> -> vector<2x4x32x8xf32>
    %24 = tpu.transpose %23, [0, 1, 3, 2] : vector<2x4x32x8xf32> -> vector<2x4x8x32xf32>
    %25 = vector.shape_cast %24 : vector<2x4x8x32xf32> to vector<8x8x32xf32>
    %26 = vector.shape_cast %21 : vector<64x32xf32> to vector<32x2x4x8xf32>
    %27 = tpu.transpose %26, [1, 2, 0, 3] : vector<32x2x4x8xf32> -> vector<2x4x32x8xf32>
    %28 = vector.shape_cast %27 : vector<2x4x32x8xf32> to vector<8x32x8xf32>
    %c0_15 = arith.constant 0 : index
    %c0_16 = arith.constant 0 : index
    %c0_17 = arith.constant 0 : index
    %29 = vector.load %arg17[%c0_15, %c0_16, %c0_17] : memref<8x8x8xf32, #tpu.memory_space<vmem>>, vector<8x8x8xf32>
    "tpu.trace_start"() <{level = 10 : i32, message = "ztd,zds->zts"}> : () -> ()
    %cst_18 = arith.constant dense<0.000000e+00> : vector<8x8x32xf32>
    %30 = tpu.matmul %29, %25, %cst_18 {dimension_numbers = #tpu.dot_dimension_numbers<[2], [1], [1], [2], [0, 0, 0, 1, 1, 2], [0], [0]>} : vector<8x8x8xf32>, vector<8x8x32xf32>, vector<8x8x32xf32> -> vector<8x8x32xf32>
    "tpu.trace_stop"() : () -> ()
    %c0_19 = arith.constant 0 : index
    %c0_20 = arith.constant 0 : index
    %31 = vector.load %arg18[%c0_19, %c0_20] : memref<8x8xf32, #tpu.memory_space<vmem>>, vector<8x8xf32>
    %cst_21 = arith.constant dense<0xFF800000> : vector<8x8xf32>
    %32 = vector.multi_reduction <maximumf>, %30, %cst_21 [2] : vector<8x8x32xf32> to vector<8x8xf32>
    %33 = arith.maximumf %31, %32 : vector<8x8xf32>
    %34 = arith.subf %31, %33 : vector<8x8xf32>
    %35 = math.exp %34 : vector<8x8xf32>
    %36 = vector.shape_cast %33 : vector<8x8xf32> to vector<8x8x1xf32>
    %37 = vector.broadcast %36 : vector<8x8x1xf32> to vector<8x8x32xf32>
    %38 = arith.subf %30, %37 : vector<8x8x32xf32>
    %39 = math.exp %38 : vector<8x8x32xf32>
    %c0_22 = arith.constant 0 : index
    %c0_23 = arith.constant 0 : index
    %40 = vector.load %arg19[%c0_22, %c0_23] : memref<8x8xf32, #tpu.memory_space<vmem>>, vector<8x8xf32>
    %41 = arith.mulf %35, %40 : vector<8x8xf32>
    %cst_24 = arith.constant dense<0.000000e+00> : vector<8x8xf32>
    %42 = vector.multi_reduction <add>, %39, %cst_24 [2] : vector<8x8x32xf32> to vector<8x8xf32>
    %43 = arith.addf %41, %42 : vector<8x8xf32>
    %c0_25 = arith.constant 0 : index
    %c0_26 = arith.constant 0 : index
    %44 = vector.load %arg19[%c0_25, %c0_26] : memref<8x8xf32, #tpu.memory_space<vmem>>, vector<8x8xf32>
    tpu.vector_store %arg19[%c0_25, %c0_26], %43 {strides = array<i32>} : memref<8x8xf32, #tpu.memory_space<vmem>>, vector<8x8xf32>,
    "tpu.trace_start"() <{level = 10 : i32, message = "zts,zsd->ztd"}> : () -> ()
    %cst_27 = arith.constant dense<0.000000e+00> : vector<8x8x8xf32>
    %45 = tpu.matmul %39, %28, %cst_27 {dimension_numbers = #tpu.dot_dimension_numbers<[2], [1], [1], [2], [0, 0, 0, 1, 1, 2], [0], [0]>} : vector<8x8x32xf32>, vector<8x32x8xf32>, vector<8x8x8xf32> -> vector<8x8x8xf32>
    "tpu.trace_stop"() : () -> ()
    %46 = vector.shape_cast %35 : vector<8x8xf32> to vector<8x8x1xf32>
    %c0_28 = arith.constant 0 : index
    %c0_29 = arith.constant 0 : index
    %c0_30 = arith.constant 0 : index
    %47 = vector.load %arg20[%c0_28, %c0_29, %c0_30] : memref<8x8x8xf32, #tpu.memory_space<vmem>>, vector<8x8x8xf32>
    %48 = vector.broadcast %46 : vector<8x8x1xf32> to vector<8x8x8xf32>
    %49 = arith.mulf %48, %47 : vector<8x8x8xf32>
    %50 = arith.addf %49, %45 : vector<8x8x8xf32>
    %c0_31 = arith.constant 0 : index
    %c0_32 = arith.constant 0 : index
    %c0_33 = arith.constant 0 : index
    %51 = vector.load %arg20[%c0_31, %c0_32, %c0_33] : memref<8x8x8xf32, #tpu.memory_space<vmem>>, vector<8x8x8xf32>
    tpu.vector_store %arg20[%c0_31, %c0_32, %c0_33], %50 {strides = array<i32>} : memref<8x8x8xf32, #tpu.memory_space<vmem>>, vector<8x8x8xf32>,
    %c0_34 = arith.constant 0 : index
    %c0_35 = arith.constant 0 : index
    %52 = vector.load %arg18[%c0_34, %c0_35] : memref<8x8xf32, #tpu.memory_space<vmem>>, vector<8x8xf32>
    tpu.vector_store %arg18[%c0_34, %c0_35], %33 {strides = array<i32>} : memref<8x8xf32, #tpu.memory_space<vmem>>, vector<8x8xf32>,
    %c1_i32 = arith.constant 1 : i32
    %53 = arith.cmpi eq, %arg1, %c1_i32 : i32
    %54 = arith.extui %53 : i1 to i32
    %c0_i32_36 = arith.constant 0 : i32
    %55 = arith.cmpi ne, %54, %c0_i32_36 : i32
    scf.if %55 {
      %c0_37 = arith.constant 0 : index
      %c0_38 = arith.constant 0 : index
      %56 = vector.load %arg19[%c0_37, %c0_38] : memref<8x8xf32, #tpu.memory_space<vmem>>, vector<8x8xf32>
      %cst_39 = arith.constant 1.000000e+00 : f32
      %57 = vector.broadcast %cst_39 : f32 to vector<8x8xf32>
      %58 = arith.divf %57, %56 : vector<8x8xf32>
      %c0_40 = arith.constant 0 : index
      %c0_41 = arith.constant 0 : index
      %c0_42 = arith.constant 0 : index
      %59 = vector.load %arg20[%c0_40, %c0_41, %c0_42] : memref<8x8x8xf32, #tpu.memory_space<vmem>>, vector<8x8x8xf32>
      %60 = vector.shape_cast %58 : vector<8x8xf32> to vector<8x8x1xf32>
      %61 = vector.broadcast %60 : vector<8x8x1xf32> to vector<8x8x8xf32>
      %62 = arith.mulf %59, %61 : vector<8x8x8xf32>
      %63 = vector.shape_cast %62 : vector<8x8x8xf32> to vector<2x4x8x8xf32>
      %64 = tpu.transpose %63, [0, 2, 1, 3] : vector<2x4x8x8xf32> -> vector<2x8x4x8xf32>
      %65 = vector.shape_cast %64 : vector<2x8x4x8xf32> to vector<16x32xf32>
      %c0_43 = arith.constant 0 : index
      %c0_44 = arith.constant 0 : index
      %66 = vector.load %arg9[%c0_43, %c0_44] : memref<32x32xf32, #tpu.memory_space<vmem>>, vector<32x32xf32>
      %cst_45 = arith.constant dense<0.000000e+00> : vector<16x32xf32>
      %67 = tpu.matmul %65, %66, %cst_45 {dimension_numbers = #tpu.dot_dimension_numbers<[1], [0], [0], [1], [0, 0, 1, 1], [], []>} : vector<16x32xf32>, vector<32x32xf32>, vector<16x32xf32> -> vector<16x32xf32>
      %c0_46 = arith.constant 0 : index
      %c0_47 = arith.constant 0 : index
      %68 = vector.load %arg13[%c0_46, %c0_47] : memref<1x32xf32, #tpu.memory_space<vmem>>, vector<1x32xf32>
      %69 = vector.shape_cast %68 : vector<1x32xf32> to vector<32xf32>
      %70 = vector.shape_cast %69 : vector<32xf32> to vector<1x32xf32>
      %71 = vector.broadcast %70 : vector<1x32xf32> to vector<16x32xf32>
      %72 = arith.addf %67, %71 : vector<16x32xf32>
      %c0_48 = arith.constant 0 : index
      %c0_49 = arith.constant 0 : index
      %c0_50 = arith.constant 0 : index
      %73 = vector.load %arg2[%c0_48, %c0_49, %c0_50] : memref<2x8x32xf32, #tpu.memory_space<vmem>>, vector<2x8x32xf32>
      %74 = vector.shape_cast %73 : vector<2x8x32xf32> to vector<16x32xf32>
      %75 = arith.addf %74, %72 : vector<16x32xf32>
      %cst_51 = arith.constant dense<0.000000e+00> : vector<16xf32>
      %76 = vector.multi_reduction <add>, %75, %cst_51 [1] : vector<16x32xf32> to vector<16xf32>
      %77 = vector.shape_cast %76 : vector<16xf32> to vector<16x1xf32>
      %cst_52 = arith.constant 3.200000e+01 : f32
      %78 = vector.broadcast %cst_52 : f32 to vector<16x1xf32>
      %79 = arith.divf %77, %78 : vector<16x1xf32>
      %80 = vector.broadcast %79 : vector<16x1xf32> to vector<16x32xf32>
      %81 = arith.subf %75, %80 : vector<16x32xf32>
      %82 = arith.mulf %81, %81 : vector<16x32xf32>
      %cst_53 = arith.constant dense<0.000000e+00> : vector<16xf32>
      %83 = vector.multi_reduction <add>, %82, %cst_53 [1] : vector<16x32xf32> to vector<16xf32>
      %84 = vector.shape_cast %83 : vector<16xf32> to vector<16x1xf32>
      %cst_54 = arith.constant 3.200000e+01 : f32
      %85 = vector.broadcast %cst_54 : f32 to vector<16x1xf32>
      %86 = arith.divf %84, %85 : vector<16x1xf32>
      %87 = vector.broadcast %79 : vector<16x1xf32> to vector<16x32xf32>
      %88 = arith.subf %75, %87 : vector<16x32xf32>
      %cst_55 = arith.constant 9.99999974E-6 : f32
      %89 = vector.broadcast %cst_55 : f32 to vector<16x1xf32>
      %90 = arith.addf %86, %89 : vector<16x1xf32>
      %91 = math.rsqrt %90 : vector<16x1xf32>
      %92 = vector.broadcast %91 : vector<16x1xf32> to vector<16x32xf32>
      %93 = arith.mulf %88, %92 : vector<16x32xf32>
      %c0_56 = arith.constant 0 : index
      %c0_57 = arith.constant 0 : index
      %94 = vector.load %arg14[%c0_56, %c0_57] : memref<1x32xf32, #tpu.memory_space<vmem>>, vector<1x32xf32>
      %95 = vector.shape_cast %94 : vector<1x32xf32> to vector<32xf32>
      %96 = vector.shape_cast %95 : vector<32xf32> to vector<1x32xf32>
      %97 = vector.broadcast %96 : vector<1x32xf32> to vector<16x32xf32>
      %98 = arith.mulf %93, %97 : vector<16x32xf32>
      %c0_58 = arith.constant 0 : index
      %c0_59 = arith.constant 0 : index
      %99 = vector.load %arg15[%c0_58, %c0_59] : memref<1x32xf32, #tpu.memory_space<vmem>>, vector<1x32xf32>
      %100 = vector.shape_cast %99 : vector<1x32xf32> to vector<32xf32>
      %101 = vector.shape_cast %100 : vector<32xf32> to vector<1x32xf32>
      %102 = vector.broadcast %101 : vector<1x32xf32> to vector<16x32xf32>
      %103 = arith.addf %98, %102 : vector<16x32xf32>
      %104 = vector.shape_cast %103 : vector<16x32xf32> to vector<2x8x32xf32>
      %c0_60 = arith.constant 0 : index
      %c0_61 = arith.constant 0 : index
      %c0_62 = arith.constant 0 : index
      %105 = vector.load %arg16[%c0_60, %c0_61, %c0_62] : memref<2x8x32xf32, #tpu.memory_space<vmem>>, vector<2x8x32xf32>
      tpu.vector_store %arg16[%c0_60, %c0_61, %c0_62], %104 {strides = array<i32>} : memref<2x8x32xf32, #tpu.memory_space<vmem>>, vector<2x8x32xf32>,
    } else {
    }
    return
  }
  func.func @transform_0(%arg0: i32, %arg1: i32) -> (i32, i32, i32) {
    %c0_i32 = arith.constant 0 : i32
    %c0_i32_0 = arith.constant 0 : i32
    %c0_i32_1 = arith.constant 0 : i32
    return %arg0, %c0_i32, %c0_i32_0 : i32, i32, i32
  }
  func.func @transform_1(%arg0: i32, %arg1: i32) -> (i32, i32, i32) {
    %c0_i32 = arith.constant 0 : i32
    %c0_i32_0 = arith.constant 0 : i32
    %c0_i32_1 = arith.constant 0 : i32
    return %arg0, %c0_i32, %c0_i32_0 : i32, i32, i32
  }
  func.func @transform_2(%arg0: i32, %arg1: i32) -> (i32, i32, i32) {
    %c0_i32 = arith.constant 0 : i32
    %c0_i32_0 = arith.constant 0 : i32
    return %arg1, %arg0, %c0_i32 : i32, i32, i32
  }
  func.func @transform_3(%arg0: i32, %arg1: i32) -> (i32, i32, i32) {
    %c0_i32 = arith.constant 0 : i32
    %c0_i32_0 = arith.constant 0 : i32
    return %arg1, %arg0, %c0_i32 : i32, i32, i32
  }
  func.func @transform_4(%arg0: i32, %arg1: i32) -> (i32, i32) {
    %c0_i32 = arith.constant 0 : i32
    %c0_i32_0 = arith.constant 0 : i32
    %c0_i32_1 = arith.constant 0 : i32
    return %c0_i32, %c0_i32_0 : i32, i32
  }
  func.func @transform_5(%arg0: i32, %arg1: i32) -> (i32, i32) {
    %c0_i32 = arith.constant 0 : i32
    %c0_i32_0 = arith.constant 0 : i32
    %c0_i32_1 = arith.constant 0 : i32
    return %c0_i32, %c0_i32_0 : i32, i32
  }
  func.func @transform_6(%arg0: i32, %arg1: i32) -> (i32, i32) {
    %c0_i32 = arith.constant 0 : i32
    %c0_i32_0 = arith.constant 0 : i32
    %c0_i32_1 = arith.constant 0 : i32
    return %c0_i32, %c0_i32_0 : i32, i32
  }
  func.func @transform_7(%arg0: i32, %arg1: i32) -> (i32, i32) {
    %c0_i32 = arith.constant 0 : i32
    %c0_i32_0 = arith.constant 0 : i32
    %c0_i32_1 = arith.constant 0 : i32
    return %c0_i32, %c0_i32_0 : i32, i32
  }
  func.func @transform_8(%arg0: i32, %arg1: i32) -> (i32, i32) {
    %c0_i32 = arith.constant 0 : i32
    %c0_i32_0 = arith.constant 0 : i32
    %c0_i32_1 = arith.constant 0 : i32
    return %c0_i32, %c0_i32_0 : i32, i32
  }
  func.func @transform_9(%arg0: i32, %arg1: i32) -> (i32, i32) {
    %c0_i32 = arith.constant 0 : i32
    %c0_i32_0 = arith.constant 0 : i32
    %c0_i32_1 = arith.constant 0 : i32
    return %c0_i32, %c0_i32_0 : i32, i32
  }
  func.func @transform_10(%arg0: i32, %arg1: i32) -> (i32, i32) {
    %c0_i32 = arith.constant 0 : i32
    %c0_i32_0 = arith.constant 0 : i32
    %c0_i32_1 = arith.constant 0 : i32
    return %c0_i32, %c0_i32_0 : i32, i32
  }
  func.func @transform_11(%arg0: i32, %arg1: i32) -> (i32, i32) {
    %c0_i32 = arith.constant 0 : i32
    %c0_i32_0 = arith.constant 0 : i32
    %c0_i32_1 = arith.constant 0 : i32
    return %c0_i32, %c0_i32_0 : i32, i32
  }
  func.func @transform_12(%arg0: i32, %arg1: i32) -> (i32, i32) {
    %c0_i32 = arith.constant 0 : i32
    %c0_i32_0 = arith.constant 0 : i32
    %c0_i32_1 = arith.constant 0 : i32
    return %c0_i32, %c0_i32_0 : i32, i32
  }
  func.func @transform_13(%arg0: i32, %arg1: i32) -> (i32, i32) {
    %c0_i32 = arith.constant 0 : i32
    %c0_i32_0 = arith.constant 0 : i32
    %c0_i32_1 = arith.constant 0 : i32
    return %c0_i32, %c0_i32_0 : i32, i32
  }
  func.func @transform_14(%arg0: i32, %arg1: i32) -> (i32, i32, i32) {
    %c0_i32 = arith.constant 0 : i32
    %c0_i32_0 = arith.constant 0 : i32
    %c0_i32_1 = arith.constant 0 : i32
    return %arg0, %c0_i32, %c0_i32_0 : i32, i32, i32
  }
}

</mosaic_0001>

<bundles_post_ra>
// kernel: tpu_custom_call.1
= control target key start
LH: loop header
LB: loop body
LE: loop exit
PB: predicated region body
PF: predicated region fallthrough
CT: control target
= control target key end

     0   :  { %s8770_s0 = inlined_call_operand.vmem [shape: f32[2,8,32], index: 0, kind: input, shape index: {}]   ;;  %s8771_s1 = inlined_call_operand.vmem [shape: f32[2,8,32], index: 1, kind: input, shape index: {}]   ;;  %s8772_s2 = inlined_call_operand.vmem [shape: f32[64,2,32], index: 2, kind: input, shape index: {}]   ;;  %s8773_s3 = inlined_call_operand.vmem [shape: f32[64,2,32], index: 3, kind: input, shape index: {}]   ;;  %s8774_s4 = inlined_call_operand.vmem [shape: f32[32,32], index: 4, kind: input, shape index: {}]   ;;  %s8775_s5 = inlined_call_operand.vmem [shape: f32[32,32], index: 5, kind: input, shape index: {}]   ;;  %s8776_s6 = inlined_call_operand.vmem [shape: f32[32,32], index: 6, kind: input, shape index: {}]   ;;  %s8777_s7 = inlined_call_operand.vmem [shape: f32[32,32], index: 7, kind: input, shape index: {}]   ;;  %s8778_s8 = inlined_call_operand.vmem [shape: f32[1,32], index: 8, kind: input, shape index: {}]   ;;  %s8779_s9 = inlined_call_operand.vmem [shape: f32[1,32], index: 9, kind: input, shape index: {}]   ;;  %s8780_s10 = inlined_call_operand.vmem [shape: f32[1,32], index: 10, kind: input, shape index: {}]   ;;  %s8781_s11 = inlined_call_operand.vmem [shape: f32[1,32], index: 11, kind: input, shape index: {}]   ;;  %s8782_s12 = inlined_call_operand.vmem [shape: f32[1,32], index: 12, kind: input, shape index: {}]   ;;  %s8783_s13 = inlined_call_operand.vmem [shape: f32[1,32], index: 13, kind: input, shape index: {}]   ;;  %s8784_s14 = inlined_call_operand.hbm [shape: f32[2,8,32], index: 14, kind: output, shape index: {}]  }
   0x1   :  { %8824 = sst [smem:[#allocation29_spill]] %s8772_s2 }
   0x2   :  { %19 = vsyncpa [#allocation7], 0  ;;  %s7094_s29 = smov 0   ;;  %s7096_s30 = smov 0  }
   0x3   :  { %s7098_s15 = smov 0  }
   0x4 LB: > { %s34_s17 = sadd.s32 1, %s6992_s30  ;;  %p6414_p1 = scmp.ge.s32.totalorder %s6996_s15, 1  ;;  %s6996_s15 = sphi %s7098_s15, %s25_s15   ;;  %s6992_s30 = sphi %s7096_s30, %s8905_s30   ;;  %s6988_s29 = sphi %s7094_s29, %s8904_s29  }
   0x5   : > { %p35_p0 = scmp.ge.s32.totalorder %s34_s17, 2  ;;  %p469_p2 = scmp.lt.s32.totalorder %s6996_s15, 3 }
   0x7   : > { %s8907_s17 = smov (%p35_p0, %s34_s17), 0  ;;  %p470_p3 = pnand %p6414_p1, %p469_p2 }
   0x9   : > { %473 = sbr.rel (%p470_p3) target bundleno = 2477 (0x9ad), region = 76 }
  0x10   : > { %s6415_s18 = sshll.u32 %s6988_s29, 5  ;;  %s8825_s2 = sld [smem:[#allocation29_spill]] }
  0x11   : > { %p544_p4 = scmp.lt.s32.totalorder %s6415_s18, 63  ;;  %p6419_p5 = scmp.ne.s32.totalorder %s6988_s29, 0 }
  0x12   : > { %v572_v0 = vld [vmem:[%s8774_s4] sm:$0xff] (!%p6419_p5)  ;;  %v573_v1 = vld [vmem:[%s8774_s4 + $0x8] sm:$0xff] (!%p6419_p5)  ;;  %v574_v2 = vld [vmem:[%s8774_s4 + $0x10] sm:$0xff] (!%p6419_p5)  ;;  %vm583_vm0 = vcmask (!%p6419_p5), 261120   ;;  %vm957_vm1 = vcmask (!%p6419_p5), 64512   ;;  %v6999_v13 = vmov (!%p6419_p5), 0.0   ;;  %v690_v21 = vlaneseq (!%p6419_p5) }
  0x13   : > { %s8909_s18 = smov (!%p544_p4, %s6415_s18), 63  ;;  %565 = sbr.rel (%p6419_p5) target bundleno = 389 (0x185), region = 80 }
  0x14   : > { %s6416_s19 = sshll.u32 %s8909_s18, 1  ;;  %v6789_v3 = vpack.c.bf16 (!%p6419_p5), %v573_v1, %v572_v0  ;;  %v575_v4 = vld [vmem:[%s8774_s4 + $0x18] sm:$0xff] (!%p6419_p5)  ;;  %v566_v5 = vld [vmem:[%s8770_s0] sm:$0xff] (!%p6419_p5)  ;;  %v567_v9 = vld [vmem:[%s8770_s0 + $0x8] sm:$0xff] (!%p6419_p5)  ;;  %v6998_v12 = vmov (!%p6419_p5), -1e+30  }
  0x15   : > { %s7124_s25 = scalar_lea.vmem %s8773_s3, %s6416_s19  ;;  %v568_v6 = vld [vmem:[%s8771_s1] sm:$0xff] (!%p6419_p5)  ;;  %v6793_v7 = vpack.c.bf16 (!%p6419_p5), %v575_v4, %v574_v2  ;;  %v569_v10 = vld [vmem:[%s8771_s1 + $0x8] sm:$0xff] (!%p6419_p5)  ;;  %966 = vst.msk [vmem:[#allocation3] sm:$0xff] (!%p6419_p5), %vm957_vm1, %v6998_v12  ;;  %967 = vst.msk [vmem:[#allocation4] sm:$0xff] (!%p6419_p5), %vm957_vm1, %v6999_v13  ;;  %s7000_s21 = smov (!%p6419_p5), 112   ;;  %v691_v25 = vshrl.u32 (!%p6419_p5), %v690_v21, 7 }
  0x16   : > { %s7119_s22 = scalar_lea.vmem %s8825_s2, %s6416_s19  ;;  %v570_v8 = vadd.f32 (!%p6419_p5), %v568_v6, %v566_v5  ;;  %6790 = vmatprep.subr.bf16.mxu0 (!%p6419_p5), %v6789_v3  ;;  %v571_v11 = vadd.f32 (!%p6419_p5), %v569_v10, %v567_v9  ;;  %968 = vst.msk [vmem:[#allocation5] sm:$0xff] (!%p6419_p5), %vm957_vm1, %v6999_v13  ;;  %969 = vst.msk [vmem:[#allocation5 + $0x8] sm:$0xff] (!%p6419_p5), %vm957_vm1, %v6999_v13  ;;  %v6420_v14 = vld [vmem:[%s8778_s8] ss:$0 sm:$0xff] (!%p6419_p5)  ;;  %s7001_s23 = smov (!%p6419_p5), 120  }
  0x17   : > { %6792 = vmatpush3.bf16.msra.mxu0 (!%p6419_p5), %v6789_v3  ;;  %970 = vst.msk [vmem:[#allocation5 + $0x10] sm:$0xff] (!%p6419_p5), %vm957_vm1, %v6999_v13  ;;  %971 = vst.msk [vmem:[#allocation5 + $0x18] sm:$0xff] (!%p6419_p5), %vm957_vm1, %v6999_v13  ;;  %s7002_s19 = smov (!%p6419_p5), 104   ;;  %v7003_v19 = vmov (!%p6419_p5), 1983009808  }
  0x18   : > { %6607 = vmatprep.mubr.msk.f32.mxu0 (!%p6419_p5), %vm583_vm0, %v570_v8  ;;  %6794 = vmatprep.subr.bf16.mxu0 (!%p6419_p5), %v6793_v7  ;;  %972 = vst.msk [vmem:[#allocation5 + $0x20] sm:$0xff] (!%p6419_p5), %vm957_vm1, %v6999_v13  ;;  %973 = vst.msk [vmem:[#allocation5 + $0x28] sm:$0xff] (!%p6419_p5), %vm957_vm1, %v6999_v13  ;;  %v688_v20 = vunpack.c.l.s4 (!%p6419_p5), %v7003_v19  ;;  %v7004_v26 = vmov (!%p6419_p5), 1934713408  }
  0x19   : > { %974 = vst.msk [vmem:[#allocation5 + $0x30] sm:$0xff] (!%p6419_p5), %vm957_vm1, %v6999_v13  ;;  %975 = vst.msk [vmem:[#allocation5 + $0x38] sm:$0xff] (!%p6419_p5), %vm957_vm1, %v6999_v13  ;;  %v720_v27 = vunpack.c.l.s4 (!%p6419_p5), %v7004_v26 }
  0x1a   : > { %v689_v24 = vunpack.c.0.s8 %v688_v20 }
  0x1b   : > { %6796 = vmatpush3.bf16.msra.mxu0 %v6793_v7  ;;  %v721_v33 = vunpack.c.0.s8 %v720_v27 }
  0x1c   : > { %v692_v30 = vsub.s32 %v689_v24, %v691_v25 }
  0x1d   : > { %v724_v44 = vsub.s32 %v721_v33, %v691_v25 }
  0x1e   : > { %6608 = vmatmul.mubr.msk.f32.vlgmr.msra.gmra.mrb[0].mxu0 %vm583_vm0, %v571_v11 }
  0xf1   : > { %v6609_v15 = vpop.f32.mrb[0].mxu0 }
  0xf2   : > { %v662_v16 = vadd.f32 %v6609_v15, %v6420_v14  ;;  %v656_v17 = vpop.f32.mrb[1].mxu0 }
  0xf3   : > { %v657_v18 = vadd.f32 %v6420_v14, %v656_v17 }
  0xf4   : > { %675 = vrot.lane.b32.xlu1 %v662_v16, %s7000_s21  ;;  %669 = vrot.lane.b32.xlu0 %v662_v16, %s7001_s23 }
  0xf8   : > { %673 = vrot.lane.b32.xlu1 %v657_v18, %s7000_s21  ;;  %667 = vrot.lane.b32.xlu0 %v657_v18, %s7001_s23 }
  0xfc   : > { %681 = vrot.lane.b32.xlu1 %v662_v16, %s7002_s19  ;;  %679 = vrot.lane.b32.xlu0 %v657_v18, %s7002_s19 }
 0x166   : > { %v676_v22 = vpop.permute.xlu1 %675  ;;  %v670_v23 = vpop.permute.xlu0 %669 }
 0x167   : > { %v753_v31 = vcombine.low %v662_v16, %v676_v22  ;;  %v754_v32 = vcombine.high %v662_v16, %v676_v22 }
 0x169   : > { %v761_v42 = vrot.slane %v753_v31, %v692_v30  ;;  %v768_v43 = vrot.slane %v754_v32, %v692_v30 }
 0x16a   : > { %v674_v28 = vpop.permute.xlu1 %673  ;;  %v668_v29 = vpop.permute.xlu0 %667 }
 0x16b   : > { %v685_v34 = vcombine.low %v657_v18, %v674_v28  ;;  %v686_v35 = vcombine.high %v657_v18, %v674_v28 }
 0x16d   : > { %v693_v49 = vrot.slane %v685_v34, %v692_v30  ;;  %v700_v50 = vrot.slane %v686_v35, %v692_v30 }
 0x16e   : > { %v682_v36 = vpop.permute.xlu1 %681  ;;  %v680_v37 = vpop.permute.xlu0 %679 }
 0x16f   : > { %v769_v38 = vcombine.low %v670_v23, %v682_v36  ;;  %v770_v39 = vcombine.high %v670_v23, %v682_v36  ;;  %v701_v40 = vcombine.low %v668_v29, %v680_v37  ;;  %v702_v41 = vcombine.high %v668_v29, %v680_v37 }
 0x171   : > { %v777_v45 = vrot.slane %v769_v38, %v692_v30  ;;  %v784_v46 = vrot.slane %v770_v39, %v692_v30  ;;  %v709_v47 = vrot.slane %v701_v40, %v692_v30  ;;  %v716_v48 = vrot.slane %v702_v41, %v692_v30 }
 0x173   : > { %v785_v51 = vcombine.low %v761_v42, %v777_v45  ;;  %v786_v52 = vcombine.high %v761_v42, %v777_v45  ;;  %v801_v53 = vcombine.low %v768_v43, %v784_v46  ;;  %v802_v54 = vcombine.high %v768_v43, %v784_v46 }
 0x174   : > { %v717_v55 = vcombine.low %v693_v49, %v709_v47  ;;  %v718_v56 = vcombine.high %v693_v49, %v709_v47  ;;  %v733_v57 = vcombine.low %v700_v50, %v716_v48  ;;  %v734_v58 = vcombine.high %v700_v50, %v716_v48 }
 0x175   : > { %v793_v59 = vrot.slane %v785_v51, %v724_v44  ;;  %v800_v60 = vrot.slane %v786_v52, %v724_v44  ;;  %v809_v61 = vrot.slane %v801_v53, %v724_v44  ;;  %v816_v62 = vrot.slane %v802_v54, %v724_v44 }
 0x176   : > { %v725_v63 = vrot.slane %v717_v55, %v724_v44  ;;  %v732_v0 = vrot.slane %v718_v56, %v724_v44  ;;  %v741_v1 = vrot.slane %v733_v57, %v724_v44  ;;  %v748_v2 = vrot.slane %v734_v58, %v724_v44 }
 0x177   : > { %v889_v3 = vcombine.low %v793_v59, %v800_v60  ;;  %v6425_v4 = vcombine.high %v793_v59, %v800_v60  ;;  %v905_v5 = vcombine.low %v809_v61, %v816_v62  ;;  %v6426_v6 = vcombine.high %v809_v61, %v816_v62 }
 0x178   : > { %v821_v7 = vcombine.low %v725_v63, %v732_v0  ;;  %v6423_v8 = vcombine.high %v725_v63, %v732_v0  ;;  %v837_v9 = vcombine.low %v741_v1, %v748_v2  ;;  %v6424_v10 = vcombine.high %v741_v1, %v748_v2 }
 0x179   : > { %v896_v11 = vrot.slane %v889_v3, %v692_v30  ;;  %v904_v12 = vrot.slane %v6425_v4, %v692_v30  ;;  %v912_v13 = vrot.slane %v905_v5, %v692_v30  ;;  %v920_v14 = vrot.slane %v6426_v6, %v692_v30 }
 0x17a   : > { %v828_v15 = vrot.slane %v821_v7, %v692_v30  ;;  %v836_v16 = vrot.slane %v6423_v8, %v692_v30  ;;  %v844_v17 = vrot.slane %v837_v9, %v692_v30  ;;  %v852_v18 = vrot.slane %v6424_v10, %v692_v30 }
 0x17b   : > { %v921_v19 = vcombine.low %v896_v11, %v904_v12  ;;  %v922_v20 = vcombine.high %v896_v11, %v904_v12  ;;  %v937_v21 = vcombine.low %v912_v13, %v920_v14  ;;  %v938_v22 = vcombine.high %v912_v13, %v920_v14 }
 0x17c   : > { %v853_v23 = vcombine.low %v828_v15, %v836_v16  ;;  %v854_v24 = vcombine.high %v828_v15, %v836_v16  ;;  %v869_v25 = vcombine.low %v844_v17, %v852_v18  ;;  %v870_v26 = vcombine.high %v844_v17, %v852_v18 }
 0x17d   : > { %v929_v27 = vrot.slane %v921_v19, %v724_v44  ;;  %v936_v28 = vrot.slane %v922_v20, %v724_v44  ;;  %v945_v29 = vrot.slane %v937_v21, %v724_v44  ;;  %v952_v31 = vrot.slane %v938_v22, %v724_v44 }
 0x17e   : > { %v861_v32 = vrot.slane %v853_v23, %v724_v44  ;;  %v868_v33 = vrot.slane %v854_v24, %v724_v44  ;;  %v877_v34 = vrot.slane %v869_v25, %v724_v44  ;;  %v884_v35 = vrot.slane %v870_v26, %v724_v44 }
 0x17f   : > { %v953_v36 = vcombine.low %v929_v27, %v945_v29  ;;  %v954_v37 = vcombine.high %v929_v27, %v945_v29  ;;  %v955_v38 = vcombine.low %v936_v28, %v952_v31  ;;  %v956_v30 = vcombine.high %v936_v28, %v952_v31 }
 0x180   : > { %v885_v39 = vcombine.low %v861_v32, %v877_v34  ;;  %v886_v40 = vcombine.high %v861_v32, %v877_v34  ;;  %v887_v41 = vcombine.low %v868_v33, %v884_v35  ;;  %v888_v42 = vcombine.high %v868_v33, %v884_v35 }
 0x181   : > { %962 = vst.msk [vmem:[#allocation2 + $0x20] sm:$0xff] %vm957_vm1, %v953_v36  ;;  %963 = vst.msk [vmem:[#allocation2 + $0x28] sm:$0xff] %vm957_vm1, %v954_v37 }
 0x182   : > { %964 = vst.msk [vmem:[#allocation2 + $0x30] sm:$0xff] %vm957_vm1, %v955_v38  ;;  %965 = vst.msk [vmem:[#allocation2 + $0x38] sm:$0xff] %vm957_vm1, %v956_v30 }
 0x183   : > { %958 = vst.msk [vmem:[#allocation2] sm:$0xff] %vm957_vm1, %v885_v39  ;;  %959 = vst.msk [vmem:[#allocation2 + $0x8] sm:$0xff] %vm957_vm1, %v886_v40 }
 0x184   : > { %960 = vst.msk [vmem:[#allocation2 + $0x10] sm:$0xff] %vm957_vm1, %v887_v41  ;;  %961 = vst.msk [vmem:[#allocation2 + $0x18] sm:$0xff] %vm957_vm1, %v888_v42 }
 0x185 PF: > { %v1072_v43 = vld [vmem:[%s8775_s5] sm:$0xff]  ;;  %v1073_v44 = vld [vmem:[%s8775_s5 + $0x8] sm:$0xff]  ;;  %v1074_v45 = vld [vmem:[%s8775_s5 + $0x10] sm:$0xff]  ;;  %v8785_v46 = vlaneseq  ;;  %v7005_v51 = vmov 1983009808   ;;  %vm1251_vm2 = vcmask 261120  }
 0x186   : > { %v6797_v47 = vpack.c.bf16 %v1073_v44, %v1072_v43  ;;  %v1075_v48 = vld [vmem:[%s8775_s5 + $0x18] sm:$0xff]  ;;  %v7185_v49 = vld [vmem:[%s7119_s22] sm:$0x3]  ;;  %v7188_v50 = vld [vmem:[%s7119_s22 + $0x2] sm:$0x3]  ;;  %v1118_v52 = vunpack.c.l.s4 %v7005_v51  ;;  %s7006_s21 = smov 112  }
 0x187   : > { %v6801_v53 = vpack.c.bf16 %v1075_v48, %v1074_v45  ;;  %v7191_v54 = vld [vmem:[%s7119_s22 + $0x4] sm:$0x3]  ;;  %v7194_v55 = vld [vmem:[%s7119_s22 + $0x6] sm:$0x3]  ;;  %v1008_v56 = vld [vmem:[%s7124_s25] sm:$0x3] }
 0x188   : > { %6798 = vmatprep.subr.bf16.mxu0 %v6797_v47  ;;  %v1009_v57 = vld [vmem:[%s7124_s25 + $0x2] sm:$0x3]  ;;  %v1010_v58 = vld [vmem:[%s7124_s25 + $0x4] sm:$0x3]  ;;  %v1011_v59 = vld [vmem:[%s7124_s25 + $0x6] sm:$0x3]  ;;  %v1040_v60 = vadd.f32 %v1008_v56, %v7185_v49  ;;  %v1119_v61 = vunpack.c.0.s8 %v1118_v52 }
 0x189   : > { %6800 = vmatpush3.bf16.msra.mxu0 %v6797_v47  ;;  %v1041_v62 = vadd.f32 %v1009_v57, %v7188_v50  ;;  %v1042_v63 = vadd.f32 %v1010_v58, %v7191_v54  ;;  %v1043_v0 = vadd.f32 %v1011_v59, %v7194_v55  ;;  %v7205_v1 = vshrl.u32 %v8785_v46, 7  ;;  %v7208_v2 = vld [vmem:[%s7119_s22 + $0x8] sm:$0x3]  ;;  %v7211_v3 = vld [vmem:[%s7119_s22 + $0xa] sm:$0x3]  ;;  %s7007_s23 = smov 120  }
 0x18a   : > { %6802 = vmatprep.subr.bf16.mxu0 %v6801_v53  ;;  %v7214_v4 = vld [vmem:[%s7119_s22 + $0xc] sm:$0x3]  ;;  %v7217_v5 = vld [vmem:[%s7119_s22 + $0xe] sm:$0x3]  ;;  %v1012_v6 = vld [vmem:[%s7124_s25 + $0x8] sm:$0x3] }
 0x18b   : > { %8826 = vst [vmem:[#allocation9_spill] sm:$0xff] %v7205_v1  ;;  %v1115_v7 = vcombine.low %v1040_v60, %v1041_v62  ;;  %v1116_v8 = vcombine.low %v1042_v63, %v1043_v0  ;;  %v7221_v9 = vsub.s32 %v1119_v61, %v7205_v1  ;;  %v1013_v10 = vld [vmem:[%s7124_s25 + $0xa] sm:$0x3]  ;;  %v1014_v11 = vld [vmem:[%s7124_s25 + $0xc] sm:$0x3]  ;;  %v1044_v13 = vadd.f32 %v1012_v6, %v7208_v2  ;;  %s7008_s19 = smov 104  }
 0x18c   : > { %v1015_v12 = vld [vmem:[%s7124_s25 + $0xe] sm:$0x3]  ;;  %v1045_v14 = vadd.f32 %v1013_v10, %v7211_v3  ;;  %v1046_v15 = vadd.f32 %v1014_v11, %v7214_v4  ;;  %v7231_v17 = vld [vmem:[%s7119_s22 + $0x10] sm:$0x3]  ;;  %v7234_v18 = vld [vmem:[%s7119_s22 + $0x12] sm:$0x3] }
 0x18d   : > { %v1047_v16 = vadd.f32 %v1015_v12, %v7217_v5  ;;  %v7237_v19 = vld [vmem:[%s7119_s22 + $0x14] sm:$0x3]  ;;  %6804 = vmatpush3.bf16.msra.mxu0 %v6801_v53  ;;  %v1123_v20 = vrot.slane %v1115_v7, %v7221_v9  ;;  %v1130_v21 = vrot.slane %v1116_v8, %v7221_v9  ;;  %v7242_v22 = vld [vmem:[%s7119_s22 + $0x16] sm:$0x3]  ;;  %v1016_v23 = vld [vmem:[%s7124_s25 + $0x10] sm:$0x3] }
 0x18e   : > { %v1017_v24 = vld [vmem:[%s7124_s25 + $0x12] sm:$0x3]  ;;  %v1132_v25 = vcombine.low %v1044_v13, %v1045_v14  ;;  %v1018_v27 = vld [vmem:[%s7124_s25 + $0x14] sm:$0x3]  ;;  %v1019_v28 = vld [vmem:[%s7124_s25 + $0x16] sm:$0x3]  ;;  %v1048_v29 = vadd.f32 %v1016_v23, %v7231_v17 }
 0x18f   : > { %v1133_v26 = vcombine.low %v1046_v15, %v1047_v16  ;;  %v1049_v31 = vadd.f32 %v1017_v24, %v7234_v18  ;;  %v7251_v32 = vld [vmem:[%s7119_s22 + $0x18] sm:$0x3]  ;;  %v1131_v33 = vcombine.low %v1123_v20, %v1130_v21  ;;  %v1050_v34 = vadd.f32 %v1018_v27, %v7237_v19  ;;  %v7256_v36 = vld [vmem:[%s7119_s22 + $0x1a] sm:$0x3]  ;;  %v7259_v37 = vld [vmem:[%s7119_s22 + $0x1c] sm:$0x3] }
 0x190   : > { %8827 = vst [vmem:[#allocation10_spill] sm:$0xff] %v7251_v32  ;;  %v1051_v35 = vadd.f32 %v1019_v28, %v7242_v22  ;;  %8828 = vst [vmem:[#allocation11_spill] sm:$0xff] %v7259_v37  ;;  %v7262_v38 = vld [vmem:[%s7119_s22 + $0x1e] sm:$0x3]  ;;  %v1140_v30 = vrot.slane %v1132_v25, %v7221_v9  ;;  %v1020_v41 = vld [vmem:[%s7124_s25 + $0x18] sm:$0x3] }
 0x191   : > { %8829 = vst [vmem:[#allocation12_spill] sm:$0xff] %v7262_v38  ;;  %v1147_v39 = vrot.slane %v1133_v26, %v7221_v9  ;;  %v1149_v40 = vcombine.low %v1048_v29, %v1049_v31  ;;  %v1021_v42 = vld [vmem:[%s7124_s25 + $0x1a] sm:$0x3]  ;;  %v1022_v43 = vld [vmem:[%s7124_s25 + $0x1c] sm:$0x3]  ;;  %6618 = vmatprep.mubr.msk.f32.mxu0 %vm1251_vm2, %v1131_v33  ;;  %v1052_v47 = vadd.f32 %v1020_v41, %v7251_v32  ;;  %vm7011_vm3 = vmmov 0  }
 0x192   : > { %v1150_v44 = vcombine.low %v1050_v34, %v1051_v35  ;;  %v1023_v45 = vld [vmem:[%s7124_s25 + $0x1e] sm:$0x3]  ;;  %v1053_v48 = vadd.f32 %v1021_v42, %v7256_v36  ;;  %v1054_v51 = vadd.f32 %v1022_v43, %v7259_v37  ;;  %v7275_v52 = vld [vmem:[%s7119_s22 + $0x20] sm:$0x3]  ;;  %v7278_v53 = vld [vmem:[%s7119_s22 + $0x22] sm:$0x3] }
 0x193   : > { %8830 = vst [vmem:[#allocation13_spill] sm:$0xff] %v7275_v52  ;;  %8831 = vst [vmem:[#allocation14_spill] sm:$0xff] %v7278_v53  ;;  %v1148_v56 = vcombine.low %v1140_v30, %v1147_v39  ;;  %v1157_v57 = vrot.slane %v1149_v40, %v7221_v9  ;;  %v1055_v58 = vadd.f32 %v1023_v45, %v7262_v38  ;;  %v7283_v59 = vld [vmem:[%s7119_s22 + $0x24] sm:$0x3]  ;;  %v7286_v60 = vld [vmem:[%s7119_s22 + $0x26] sm:$0x3] }
 0x194   : > { %8832 = vst [vmem:[#allocation15_spill] sm:$0xff] %v7283_v59  ;;  %8833 = vst [vmem:[#allocation16_spill] sm:$0xff] %v7286_v60  ;;  %v1024_v61 = vld [vmem:[%s7124_s25 + $0x20] sm:$0x3]  ;;  %v1164_v62 = vrot.slane %v1150_v44, %v7221_v9  ;;  %v1166_v63 = vcombine.low %v1052_v47, %v1053_v48  ;;  %v1025_v0 = vld [vmem:[%s7124_s25 + $0x22] sm:$0x3] }
 0x195   : > { %v1026_v6 = vld [vmem:[%s7124_s25 + $0x24] sm:$0x3]  ;;  %v1027_v7 = vld [vmem:[%s7124_s25 + $0x26] sm:$0x3]  ;;  %v1056_v8 = vadd.f32 %v1024_v61, %v7275_v52  ;;  %6619 = vmatmul.mubr.msk.f32.vlgmr.msra.gmra.mrb[0].mxu0 %vm1251_vm2, %v1148_v56  ;;  %v1167_v10 = vcombine.low %v1054_v51, %v1055_v58  ;;  %v1057_v11 = vadd.f32 %v1025_v0, %v7278_v53  ;;  %v7299_v14 = vld [vmem:[%s7119_s22 + $0x28] sm:$0x3] }
 0x196   : > { %v1058_v12 = vadd.f32 %v1026_v6, %v7283_v59  ;;  %v1059_v13 = vadd.f32 %v1027_v7, %v7286_v60  ;;  %8834 = vst [vmem:[#allocation17_spill] sm:$0xff] %v7299_v14  ;;  %v7302_v15 = vld [vmem:[%s7119_s22 + $0x2a] sm:$0x3]  ;;  %v7305_v16 = vld [vmem:[%s7119_s22 + $0x2c] sm:$0x3]  ;;  %v1165_v20 = vcombine.low %v1157_v57, %v1164_v62  ;;  %v1174_v21 = vrot.slane %v1166_v63, %v7221_v9  ;;  %p6493_p6 = scmp.ne.s32.totalorder %s6988_s29, 1 }
 0x197   : > { %8835 = vst [vmem:[#allocation18_spill] sm:$0xff] %v7302_v15  ;;  %8836 = vst [vmem:[#allocation19_spill] sm:$0xff] %v7305_v16  ;;  %v7309_v23 = vld [vmem:[%s7119_s22 + $0x2e] sm:$0x3]  ;;  %v1028_v24 = vld [vmem:[%s7124_s25 + $0x28] sm:$0x3]  ;;  %v1181_v26 = vrot.slane %v1167_v10, %v7221_v9  ;;  %v1183_v27 = vcombine.low %v1056_v8, %v1057_v11 }
 0x198   : > { %8837 = vst [vmem:[#allocation20_spill] sm:$0xff] %v7309_v23  ;;  %v1029_v25 = vld [vmem:[%s7124_s25 + $0x2a] sm:$0x3]  ;;  %v1184_v28 = vcombine.low %v1058_v12, %v1059_v13  ;;  %v1030_v29 = vld [vmem:[%s7124_s25 + $0x2c] sm:$0x3]  ;;  %v1060_v33 = vadd.f32 %v1028_v24, %v7299_v14  ;;  %6621 = vmatprep.mubr.msk.f32.mxu0 %vm1251_vm2, %v1165_v20  ;;  %vm4273_vm4 = vcmask 64512  }
 0x199   : > { %v1031_v31 = vld [vmem:[%s7124_s25 + $0x2e] sm:$0x3]  ;;  %v7318_v34 = vld [vmem:[%s7119_s22 + $0x30] sm:$0x3]  ;;  %v1061_v35 = vadd.f32 %v1029_v25, %v7302_v15  ;;  %v1062_v30 = vadd.f32 %v1030_v29, %v7305_v16  ;;  %v7325_v40 = vld [vmem:[%s7119_s22 + $0x32] sm:$0x3]  ;;  %v1182_v43 = vcombine.low %v1174_v21, %v1181_v26  ;;  %v1191_v44 = vrot.slane %v1183_v27, %v7221_v9 }
 0x19a   : > { %8838 = vst [vmem:[#allocation21_spill] sm:$0xff] %v7318_v34  ;;  %v1063_v39 = vadd.f32 %v1031_v31, %v7309_v23  ;;  %8839 = vst [vmem:[#allocation22_spill] sm:$0xff] %v7325_v40  ;;  %v7328_v41 = vld [vmem:[%s7119_s22 + $0x34] sm:$0x3]  ;;  %v7331_v42 = vld [vmem:[%s7119_s22 + $0x36] sm:$0x3]  ;;  %v1198_v45 = vrot.slane %v1184_v28, %v7221_v9 }
 0x19b   : > { %8840 = vst [vmem:[#allocation23_spill] sm:$0xff] %v7328_v41  ;;  %8841 = vst [vmem:[#allocation24_spill] sm:$0xff] %v7331_v42  ;;  %v1032_v47 = vld [vmem:[%s7124_s25 + $0x30] sm:$0x3]  ;;  %v1033_v48 = vld [vmem:[%s7124_s25 + $0x32] sm:$0x3]  ;;  %v1200_v56 = vcombine.low %v1060_v33, %v1061_v35  ;;  %6622 = vmatmul.mubr.msk.f32.gmra.mrb[2].mxu0 %vm1251_vm2, %v1182_v43 }
 0x19c   : > { %v1034_v51 = vld [vmem:[%s7124_s25 + $0x34] sm:$0x3]  ;;  %v1201_v57 = vcombine.low %v1062_v30, %v1063_v39  ;;  %v1035_v58 = vld [vmem:[%s7124_s25 + $0x36] sm:$0x3]  ;;  %v1064_v61 = vadd.f32 %v1032_v47, %v7318_v34  ;;  %v1065_v62 = vadd.f32 %v1033_v48, %v7325_v40  ;;  %v7342_v63 = vld [vmem:[%s7119_s22 + $0x38] sm:$0x3]  ;;  %v1199_v6 = vcombine.low %v1191_v44, %v1198_v45 }
 0x19d   : > { %8842 = vst [vmem:[#allocation25_spill] sm:$0xff] %v7342_v63  ;;  %v7345_v0 = vld [vmem:[%s7119_s22 + $0x3a] sm:$0x3]  ;;  %v1066_v7 = vadd.f32 %v1034_v51, %v7328_v41  ;;  %v1067_v8 = vadd.f32 %v1035_v58, %v7331_v42  ;;  %v7351_v10 = vld [vmem:[%s7119_s22 + $0x3c] sm:$0x3]  ;;  %v1208_v13 = vrot.slane %v1200_v56, %v7221_v9  ;;  %vm4925_vm5 = vcmask 1041409  }
 0x19e   : > { %8843 = vst [vmem:[#allocation26_spill] sm:$0xff] %v7345_v0  ;;  %8844 = vst [vmem:[#allocation27_spill] sm:$0xff] %v7351_v10  ;;  %v7354_v11 = vld [vmem:[%s7119_s22 + $0x3e] sm:$0x3]  ;;  %v1036_v12 = vld [vmem:[%s7124_s25 + $0x38] sm:$0x3]  ;;  %v1215_v20 = vrot.slane %v1201_v57, %v7221_v9  ;;  %v1217_v21 = vcombine.low %v1064_v61, %v1065_v62  ;;  %6624 = vmatprep.mubr.msk.f32.mxu0 %vm1251_vm2, %v1199_v6 }
 0x19f   : > { %8845 = vst [vmem:[#allocation28_spill] sm:$0xff] %v7354_v11  ;;  %v1037_v24 = vld [vmem:[%s7124_s25 + $0x3a] sm:$0x3]  ;;  %v1038_v25 = vld [vmem:[%s7124_s25 + $0x3c] sm:$0x3]  ;;  %v1068_v27 = vadd.f32 %v1036_v12, %v7342_v63  ;;  %v1218_v28 = vcombine.low %v1066_v7, %v1067_v8  ;;  %vm4927_vm6 = vcmask 1042434  }
 0x1a0   : > { %v1039_v26 = vld [vmem:[%s7124_s25 + $0x3e] sm:$0x3]  ;;  %v1069_v29 = vadd.f32 %v1037_v24, %v7345_v0  ;;  %v1070_v31 = vadd.f32 %v1038_v25, %v7351_v10  ;;  %v1216_v35 = vcombine.low %v1208_v13, %v1215_v20  ;;  %v1225_v30 = vrot.slane %v1217_v21, %v7221_v9  ;;  %v6427_v56 = vld [vmem:[%s8779_s9] ss:$0 sm:$0xff]  ;;  %s7013_s28 = smov (!%p6493_p6), 8   ;;  %s7014_s18 = smov (!%p6493_p6), 16  }
 0x1a1   : > { %v1071_v33 = vadd.f32 %v1039_v26, %v7354_v11  ;;  %v1232_v39 = vrot.slane %v1218_v28, %v7221_v9  ;;  %vm4929_vm7 = vcmask 1043459   ;;  %vm4931_vm8 = vcmask 1044484   ;;  %s7015_s2 = smov (!%p6493_p6), 24  }
 0x1a2   : > { %v1234_v43 = vcombine.low %v1068_v27, %v1069_v29  ;;  %6625 = vmatmul.mubr.msk.f32.gmra.mrb[4].mxu0 %vm1251_vm2, %v1216_v35  ;;  %v1373_v29 = vld [vmem:[%s8776_s6] sm:$0xff]  ;;  %v1416_v35 = vcombine.low %v7185_v49, %v7188_v50  ;;  %v1451_v49 = vcombine.low %v7237_v19, %v7242_v22  ;;  %vm4933_vm9 = vcmask 1045509  }
 0x1a3   : > { %v1235_v44 = vcombine.low %v1070_v31, %v1071_v33  ;;  %v1233_v45 = vcombine.low %v1225_v30, %v1232_v39  ;;  %v1374_v31 = vld [vmem:[%s8776_s6 + $0x8] sm:$0xff]  ;;  %v1375_v33 = vld [vmem:[%s8776_s6 + $0x10] sm:$0xff]  ;;  %v1417_v30 = vcombine.low %v7191_v54, %v7194_v55  ;;  %v1433_v39 = vcombine.low %v7208_v2, %v7211_v3 }
 0x1a4   : > { %v1242_v47 = vrot.slane %v1234_v43, %v7221_v9  ;;  %v1434_v43 = vcombine.low %v7214_v4, %v7217_v5  ;;  %v1424_v54 = vrot.slane %v1416_v35, %v7221_v9  ;;  %v8786_v2 = vmov 0.0  }
 0x1a5   : > { %v1249_v48 = vrot.slane %v1235_v44, %v7221_v9  ;;  %6627 = vmatprep.mubr.msk.f32.mxu0 %vm1251_vm2, %v1233_v45  ;;  %v6805_v44 = vpack.c.bf16 %v1374_v31, %v1373_v29  ;;  %v1376_v45 = vld [vmem:[%s8776_s6 + $0x18] sm:$0xff]  ;;  %v1431_v55 = vrot.slane %v1417_v30, %v7221_v9  ;;  %6650 = vmatprep.subr.mxu0 %v8786_v2  ;;  %vm4935_vm10 = vcmask 1046534  }
 0x1a6   : > { %v6809_v50 = vpack.c.bf16 %v1376_v45, %v1375_v33  ;;  %v1441_v3 = vrot.slane %v1433_v39, %v7221_v9  ;;  %v1448_v4 = vrot.slane %v1434_v43, %v7221_v9  ;;  %vm4937_vm11 = vcmask 1047559  }
 0x1a7   : > { %v1250_v51 = vcombine.low %v1242_v47, %v1249_v48  ;;  %v1450_v47 = vcombine.low %v7231_v17, %v7234_v18  ;;  %6806 = vmatprep.subr.bf16.mxu1 %v6805_v44  ;;  %v1432_v5 = vcombine.low %v1424_v54, %v1431_v55  ;;  %v1465_v18 = vrot.slane %v1451_v49, %v7221_v9 }
 0x1a8   : > { %6808 = vmatpush3.bf16.msra.mxu1 %v6805_v44  ;;  %v1449_v19 = vcombine.low %v1441_v3, %v1448_v4  ;;  %v7010_v48 = vmov 1934713408   ;;  %vm6150_vm12 = vcmask (!%p6493_p6), 130048   ;;  %vm6153_vm13 = vcmask (!%p6493_p6), 195584  }
 0x1a9   : > { %6628 = vmatmul.mubr.msk.f32.gmra.mrb[6].mxu0 %vm1251_vm2, %v1250_v51  ;;  %v1458_v17 = vrot.slane %v1450_v47, %v7221_v9  ;;  %6810 = vmatprep.subr.bf16.mxu1 %v6809_v50  ;;  %v1788_v51 = vunpack.c.l.s4 %v7010_v48 }
 0x1aa   : > { %6638 = vmatprep.mubr.msk.f32.mxu1 %vm1251_vm2, %v1432_v5 }
 0x1ab   : > { %v1466_v22 = vcombine.low %v1458_v17, %v1465_v18 }
 0x1ac   : > { %6812 = vmatpush3.bf16.msra.mxu1 %v6809_v50 }
 0x1ad   : > { %6655 = vmatprep.subr.mxu1 %v8786_v2 }
 0x1af   : > { %6639 = vmatmul.mubr.msk.f32.vlgmr.msra.gmra.mrb[0].mxu1 %vm1251_vm2, %v1449_v19 }
 0x1b0   : > { %6641 = vmatprep.mubr.msk.f32.mxu1 %vm1251_vm2, %v1466_v22 }
 0x268   : > { %v6620_v57 = vpop.f32.mrb[0].mxu0 }
 0x269   : > { %v7377_v58 = vadd.f32 %v6620_v57, %v6427_v56  ;;  %v1334_v61 = vpop.f32.mrb[1].mxu0 }
 0x26a   : > { %v7383_v62 = vadd.f32 %v6427_v56, %v1334_v61  ;;  %v1789_v61 = vunpack.c.0.s8 %v1788_v51 }
 0x26b   : > { %1707 = vrot.lane.b32.xlu1 %v7377_v58, %s7006_s21  ;;  %1683 = vrot.lane.b32.xlu0 %v7377_v58, %s7007_s23 }
 0x26c   : > { %v7479_v29 = vsub.s32 %v1789_v61, %v7205_v1 }
 0x26e   : > { %v6623_v6 = vpop.f32.mrb[2].mxu0 }
 0x26f   : > { %1731 = vrot.lane.b32.xlu1 %v7377_v58, %s7008_s19  ;;  %1681 = vrot.lane.b32.xlu0 %v7383_v62, %s7007_s23  ;;  %v1344_v7 = vpop.f32.mrb[3].mxu0  ;;  %v7389_v8 = vadd.f32 %v6623_v6, %v6427_v56 }
 0x270   : > { %v7391_v12 = vadd.f32 %v6427_v56, %v1344_v7 }
 0x273   : > { %1705 = vrot.lane.b32.xlu1 %v7383_v62, %s7006_s21  ;;  %1729 = vrot.lane.b32.xlu0 %v7383_v62, %s7008_s19 }
 0x275   : > { %v6626_v13 = vpop.f32.mrb[4].mxu0 }
 0x276   : > { %v1354_v20 = vpop.f32.mrb[5].mxu0  ;;  %v7405_v25 = vadd.f32 %v6626_v13, %v6427_v56 }
 0x277   : > { %1687 = vrot.lane.b32.xlu1 %v7389_v8, %s7007_s23  ;;  %1685 = vrot.lane.b32.xlu0 %v7391_v12, %s7007_s23  ;;  %v7407_v26 = vadd.f32 %v6427_v56, %v1354_v20 }
 0x27b   : > { %1711 = vrot.lane.b32.xlu1 %v7389_v8, %s7006_s21  ;;  %1709 = vrot.lane.b32.xlu0 %v7391_v12, %s7006_s21 }
 0x27c   : > { %v6629_v21 = vpop.f32.mrb[6].mxu0 }
 0x27d   : > { %v1364_v24 = vpop.f32.mrb[7].mxu0  ;;  %v7421_v27 = vadd.f32 %v6629_v21, %v6427_v56 }
 0x27e   : > { %v7423_v28 = vadd.f32 %v6427_v56, %v1364_v24 }
 0x27f   : > { %1735 = vrot.lane.b32.xlu1 %v7389_v8, %s7008_s19  ;;  %1733 = vrot.lane.b32.xlu0 %v7391_v12, %s7008_s19 }
 0x283   : > { %1691 = vrot.lane.b32.xlu1 %v7405_v25, %s7007_s23  ;;  %1689 = vrot.lane.b32.xlu0 %v7407_v26, %s7007_s23 }
 0x287   : > { %1715 = vrot.lane.b32.xlu1 %v7405_v25, %s7006_s21  ;;  %1713 = vrot.lane.b32.xlu0 %v7407_v26, %s7006_s21 }
 0x28b   : > { %1739 = vrot.lane.b32.xlu1 %v7405_v25, %s7008_s19  ;;  %1737 = vrot.lane.b32.xlu0 %v7407_v26, %s7008_s19 }
 0x28f   : > { %1695 = vrot.lane.b32.xlu1 %v7421_v27, %s7007_s23  ;;  %1693 = vrot.lane.b32.xlu0 %v7423_v28, %s7007_s23 }
 0x293   : > { %1719 = vrot.lane.b32.xlu1 %v7421_v27, %s7006_s21  ;;  %1717 = vrot.lane.b32.xlu0 %v7423_v28, %s7006_s21 }
 0x297   : > { %1743 = vrot.lane.b32.xlu1 %v7421_v27, %s7008_s19  ;;  %1741 = vrot.lane.b32.xlu0 %v7423_v28, %s7008_s19 }
 0x2dd   : > { %v1708_v56 = vpop.permute.xlu1 %1707  ;;  %v1684_v57 = vpop.permute.xlu0 %1683 }
 0x2de   : > { %v1821_v6 = vcombine.low %v7377_v58, %v1708_v56  ;;  %v1822_v7 = vcombine.high %v7377_v58, %v1708_v56 }
 0x2e0   : > { %v1829_v31 = vrot.slane %v1821_v6, %v7221_v9  ;;  %v1836_v33 = vrot.slane %v1822_v7, %v7221_v9 }
 0x2e1   : > { %v1732_v13 = vpop.permute.xlu1 %1731  ;;  %v1682_v20 = vpop.permute.xlu0 %1681 }
 0x2e2   : > { %v1837_v21 = vcombine.low %v1684_v57, %v1732_v13  ;;  %v1838_v24 = vcombine.high %v1684_v57, %v1732_v13 }
 0x2e4   : > { %v1845_v35 = vrot.slane %v1837_v21, %v7221_v9  ;;  %v1852_v30 = vrot.slane %v1838_v24, %v7221_v9 }
 0x2e5   : > { %v1706_v39 = vpop.permute.xlu1 %1705  ;;  %v1730_v43 = vpop.permute.xlu0 %1729 }
 0x2e6   : > { %v1853_v44 = vcombine.low %v1829_v31, %v1845_v35  ;;  %v1854_v45 = vcombine.high %v1829_v31, %v1845_v35  ;;  %v1869_v58 = vcombine.low %v1836_v33, %v1852_v30  ;;  %v1870_v47 = vcombine.high %v1836_v33, %v1852_v30 }
 0x2e7   : > { %v1753_v49 = vcombine.low %v7383_v62, %v1706_v39  ;;  %v1754_v50 = vcombine.high %v7383_v62, %v1706_v39  ;;  %v1769_v54 = vcombine.low %v1682_v20, %v1730_v43  ;;  %v1770_v55 = vcombine.high %v1682_v20, %v1730_v43 }
 0x2e8   : > { %v7488_v3 = vrot.slane %v1853_v44, %v7479_v29  ;;  %v7491_v4 = vrot.slane %v1854_v45, %v7479_v29  ;;  %v7494_v5 = vrot.slane %v1869_v58, %v7479_v29  ;;  %v7497_v17 = vrot.slane %v1870_v47, %v7479_v29 }
 0x2e9   : > { %v1761_v18 = vrot.slane %v1753_v49, %v7221_v9  ;;  %v1768_v19 = vrot.slane %v1754_v50, %v7221_v9  ;;  %v1777_v62 = vrot.slane %v1769_v54, %v7221_v9  ;;  %v1784_v22 = vrot.slane %v1770_v55, %v7221_v9  ;;  %v1688_v48 = vpop.permute.xlu1 %1687  ;;  %v1686_v51 = vpop.permute.xlu0 %1685 }
 0x2ea   : > { %v2313_v7 = vcombine.low %v7488_v3, %v7494_v5  ;;  %v2321_v13 = vcombine.low %v7491_v4, %v7497_v17  ;;  %v6448_v32 = vcombine.high %v7491_v4, %v7497_v17 }
 0x2eb   : > { %v1785_v56 = vcombine.low %v1761_v18, %v1777_v62  ;;  %v1786_v57 = vcombine.high %v1761_v18, %v1777_v62  ;;  %v1801_v61 = vcombine.low %v1768_v19, %v1784_v22  ;;  %v1802_v6 = vcombine.high %v1768_v19, %v1784_v22 }
 0x2ec   : > { %v7526_v45 = vrot.slane %v2313_v7, %v7221_v9  ;;  %v7529_v58 = vrot.slane %v2321_v13, %v7221_v9 }
 0x2ed   : > { %v7508_v20 = vrot.slane %v1785_v56, %v7479_v29  ;;  %v7511_v21 = vrot.slane %v1786_v57, %v7479_v29  ;;  %v7514_v24 = vrot.slane %v1801_v61, %v7479_v29  ;;  %v7517_v31 = vrot.slane %v1802_v6, %v7479_v29  ;;  %v1712_v33 = vpop.permute.xlu1 %1711  ;;  %v1710_v35 = vpop.permute.xlu0 %1709 }
 0x2ee   : > { %v1957_v30 = vcombine.low %v7389_v8, %v1712_v33  ;;  %v1958_v39 = vcombine.high %v7389_v8, %v1712_v33  ;;  %v1889_v47 = vcombine.low %v7391_v12, %v1710_v35  ;;  %v1890_v49 = vcombine.high %v7391_v12, %v1710_v35 }
 0x2ef   : > { %v2297_v43 = vcombine.low %v7508_v20, %v7514_v24  ;;  %v2305_v44 = vcombine.low %v7511_v21, %v7517_v31 }
 0x2f0   : > { %v1965_v56 = vrot.slane %v1957_v30, %v7221_v9  ;;  %v1972_v57 = vrot.slane %v1958_v39, %v7221_v9  ;;  %v1897_v33 = vrot.slane %v1889_v47, %v7221_v9  ;;  %v2345_v39 = vcombine.low %v7526_v45, %v7529_v58 }
 0x2f1   : > { %v1736_v50 = vpop.permute.xlu1 %1735  ;;  %v1734_v54 = vpop.permute.xlu0 %1733  ;;  %v7534_v8 = vrot.slane %v2297_v43, %v7221_v9  ;;  %v7537_v55 = vrot.slane %v2305_v44, %v7221_v9 }
 0x2f2   : > { %v1973_v18 = vcombine.low %v1688_v48, %v1736_v50  ;;  %v1974_v19 = vcombine.high %v1688_v48, %v1736_v50  ;;  %v1905_v62 = vcombine.low %v1686_v51, %v1734_v54  ;;  %v1906_v22 = vcombine.high %v1686_v51, %v1734_v54 }
 0x2f3   : > { %v2329_v61 = vcombine.low %v7534_v8, %v7537_v55  ;;  %v1904_v48 = vrot.slane %v1890_v49, %v7221_v9 }
 0x2f4   : > { %v1981_v12 = vrot.slane %v1973_v18, %v7221_v9  ;;  %v1988_v6 = vrot.slane %v1974_v19, %v7221_v9  ;;  %v1913_v7 = vrot.slane %v1905_v62, %v7221_v9  ;;  %v1920_v13 = vrot.slane %v1906_v22, %v7221_v9 }
 0x2f5   : > { %v1692_v51 = vpop.permute.xlu1 %1691  ;;  %v1690_v35 = vpop.permute.xlu0 %1689  ;;  %v2337_v30 = vrot.slane %v2329_v61, %v7479_v29 }
 0x2f6   : > { %v1989_v43 = vcombine.low %v1965_v56, %v1981_v12  ;;  %v1990_v44 = vcombine.high %v1965_v56, %v1981_v12  ;;  %v2005_v50 = vcombine.low %v1972_v57, %v1988_v6  ;;  %v2006_v54 = vcombine.high %v1972_v57, %v1988_v6 }
 0x2f7   : > { %v1921_v18 = vcombine.low %v1897_v33, %v1913_v7  ;;  %v1922_v19 = vcombine.high %v1897_v33, %v1913_v7  ;;  %v1937_v62 = vcombine.low %v1904_v48, %v1920_v13  ;;  %v1938_v46 = vcombine.high %v1904_v48, %v1920_v13 }
 0x2f8   : > { %v7553_v22 = vrot.slane %v1989_v43, %v7479_v29  ;;  %v7556_v47 = vrot.slane %v1990_v44, %v7479_v29  ;;  %v7559_v49 = vrot.slane %v2005_v50, %v7479_v29  ;;  %v7562_v61 = vrot.slane %v2006_v54, %v7479_v29 }
 0x2f9   : > { %v7565_v56 = vrot.slane %v1921_v18, %v7479_v29  ;;  %v7568_v57 = vrot.slane %v1922_v19, %v7479_v29  ;;  %v7571_v12 = vrot.slane %v1937_v62, %v7479_v29  ;;  %v7574_v6 = vrot.slane %v1938_v46, %v7479_v29  ;;  %v1716_v7 = vpop.permute.xlu1 %1715  ;;  %v1714_v13 = vpop.permute.xlu0 %1713 }
 0x2fa   : > { %v2353_v33 = vrot.slane %v2345_v39, %v7479_v29  ;;  %v2381_v48 = vcombine.low %v7553_v22, %v7559_v49  ;;  %v2389_v43 = vcombine.low %v7556_v47, %v7562_v61  ;;  %v2093_v46 = vcombine.low %v7405_v25, %v1716_v7 }
 0x2fb   : > { %v2365_v44 = vcombine.low %v7565_v56, %v7571_v12  ;;  %v2373_v50 = vcombine.low %v7568_v57, %v7574_v6  ;;  %v2094_v19 = vcombine.high %v7405_v25, %v1716_v7  ;;  %v2025_v39 = vcombine.low %v7407_v26, %v1714_v13 }
 0x2fc   : > { %v2362_v54 = vcombine.high %v2337_v30, %v2353_v33  ;;  %v2361_v18 = vcombine.low %v2337_v30, %v2353_v33  ;;  %v2026_v62 = vcombine.high %v7407_v26, %v1714_v13  ;;  %v2101_v30 = vrot.slane %v2093_v46, %v7221_v9 }
 0x2fd   : > { %v1740_v2 = vpop.permute.xlu1 %1739  ;;  %v1738_v1 = vpop.permute.xlu0 %1737  ;;  %v7590_v10 = vrot.slane %v2365_v44, %v7221_v9  ;;  %v7593_v11 = vrot.slane %v2373_v50, %v7221_v9  ;;  %v2108_v63 = vrot.slane %v2094_v19, %v7221_v9  ;;  %v2033_v25 = vrot.slane %v2025_v39, %v7221_v9 }
 0x2fe   : > { %2873 = vxpose.xlu1.b32.start [1/4] (short) (narrow) %v2362_v54, 8  ;;  %2841 = vxpose.xlu0.b32.start [1/4] (short) (narrow) %v2361_v18, 8  ;;  %v2109_v33 = vcombine.low %v1692_v51, %v1740_v2  ;;  %v2110_v7 = vcombine.high %v1692_v51, %v1740_v2  ;;  %v2041_v0 = vcombine.low %v1690_v35, %v1738_v1 }
 0x2ff   : > { %v2042_v13 = vcombine.high %v1690_v35, %v1738_v1  ;;  %v7600_v44 = vrot.slane %v2381_v48, %v7221_v9  ;;  %v7603_v50 = vrot.slane %v2389_v43, %v7221_v9  ;;  %v2040_v54 = vrot.slane %v2026_v62, %v7221_v9 }
 0x300   : > { %v2117_v26 = vrot.slane %v2109_v33, %v7221_v9  ;;  %v2124_v18 = vrot.slane %v2110_v7, %v7221_v9  ;;  %v2049_v46 = vrot.slane %v2041_v0, %v7221_v9  ;;  %v2397_v2 = vcombine.low %v7590_v10, %v7593_v11 }
 0x301   : > { %v1696_v19 = vpop.permute.xlu1 %1695  ;;  %v1694_v41 = vpop.permute.xlu0 %1693  ;;  %v2056_v1 = vrot.slane %v2042_v13, %v7221_v9  ;;  %v2413_v35 = vcombine.low %v7600_v44, %v7603_v50  ;;  %v2398_v4 = vcombine.high %v7590_v10, %v7593_v11  ;;  %v2414_v17 = vcombine.high %v7600_v44, %v7603_v50 }
 0x302   : > { %v2125_v51 = vcombine.low %v2101_v30, %v2117_v26  ;;  %v2126_v39 = vcombine.high %v2101_v30, %v2117_v26  ;;  %v2141_v48 = vcombine.low %v2108_v63, %v2124_v18  ;;  %v2142_v43 = vcombine.high %v2108_v63, %v2124_v18 }
 0x303   : > { %v2057_v33 = vcombine.low %v2033_v25, %v2049_v46  ;;  %v2058_v62 = vcombine.high %v2033_v25, %v2049_v46  ;;  %v2073_v42 = vcombine.low %v2040_v54, %v2056_v1  ;;  %v2074_v34 = vcombine.high %v2040_v54, %v2056_v1 }
 0x304   : > { %v7614_v7 = vrot.slane %v2125_v51, %v7479_v29  ;;  %v7617_v0 = vrot.slane %v2126_v39, %v7479_v29  ;;  %v7620_v40 = vrot.slane %v2141_v48, %v7479_v29  ;;  %v7623_v30 = vrot.slane %v2142_v43, %v7479_v29 }
 0x305   : > { %v7626_v26 = vrot.slane %v2057_v33, %v7479_v29  ;;  %v1720_v63 = vpop.permute.xlu1 %1719  ;;  %v1718_v13 = vpop.permute.xlu0 %1717  ;;  %v7629_v25 = vrot.slane %v2073_v42, %v7479_v29  ;;  %v2405_v18 = vrot.slane %v2397_v2, %v7479_v29  ;;  %v2421_v46 = vrot.slane %v2413_v35, %v7479_v29 }
 0x306   : > { %v7634_v54 = vrot.slane %v2058_v62, %v7479_v29  ;;  %v7637_v51 = vrot.slane %v2074_v34, %v7479_v29  ;;  %v2449_v39 = vcombine.low %v7614_v7, %v7620_v40  ;;  %v2457_v1 = vcombine.low %v7617_v0, %v7623_v30 }
 0x307   : > { %v2433_v42 = vcombine.low %v7626_v26, %v7629_v25  ;;  %v2430_v48 = vcombine.high %v2405_v18, %v2421_v46  ;;  %v2429_v43 = vcombine.low %v2405_v18, %v2421_v46  ;;  %v2229_v2 = vcombine.low %v7421_v27, %v1720_v63 }
 0x308   : > { %v2230_v35 = vcombine.high %v7421_v27, %v1720_v63  ;;  %v2161_v34 = vcombine.low %v7423_v28, %v1718_v13  ;;  %v2162_v16 = vcombine.high %v7423_v28, %v1718_v13  ;;  %v2441_v15 = vcombine.low %v7634_v54, %v7637_v51 }
 0x309   : > { %v1744_v33 = vpop.permute.xlu1 %1743  ;;  %v1742_v62 = vpop.permute.xlu0 %1741  ;;  %2874 = vxpose.xlu1.b32.cont [2/4] (short) (narrow) %v2430_v48, 8  ;;  %2842 = vxpose.xlu0.b32.cont [2/4] (short) (narrow) %v2429_v43, 8  ;;  %v2237_v59 = vrot.slane %v2229_v2, %v7221_v9  ;;  %v6452_v10 = vcombine.high %v7556_v47, %v7562_v61  ;;  %v6449_v11 = vcombine.high %v7565_v56, %v7571_v12 }
 0x30a   : > { %v2245_v23 = vcombine.low %v1696_v19, %v1744_v33  ;;  %v2246_v14 = vcombine.high %v1696_v19, %v1744_v33  ;;  %v2177_v18 = vcombine.low %v1694_v41, %v1742_v62  ;;  %v2244_v46 = vrot.slane %v2230_v35, %v7221_v9 }
 0x30b   : > { %v2169_v27 = vrot.slane %v2161_v34, %v7221_v9  ;;  %v2176_v28 = vrot.slane %v2162_v16, %v7221_v9  ;;  %v2178_v13 = vcombine.high %v1694_v41, %v1742_v62  ;;  %v7659_v33 = vrot.slane %v2433_v42, %v7221_v9 }
 0x30c   : > { %v2253_v63 = vrot.slane %v2245_v23, %v7221_v9  ;;  %v2260_v60 = vrot.slane %v2246_v14, %v7221_v9  ;;  %v2185_v19 = vrot.slane %v2177_v18, %v7221_v9  ;;  %v7663_v23 = vrot.slane %v2441_v15, %v7221_v9 }
 0x30d   : > { %v2192_v35 = vrot.slane %v2178_v13, %v7221_v9  ;;  %v2412_v50 = vrot.slane %v2398_v4, %v7479_v29  ;;  %v2428_v47 = vrot.slane %v2414_v17, %v7479_v29  ;;  %v6455_v56 = vcombine.high %v7614_v7, %v7620_v40 }
 0x30e   : > { %v2261_v48 = vcombine.low %v2237_v59, %v2253_v63  ;;  %v2262_v43 = vcombine.high %v2237_v59, %v2253_v63  ;;  %v2277_v2 = vcombine.low %v2244_v46, %v2260_v60  ;;  %v2278_v52 = vcombine.high %v2244_v46, %v2260_v60 }
 0x30f   : > { %v2193_v53 = vcombine.low %v2169_v27, %v2185_v19  ;;  %v2194_v34 = vcombine.high %v2169_v27, %v2185_v19  ;;  %v2209_v15 = vcombine.low %v2176_v28, %v2192_v35  ;;  %v2210_v62 = vcombine.high %v2176_v28, %v2192_v35 }
 0x310   : > { %v7666_v14 = vrot.slane %v2261_v48, %v7479_v29  ;;  %v7669_v16 = vrot.slane %v2262_v43, %v7479_v29  ;;  %v7672_v41 = vrot.slane %v2277_v2, %v7479_v29  ;;  %v7675_v59 = vrot.slane %v2278_v52, %v7479_v29 }
 0x311   : > { %v7678_v60 = vrot.slane %v2193_v53, %v7479_v29  ;;  %v7681_v42 = vrot.slane %v2194_v34, %v7479_v29  ;;  %v7688_v27 = vrot.slane %v2449_v39, %v7221_v9  ;;  %v7691_v52 = vrot.slane %v2209_v15, %v7479_v29 }
 0x312   : > { %v2517_v18 = vcombine.low %v7666_v14, %v7672_v41  ;;  %v2525_v46 = vcombine.low %v7669_v16, %v7675_v59  ;;  %v7694_v53 = vrot.slane %v2210_v62, %v7479_v29  ;;  %v2464_v63 = vrot.slane %v2457_v1, %v7221_v9 }
 0x313   : > { %v2465_v28 = vcombine.low %v7659_v33, %v7663_v23  ;;  %v2501_v48 = vcombine.low %v7678_v60, %v7691_v52  ;;  %v6456_v12 = vcombine.high %v7617_v0, %v7623_v30  ;;  %v7773_v0 = vrot.slane %v6449_v11, %v7221_v9 }
 0x314   : > { %v2524_v13 = vrot.slane %v2517_v18, %v7221_v9  ;;  %v2532_v19 = vrot.slane %v2525_v46, %v7221_v9  ;;  %v2509_v39 = vcombine.low %v7681_v42, %v7694_v53  ;;  %v2481_v2 = vcombine.low %v7688_v27, %v2464_v63 }
 0x315   : > { %v2473_v43 = vrot.slane %v2465_v28, %v7479_v29  ;;  %v2508_v1 = vrot.slane %v2501_v48, %v7221_v9  ;;  %v2330_v46 = vcombine.high %v7534_v8, %v7537_v55  ;;  %v6447_v28 = vcombine.high %v7488_v3, %v7494_v5 }
 0x316   : > { %v2549_v35 = vcombine.low %v2524_v13, %v2532_v19  ;;  %v2516_v34 = vrot.slane %v2509_v39, %v7221_v9  ;;  %v2489_v15 = vrot.slane %v2481_v2, %v7479_v29  ;;  %v2346_v39 = vcombine.high %v7526_v45, %v7529_v58 }
 0x317   : > { %v6445_v2 = vcombine.high %v7508_v20, %v7514_v24  ;;  %v2344_v3 = vrot.slane %v2330_v46, %v7479_v29  ;;  %v8846_v5 = vmov 0.0   ;;  %v7732_v20 = vrot.slane %v6447_v28, %v7221_v9 }
 0x318   : > { %v2533_v62 = vcombine.low %v2508_v1, %v2516_v34  ;;  %v2557_v18 = vrot.slane %v2549_v35, %v7479_v29  ;;  %v2498_v37 = vcombine.high %v2473_v43, %v2489_v15  ;;  %v2497_v38 = vcombine.low %v2473_v43, %v2489_v15  ;;  %6652 = vmatprep.mubr.msk.f32.mxu0 %vm7011_vm3, %v8846_v5 }
 0x319   : > { %v6446_v35 = vcombine.high %v7511_v21, %v7517_v31  ;;  %v2360_v21 = vrot.slane %v2346_v39, %v7479_v29  ;;  %v7741_v24 = vrot.slane %v6445_v2, %v7221_v9  ;;  %v6450_v45 = vcombine.high %v7568_v57, %v7574_v6  ;;  %v8847_v39 = vld [vmem:[#allocation10_spill] sm:$0xff] }
 0x31a   : > { %v2541_v48 = vrot.slane %v2533_v62, %v7479_v29  ;;  %2875 = vxpose.xlu1.b32.cont [3/4] (short) (narrow) %v2498_v37, 8  ;;  %2843 = vxpose.xlu0.b32.cont [3/4] (short) (narrow) %v2497_v38, 8  ;;  %v7735_v37 = vrot.slane %v6448_v32, %v7221_v9  ;;  %v6451_v38 = vcombine.high %v7553_v22, %v7559_v49 }
 0x31b   : > { %v7744_v31 = vrot.slane %v6446_v35, %v7221_v9  ;;  %v2466_v32 = vcombine.high %v7659_v33, %v7663_v23  ;;  %v2364_v58 = vcombine.high %v2344_v3, %v2360_v21  ;;  %v2482_v22 = vcombine.high %v7688_v27, %v2464_v63  ;;  %v8848_v35 = vld [vmem:[#allocation12_spill] sm:$0xff] }
 0x31c   : > { %v2566_v8 = vcombine.high %v2541_v48, %v2557_v18  ;;  %v2565_v55 = vcombine.low %v2541_v48, %v2557_v18  ;;  %v2550_v49 = vcombine.high %v2524_v13, %v2532_v19  ;;  %v2363_v44 = vcombine.low %v2344_v3, %v2360_v21  ;;  %v8851_v21 = vld [vmem:[#allocation13_spill] sm:$0xff] }
 0x31d   : > { %v2534_v61 = vcombine.high %v2508_v1, %v2516_v34  ;;  %v6453_v33 = vcombine.high %v7626_v26, %v7629_v25  ;;  %v6454_v57 = vcombine.high %v7634_v54, %v7637_v51  ;;  %v6457_v6 = vcombine.high %v7678_v60, %v7691_v52 }
 0x31e   : > { %2876 = vxpose.xlu1.b32.end [4/4] (short) (narrow) %v2566_v8, 8  ;;  %2844 = vxpose.xlu0.b32.end [4/4] (short) (narrow) %v2565_v55, 8  ;;  %v2480_v23 = vrot.slane %v2466_v32, %v7479_v29  ;;  %v2601_v27 = vcombine.low %v7741_v24, %v7744_v31  ;;  %v2496_v40 = vrot.slane %v2482_v22, %v7479_v29  ;;  %v8849_v8 = vld [vmem:[#allocation11_spill] sm:$0xff] }
 0x31f   : > { %v2564_v7 = vrot.slane %v2550_v49, %v7479_v29  ;;  %v7776_v30 = vrot.slane %v6450_v45, %v7221_v9  ;;  %v2432_v26 = vcombine.high %v2412_v50, %v2428_v47  ;;  %v2431_v25 = vcombine.low %v2412_v50, %v2428_v47  ;;  %v8852_v45 = vld [vmem:[#allocation16_spill] sm:$0xff]  ;;  %v8855_v49 = vld [vmem:[#allocation17_spill] sm:$0xff] }
 0x320   : > { %v2548_v54 = vrot.slane %v2534_v61, %v7479_v29  ;;  %v2617_v51 = vcombine.low %v7732_v20, %v7735_v37  ;;  %v7782_v60 = vrot.slane %v6451_v38, %v7221_v9  ;;  %v7785_v52 = vrot.slane %v6452_v10, %v7221_v9  ;;  %v8850_v38 = vld [vmem:[#allocation14_spill] sm:$0xff] }
 0x321   : > { %v7788_v63 = vrot.slane %v6453_v33, %v7221_v9  ;;  %v7791_v13 = vrot.slane %v6454_v57, %v7221_v9  ;;  %v6459_v19 = vcombine.high %v7666_v14, %v7672_v41  ;;  %v6460_v43 = vcombine.high %v7669_v16, %v7675_v59 }
 0x322   : > { %2937 = vxpose.xlu1.b32.start [1/4] (short) (narrow) %v2364_v58, 8  ;;  %2905 = vxpose.xlu0.b32.start [1/4] (short) (narrow) %v2363_v44, 8  ;;  %v2609_v1 = vrot.slane %v2601_v27, %v7479_v29  ;;  %v6458_v34 = vcombine.high %v7681_v42, %v7694_v53  ;;  %v2500_v15 = vcombine.high %v2480_v23, %v2496_v40  ;;  %v8853_v58 = vld [vmem:[#allocation15_spill] sm:$0xff] }
 0x323   : > { %v2499_v62 = vcombine.low %v2480_v23, %v2496_v40  ;;  %v2669_v18 = vcombine.low %v7773_v0, %v7776_v30  ;;  %v2568_v46 = vcombine.high %v2548_v54, %v2564_v7  ;;  %v2567_v28 = vcombine.low %v2548_v54, %v2564_v7  ;;  %v8858_v40 = vld [vmem:[#allocation22_spill] sm:$0xff]  ;;  %v8859_v7 = vld [vmem:[#allocation21_spill] sm:$0xff]  ;;  %v8861_v54 = vld [vmem:[#allocation23_spill] sm:$0xff] }
 0x324   : > { %v2625_v48 = vrot.slane %v2617_v51, %v7479_v29  ;;  %v7804_v14 = vrot.slane %v6455_v56, %v7221_v9  ;;  %v2685_v16 = vcombine.low %v7782_v60, %v7785_v52  ;;  %v7809_v41 = vrot.slane %v6456_v12, %v7221_v9  ;;  %v8856_v56 = vld [vmem:[#allocation20_spill] sm:$0xff]  ;;  %v8857_v12 = vld [vmem:[#allocation19_spill] sm:$0xff] }
 0x325   : > { %v2737_v59 = vcombine.low %v7788_v63, %v7791_v13  ;;  %v7814_v42 = vrot.slane %v6457_v6, %v7221_v9  ;;  %v1467_v2 = vcombine.low %v8847_v39, %v7256_v36  ;;  %v1468_v55 = vcombine.low %v8849_v8, %v8848_v35  ;;  %v8854_v36 = vld [vmem:[#allocation18_spill] sm:$0xff] }
 0x326   : > { %2938 = vxpose.xlu1.b32.cont [2/4] (short) (narrow) %v2432_v26, 8  ;;  %2906 = vxpose.xlu0.b32.cont [2/4] (short) (narrow) %v2431_v25, 8  ;;  %v2634_v53 = vcombine.high %v2609_v1, %v2625_v48  ;;  %v2633_v3 = vcombine.low %v2609_v1, %v2625_v48  ;;  %v2677_v4 = vrot.slane %v2669_v18, %v7479_v29  ;;  %v8860_v25 = vld [vmem:[#allocation24_spill] sm:$0xff]  ;;  %v8862_v1 = vld [vmem:[#allocation26_spill] sm:$0xff]  ;;  %v8865_v48 = vld [vmem:[#allocation27_spill] sm:$0xff] }
 0x327   : > { %v7822_v17 = vrot.slane %v6458_v34, %v7221_v9  ;;  %v1484_v10 = vcombine.low %v8851_v21, %v8850_v38  ;;  %v1475_v11 = vrot.slane %v1467_v2, %v7221_v9  ;;  %v1482_v32 = vrot.slane %v1468_v55, %v7221_v9  ;;  %v8863_v34 = vld [vmem:[#allocation25_spill] sm:$0xff] }
 0x328   : > { %v1485_v22 = vcombine.low %v8853_v58, %v8852_v45  ;;  %v1501_v44 = vcombine.low %v8855_v49, %v8854_v36  ;;  %v2693_v50 = vrot.slane %v2685_v16, %v7479_v29  ;;  %v2753_v47 = vcombine.low %v7804_v14, %v7809_v41 }
 0x329   : > { %v1492_v61 = vrot.slane %v1484_v10, %v7221_v9  ;;  %v1502_v33 = vcombine.low %v8857_v12, %v8856_v56  ;;  %v1483_v57 = vcombine.low %v1475_v11, %v1482_v32  ;;  %v1518_v26 = vcombine.low %v8859_v7, %v8858_v40  ;;  %v4266_v40 = vld [vmem:[#allocation2 + $0x8] sm:$0xff]  ;;  %v4267_v7 = vld [vmem:[#allocation2 + $0x10] sm:$0xff] }
 0x32a   : > { %2939 = vxpose.xlu1.b32.cont [3/4] (short) (narrow) %v2500_v15, 8  ;;  %2907 = vxpose.xlu0.b32.cont [3/4] (short) (narrow) %v2499_v62, 8  ;;  %v1499_v6 = vrot.slane %v1485_v22, %v7221_v9  ;;  %v1509_v23 = vrot.slane %v1501_v44, %v7221_v9  ;;  %v1519_v51 = vcombine.low %v8861_v54, %v8860_v25 }
 0x32b   : > { %v1516_v27 = vrot.slane %v1502_v33, %v7221_v9  ;;  %v1535_v15 = vcombine.low %v8863_v34, %v8862_v1  ;;  %v7848_v62 = vrot.slane %v6459_v19, %v7221_v9  ;;  %v2804_v18 = vrot.slane %v6460_v43, %v7221_v9  ;;  %6642 = vmatmul.mubr.msk.f32.gmra.mrb[2].mxu1 %vm1251_vm2, %v1483_v57  ;;  %v7915_v1 = vpop.f32.mrb[0].mxu1 }
 0x32c   : > { %v1526_v2 = vrot.slane %v1518_v26, %v7221_v9  ;;  %v1533_v35 = vrot.slane %v1519_v51, %v7221_v9  ;;  %v2702_v55 = vcombine.high %v2677_v4, %v2693_v50  ;;  %v2745_v43 = vrot.slane %v2737_v59, %v7479_v29  ;;  %v4268_v26 = vld [vmem:[#allocation2 + $0x18] sm:$0xff]  ;;  %v7913_v51 = vld [vmem:[%s8780_s10] ss:$0 sm:$0xff]  ;;  %v1634_v34 = vpop.f32.mrb[1].mxu1 }
 0x32d   : > { %v1517_v39 = vcombine.low %v1509_v23, %v1516_v27  ;;  %v1543_v8 = vrot.slane %v1535_v15, %v7221_v9  ;;  %v2805_v38 = vcombine.low %v7814_v42, %v7822_v17  ;;  %v2701_v10 = vcombine.low %v2677_v4, %v2693_v50 }
 0x32e   : > { %2940 = vxpose.xlu1.b32.end [4/4] (short) (narrow) %v2568_v46, 8  ;;  %2908 = vxpose.xlu0.b32.end [4/4] (short) (narrow) %v2567_v28, 8  ;;  %v1500_v46 = vcombine.low %v1492_v61, %v1499_v6  ;;  %v8864_v28 = vld [vmem:[#allocation28_spill] sm:$0xff]  ;;  %v1534_v21 = vcombine.low %v1526_v2, %v1533_v35  ;;  %v2761_v11 = vrot.slane %v2753_v47, %v7479_v29 }
 0x32f   : > { %v1536_v16 = vcombine.low %v8865_v48, %v8864_v28  ;;  %v2821_v32 = vcombine.low %v7848_v62, %v2804_v18  ;;  %v2602_v59 = vcombine.high %v7741_v24, %v7744_v31  ;;  %v2813_v58 = vrot.slane %v2805_v38, %v7479_v29  ;;  %v4271_v48 = vld [vmem:[#allocation2 + $0x30] sm:$0xff] }
 0x330   : > { %6644 = vmatprep.mubr.msk.f32.mxu1 %vm1251_vm2, %v1500_v46  ;;  %v2769_v45 = vcombine.low %v2745_v43, %v2761_v11  ;;  %v2618_v22 = vcombine.high %v7732_v20, %v7735_v37  ;;  %v2670_v36 = vcombine.high %v7773_v0, %v7776_v30  ;;  %v2686_v44 = vcombine.high %v7782_v60, %v7785_v52 }
 0x331   : > { %v1550_v19 = vrot.slane %v1536_v16, %v7221_v9  ;;  %6645 = vmatmul.mubr.msk.f32.gmra.mrb[4].mxu1 %vm1251_vm2, %v1517_v39  ;;  %v2829_v4 = vrot.slane %v2821_v32, %v7479_v29  ;;  %v2616_v49 = vrot.slane %v2602_v59, %v7479_v29  ;;  %v2738_v61 = vcombine.high %v7788_v63, %v7791_v13  ;;  %v4272_v16 = vld [vmem:[#allocation2 + $0x38] sm:$0xff] }
 0x332   : > { %3001 = vxpose.xlu1.b32.start [1/4] (short) (narrow) %v2634_v53, 8  ;;  %2969 = vxpose.xlu0.b32.start [1/4] (short) (narrow) %v2633_v3, 8  ;;  %v2770_v3 = vcombine.high %v2745_v43, %v2761_v11  ;;  %v2632_v50 = vrot.slane %v2618_v22, %v7479_v29  ;;  %v2684_v47 = vrot.slane %v2670_v36, %v7479_v29 }
 0x333   : > { %v1551_v53 = vcombine.low %v1543_v8, %v1550_v19  ;;  %6647 = vmatprep.mubr.msk.f32.mxu1 %vm1251_vm2, %v1534_v21  ;;  %v2838_v24 = vcombine.high %v2813_v58, %v2829_v4  ;;  %v2837_v31 = vcombine.low %v2813_v58, %v2829_v4  ;;  %v2700_v0 = vrot.slane %v2686_v44, %v7479_v29 }
 0x334   : > { %v2636_v20 = vcombine.high %v2616_v49, %v2632_v50  ;;  %v2635_v37 = vcombine.low %v2616_v49, %v2632_v50  ;;  %v2754_v30 = vcombine.high %v7804_v14, %v7809_v41  ;;  %v2752_v60 = vrot.slane %v2738_v61, %v7479_v29 }
 0x335   : > { %6648 = vmatmul.mubr.msk.f32.gmra.mrb[6].mxu1 %vm1251_vm2, %v1551_v53  ;;  %v2806_v52 = vcombine.high %v7814_v42, %v7822_v17  ;;  %v2704_v56 = vcombine.high %v2684_v47, %v2700_v0  ;;  %v2703_v12 = vcombine.low %v2684_v47, %v2700_v0  ;;  %v2822_v63 = vcombine.high %v7848_v62, %v2804_v18  ;;  %v4265_v42 = vld [vmem:[#allocation2] sm:$0xff]  ;;  %v4270_v18 = vld [vmem:[#allocation2 + $0x28] sm:$0xff] }
 0x336   : > { %3002 = vxpose.xlu1.b32.cont [2/4] (short) (narrow) %v2702_v55, 8  ;;  %2970 = vxpose.xlu0.b32.cont [2/4] (short) (narrow) %v2701_v10, 8  ;;  %v2768_v33 = vrot.slane %v2754_v30, %v7479_v29  ;;  %v7918_v15 = vadd.f32 %v7913_v51, %v1634_v34  ;;  %v4269_v62 = vld [vmem:[#allocation2 + $0x20] sm:$0xff] }
 0x337   : > { %6657 = vmatprep.mubr.msk.f32.mxu1 %vm7011_vm3, %v8846_v5  ;;  %v2820_v6 = vrot.slane %v2806_v52, %v7479_v29  ;;  %v2836_v14 = vrot.slane %v2822_v63, %v7479_v29 }
 0x338   : > { %v2772_v13 = vcombine.high %v2752_v60, %v2768_v33  ;;  %v2771_v57 = vcombine.low %v2752_v60, %v2768_v33 }
 0x339   : > { %v2840_v41 = vcombine.high %v2820_v6, %v2836_v14  ;;  %v2839_v23 = vcombine.low %v2820_v6, %v2836_v14  ;;  %v8809_v6 = vmov 0.0|0.0  }
 0x33a   : > { %3003 = vxpose.xlu1.b32.cont [3/4] (short) (narrow) %v2770_v3, 8  ;;  %2971 = vxpose.xlu0.b32.cont [3/4] (short) (narrow) %v2769_v45, 8 }
 0x33e   : > { %3004 = vxpose.xlu1.b32.end [4/4] (short) (narrow) %v2838_v24, 8  ;;  %2972 = vxpose.xlu0.b32.end [4/4] (short) (narrow) %v2837_v31, 8 }
 0x342   : > { %3065 = vxpose.xlu1.b32.start [1/4] (short) (narrow) %v2636_v20, 8  ;;  %3033 = vxpose.xlu0.b32.start [1/4] (short) (narrow) %v2635_v37, 8 }
 0x346   : > { %3066 = vxpose.xlu1.b32.cont [2/4] (short) (narrow) %v2704_v56, 8  ;;  %3034 = vxpose.xlu0.b32.cont [2/4] (short) (narrow) %v2703_v12, 8  ;;  %v7978_v12 = vadd.f32 %v7915_v1, %v7913_v51 }
 0x34a   : > { %3067 = vxpose.xlu1.b32.cont [3/4] (short) (narrow) %v2772_v13, 8  ;;  %3035 = vxpose.xlu0.b32.cont [3/4] (short) (narrow) %v2771_v57, 8 }
 0x34e   : > { %3068 = vxpose.xlu1.b32.end [4/4] (short) (narrow) %v2840_v41, 8  ;;  %3036 = vxpose.xlu0.b32.end [4/4] (short) (narrow) %v2839_v23, 8  ;;  %v8866_v41 = vlaneseq }
 0x350   : > { %v4892_v23 = vand.u32 127, %v8866_v41 }
 0x36c   : > { %3105 = vrot.lane.b32.xlu1 %v7918_v15, %s7007_s23 }
 0x392   : > { %v2857_v17 = vpop.trf.xlu0  ;;  %v2889_v27 = vpop.trf.xlu1 }
 0x393   : > { %6651 = vmatpush3.msra.mxu0 %v2857_v17  ;;  %6656 = vmatpush3.msra.mxu1 %v2889_v27  ;;  %v8867_v17 = vld [vmem:[#allocation9_spill] sm:$0xff] }
 0x394   : > { %6653 = vmatmul.mubr.msk.f32.vlgmr.msra.gmra.mrb[8].mxu0 %vm4273_vm4, %v4265_v42  ;;  %6660 = vmatprep.subr.mxu0 %v8846_v5  ;;  %v8042_v27 = vsub.s32 %v4892_v23, %v8867_v17  ;;  %v8086_v23 = vsub.s32 4, %v8867_v17 }
 0x395   : > { %6662 = vmatprep.mubr.msk.f32.mxu0 %vm7011_vm3, %v8846_v5  ;;  %6658 = vmatmul.mubr.msk.f32.vlgmr.msra.gmra.mrb[8].mxu1 %vm4273_vm4, %v4266_v40 }
 0x396   : > { %6665 = vmatprep.subr.mxu1 %v8846_v5  ;;  %6667 = vmatprep.mubr.msk.f32.mxu1 %vm7011_vm3, %v8846_v5  ;;  %8868 = vst [vmem:[#allocation10_spill] sm:$0xff] %v8042_v27  ;;  %8874 = vst [vmem:[#allocation15_spill] sm:$0xff] %v8086_v23 }
 0x3a2   : > { %v2921_v25 = vpop.trf.xlu0  ;;  %v2953_v54 = vpop.trf.xlu1 }
 0x3a3   : > { %6661 = vmatpush3.msra.mxu0 %v2921_v25  ;;  %6666 = vmatpush3.msra.mxu1 %v2953_v54 }
 0x3a4   : > { %6663 = vmatmul.mubr.msk.f32.vlgmr.msra.gmra.mrb[10].mxu0 %vm4273_vm4, %v4267_v7  ;;  %6668 = vmatmul.mubr.msk.f32.vlgmr.msra.gmra.mrb[10].mxu1 %vm4273_vm4, %v4268_v26 }
 0x3a5   : > { %6670 = vmatprep.subr.mxu0 %v8846_v5  ;;  %6675 = vmatprep.subr.mxu1 %v8846_v5 }
 0x3a6   : > { %6672 = vmatprep.mubr.msk.f32.mxu0 %vm7011_vm3, %v8846_v5  ;;  %6677 = vmatprep.mubr.msk.f32.mxu1 %vm7011_vm3, %v8846_v5 }
 0x3b2   : > { %v2985_v46 = vpop.trf.xlu0  ;;  %v3017_v28 = vpop.trf.xlu1 }
 0x3b3   : > { %6671 = vmatpush3.msra.mxu0 %v2985_v46  ;;  %6676 = vmatpush3.msra.mxu1 %v3017_v28 }
 0x3b4   : > { %6673 = vmatmul.mubr.msk.f32.vlgmr.msra.gmra.mrb[12].mxu0 %vm4273_vm4, %v4269_v62  ;;  %6678 = vmatmul.mubr.msk.f32.vlgmr.msra.gmra.mrb[12].mxu1 %vm4273_vm4, %v4270_v18 }
 0x3b5   : > { %6685 = vmatprep.subr.mxu1 %v8846_v5  ;;  %6680 = vmatprep.subr.mxu0 %v8846_v5 }
 0x3b6   : > { %6682 = vmatprep.mubr.msk.f32.mxu0 %vm7011_vm3, %v8846_v5  ;;  %6687 = vmatprep.mubr.msk.f32.mxu1 %vm7011_vm3, %v8846_v5 }
 0x3c2   : > { %v3081_v39 = vpop.trf.xlu1  ;;  %v3049_v2 = vpop.trf.xlu0 }
 0x3c3   : > { %6681 = vmatpush3.msra.mxu0 %v3049_v2  ;;  %6686 = vmatpush3.msra.mxu1 %v3081_v39 }
 0x3c4   : > { %6683 = vmatmul.mubr.msk.f32.vlgmr.msra.gmra.mrb[14].mxu0 %vm4273_vm4, %v4271_v48  ;;  %6688 = vmatmul.mubr.msk.f32.vlgmr.msra.gmra.mrb[14].mxu1 %vm4273_vm4, %v4272_v16 }
 0x3c5   : > { %6698 = vmatprep.mubr.msk.f32.mxu0 %vm7011_vm3, %v8846_v5  ;;  %6709 = vmatprep.mubr.msk.f32.mxu1 %vm7011_vm3, %v8846_v5 }
 0x3c6   : > { %6813 = vmatprep.subr.bf16.mxu0 %v8809_v6  ;;  %6819 = vmatprep.subr.bf16.mxu1 %v8809_v6 }
 0x3de   : > { %v8039_v42 = vpop.permute.xlu1 %3105 }
 0x3fe   : > { %v6643_v35 = vpop.f32.mrb[2].mxu1 }
 0x3ff   : > { %v1644_v8 = vpop.f32.mrb[3].mxu1  ;;  %v7974_v56 = vadd.f32 %v6643_v35, %v7913_v51 }
 0x400   : > { %v7969_v52 = vadd.f32 %v7913_v51, %v1644_v8 }
 0x404   : > { %v6646_v19 = vpop.f32.mrb[4].mxu1 }
 0x405   : > { %v1654_v55 = vpop.f32.mrb[5].mxu1  ;;  %v8001_v33 = vadd.f32 %v6646_v19, %v7913_v51 }
 0x406   : > { %v8004_v63 = vadd.f32 %v7913_v51, %v1654_v55 }
 0x408   : > { %v6649_v43 = vpop.f32.mrb[6].mxu1 }
 0x409   : > { %v1664_v38 = vpop.f32.mrb[7].mxu1  ;;  %v8011_v13 = vadd.f32 %v6649_v43, %v7913_v51  ;;  %v4858_v43 = vld [vmem:[#allocation3] sm:$0xff] }
 0x40a   : > { %v8014_v57 = vadd.f32 %v7913_v51, %v1664_v38 }
 0x467   : > { %v7936_v21 = vpop.f32.mrb[8].mxu0 }
 0x468   : > { %v4859_v10 = vsel %vm1251_vm2, %v7936_v21, -inf  ;;  %v6654_v11 = vpop.f32.mrb[9].mxu0  ;;  %v7940_v32 = vpop.f32.mrb[8].mxu1 }
 0x469   : > { %4860 = vmax.xlane.f32.xlu0 %v4859_v10  ;;  %v6659_v53 = vpop.f32.mrb[9].mxu1  ;;  %v4862_v59 = vsel %vm1251_vm2, %v7940_v32, -inf  ;;  %v8059_v10 = vsub.s32 1, %v8867_v17  ;;  %v8062_v11 = vsub.s32 0, %v8867_v17 }
 0x46a   : > { %4863 = vmax.xlane.f32.xlu1 %v4862_v59 }
 0x46b   : > { %8869 = vst [vmem:[#allocation12_spill] sm:$0xff] %v8059_v10  ;;  %8870 = vst [vmem:[#allocation11_spill] sm:$0xff] %v8062_v11 }
 0x477   : > { %v7944_v3 = vpop.f32.mrb[10].mxu0  ;;  %v7946_v45 = vpop.f32.mrb[10].mxu1 }
 0x478   : > { %v4865_v58 = vsel %vm1251_vm2, %v7944_v3, -inf  ;;  %v6664_v4 = vpop.f32.mrb[11].mxu0  ;;  %v6669_v22 = vpop.f32.mrb[11].mxu1  ;;  %v4868_v36 = vsel %vm1251_vm2, %v7946_v45, -inf }
 0x479   : > { %4866 = vmax.xlane.f32.xlu0 %v4865_v58 }
 0x47d   : > { %4869 = vmax.xlane.f32.xlu0 %v4868_v36 }
 0x487   : > { %v7952_v24 = vpop.f32.mrb[12].mxu0  ;;  %v7954_v31 = vpop.f32.mrb[12].mxu1 }
 0x488   : > { %v4871_v49 = vsel %vm1251_vm2, %v7952_v24, -inf  ;;  %v4874_v44 = vsel %vm1251_vm2, %v7954_v31, -inf  ;;  %v6674_v50 = vpop.f32.mrb[13].mxu0  ;;  %v6679_v47 = vpop.f32.mrb[13].mxu1 }
 0x489   : > { %4872 = vmax.xlane.f32.xlu1 %v4871_v49  ;;  %4875 = vmax.xlane.f32.xlu0 %v4874_v44  ;;  %v8073_v49 = vsub.s32 3, %v8867_v17  ;;  %v8078_v47 = vsub.s32 2, %v8867_v17 }
 0x48b   : > { %8871 = vst [vmem:[#allocation14_spill] sm:$0xff] %v8073_v49  ;;  %8872 = vst [vmem:[#allocation13_spill] sm:$0xff] %v8078_v47 }
 0x497   : > { %v7960_v61 = vpop.f32.mrb[14].mxu0  ;;  %v7962_v20 = vpop.f32.mrb[14].mxu1 }
 0x498   : > { %v4880_v37 = vsel %vm1251_vm2, %v7962_v20, -inf  ;;  %v4877_v0 = vsel %vm1251_vm2, %v7960_v61, -inf  ;;  %v6684_v30 = vpop.f32.mrb[15].mxu0  ;;  %v6689_v60 = vpop.f32.mrb[15].mxu1 }
 0x499   : > { %4881 = vmax.xlane.f32.xlu0 %v4880_v37  ;;  %4878 = vmax.xlane.f32.xlu1 %v4877_v0  ;;  %v8082_v30 = vsub.s32 5, %v8867_v17 }
 0x49b   : > { %8873 = vst [vmem:[#allocation16_spill] sm:$0xff] %v8082_v30 }
 0x4aa   : > { %3109 = vrot.lane.b32.xlu1 %v7969_v52, %s7007_s23 }
 0x4ae   : > { %3111 = vrot.lane.b32.xlu1 %v7974_v56, %s7007_s23 }
 0x4af   : > { %3107 = vrot.lane.b32.xlu0 %v7978_v12, %s7007_s23 }
 0x4b2   : > { %3131 = vrot.lane.b32.xlu1 %v7978_v12, %s7006_s21 }
 0x4b3   : > { %3129 = vrot.lane.b32.xlu0 %v7918_v15, %s7006_s21 }
 0x4b6   : > { %3135 = vrot.lane.b32.xlu1 %v7974_v56, %s7006_s21 }
 0x4b7   : > { %3133 = vrot.lane.b32.xlu0 %v7969_v52, %s7006_s21 }
 0x4ba   : > { %3155 = vrot.lane.b32.xlu1 %v7978_v12, %s7008_s19 }
 0x4bb   : > { %3153 = vrot.lane.b32.xlu0 %v7918_v15, %s7008_s19 }
 0x4be   : > { %3159 = vrot.lane.b32.xlu1 %v7974_v56, %s7008_s19 }
 0x4bf   : > { %3157 = vrot.lane.b32.xlu0 %v7969_v52, %s7008_s19 }
 0x4c2   : > { %3115 = vrot.lane.b32.xlu1 %v8001_v33, %s7007_s23 }
 0x4c3   : > { %3113 = vrot.lane.b32.xlu0 %v8004_v63, %s7007_s23 }
 0x4c6   : > { %3119 = vrot.lane.b32.xlu1 %v8011_v13, %s7007_s23 }
 0x4c7   : > { %3117 = vrot.lane.b32.xlu0 %v8014_v57, %s7007_s23 }
 0x4ca   : > { %3139 = vrot.lane.b32.xlu1 %v8001_v33, %s7006_s21 }
 0x4cb   : > { %3137 = vrot.lane.b32.xlu0 %v8004_v63, %s7006_s21 }
 0x4ce   : > { %3143 = vrot.lane.b32.xlu1 %v8011_v13, %s7006_s21 }
 0x4cf   : > { %3141 = vrot.lane.b32.xlu0 %v8014_v57, %s7006_s21 }
 0x4d2   : > { %3163 = vrot.lane.b32.xlu1 %v8001_v33, %s7008_s19 }
 0x4d3   : > { %3161 = vrot.lane.b32.xlu0 %v8004_v63, %s7008_s19 }
 0x4d6   : > { %3167 = vrot.lane.b32.xlu1 %v8011_v13, %s7008_s19 }
 0x4d7   : > { %3165 = vrot.lane.b32.xlu0 %v8014_v57, %s7008_s19 }
 0x4f6   : > { %v4861_v14 = vpop.xlane.xlu0 %4860 }
 0x4f7   : > { %v4864_v7 = vpop.xlane.xlu1 %4863  ;;  %v4896_v26 = vrot.slane %v4861_v14, %v8042_v27 }
 0x4f8   : > { %v4900_v25 = vrot.slane %v4864_v7, %v8042_v27  ;;  %v8089_v7 = vsub.s32 7, %v8867_v17 }
 0x4fa   : > { %v4926_v1 = vsel %vm4925_vm5, %v4900_v25, %v4896_v26  ;;  %8875 = vst [vmem:[#allocation18_spill] sm:$0xff] %v8089_v7  ;;  %v8092_v26 = vsub.s32 6, %v8867_v17 }
 0x4fc   : > { %8876 = vst [vmem:[#allocation17_spill] sm:$0xff] %v8092_v26 }
 0x506   : > { %v4867_v40 = vpop.xlane.xlu0 %4866 }
 0x507   : > { %v4904_v54 = vrot.slane %v4867_v40, %v8042_v27 }
 0x509   : > { %v4928_v18 = vsel %vm4927_vm6, %v4904_v54, %v4926_v1 }
 0x50a   : > { %v4870_v51 = vpop.xlane.xlu0 %4869 }
 0x50b   : > { %v4908_v34 = vrot.slane %v4870_v51, %v8042_v27 }
 0x50d   : > { %v4930_v48 = vsel %vm4929_vm7, %v4908_v34, %v4928_v18 }
 0x516   : > { %v4873_v62 = vpop.xlane.xlu1 %4872  ;;  %v4876_v28 = vpop.xlane.xlu0 %4875 }
 0x517   : > { %v4912_v46 = vrot.slane %v4873_v62, %v8042_v27  ;;  %v4916_v16 = vrot.slane %v4876_v28, %v8042_v27 }
 0x519   : > { %v4932_v39 = vsel %vm4931_vm8, %v4912_v46, %v4930_v48 }
 0x51a   : > { %v4934_v55 = vsel %vm4933_vm9, %v4916_v16, %v4932_v39 }
 0x526   : > { %v4879_v2 = vpop.xlane.xlu1 %4878  ;;  %v4882_v35 = vpop.xlane.xlu0 %4881 }
 0x527   : > { %v4920_v8 = vrot.slane %v4879_v2, %v8042_v27  ;;  %v4924_v19 = vrot.slane %v4882_v35, %v8042_v27 }
 0x529   : > { %v4936_v38 = vsel %vm4935_vm10, %v4920_v8, %v4934_v55 }
 0x52a   : > { %v4938_v53 = vsel %vm4937_vm11, %v4924_v19, %v4936_v38  ;;  %v8065_v59 = vpop.permute.xlu1 %3109  ;;  %v8067_v58 = vpop.permute.xlu0 %3107 }
 0x52b   : > { %v4940_v4 = vmax.f32 %v4858_v43, %v4938_v53 }
 0x52d   : > { %5772 = vst.msk [vmem:[#allocation3] sm:$0xff] %vm4273_vm4, %v4940_v4  ;;  %v4954_v22 = vrot.slane %v4940_v4, %v8059_v10  ;;  %v4947_v36 = vrot.slane %v4940_v4, %v8062_v11  ;;  %v4941_v37 = vsub.f32 %v4858_v43, %v4940_v4  ;;  %v4968_v0 = vrot.slane %v4940_v4, %v8073_v49 }
 0x52e   : > { %v8075_v44 = vpop.permute.xlu1 %3111  ;;  %v3130_v50 = vpop.permute.xlu0 %3129  ;;  %v4961_v41 = vrot.slane %v4940_v4, %v8078_v47  ;;  %v4982_v51 = vrot.slane %v4940_v4, %v8082_v30  ;;  %v4975_v62 = vrot.slane %v4940_v4, %v8086_v23  ;;  %v4996_v17 = vrot.slane %v4940_v4, %v8089_v7 }
 0x52f   : > { %4956 = vbcast.lane.b32.xlu1 %v4954_v22, 256  ;;  %4949 = vbcast.lane.b32.xlu0 %v4947_v36, 256  ;;  %v4942_v40 = vmul.f32 1.442695, %v4941_v37  ;;  %v3177_v25 = vcombine.low %v7918_v15, %v3130_v50  ;;  %v3178_v54 = vcombine.high %v7918_v15, %v3130_v50  ;;  %v4989_v28 = vrot.slane %v4940_v4, %v8092_v26 }
 0x531   : > { %6920 = vpow2.f32 %v4942_v40  ;;  %v3185_v15 = vrot.slane %v3177_v25, %v7221_v9  ;;  %v3192_v48 = vrot.slane %v3178_v54, %v7221_v9 }
 0x532   : > { %v3132_v60 = vpop.permute.xlu1 %3131  ;;  %v3134_v14 = vpop.permute.xlu0 %3133 }
 0x533   : > { %4970 = vbcast.lane.b32.xlu1 %v4968_v0, 256  ;;  %4963 = vbcast.lane.b32.xlu0 %v4961_v41, 256  ;;  %v3245_v2 = vcombine.low %v7978_v12, %v3132_v60  ;;  %v3246_v35 = vcombine.high %v7978_v12, %v3132_v60  ;;  %v3314_v8 = vcombine.high %v7969_v52, %v3134_v14 }
 0x536   : > { %v8097_v1 = vpop.permute.xlu1 %3135  ;;  %v3154_v34 = vpop.permute.xlu0 %3153 }
 0x537   : > { %v3193_v18 = vcombine.low %v8039_v42, %v3154_v34  ;;  %v3194_v46 = vcombine.high %v8039_v42, %v3154_v34  ;;  %4984 = vbcast.lane.b32.xlu1 %v4982_v51, 256  ;;  %4977 = vbcast.lane.b32.xlu0 %v4975_v62, 256  ;;  %v3313_v42 = vcombine.low %v7969_v52, %v3134_v14 }
 0x538   : > { %v3253_v14 = vrot.slane %v3245_v2, %v7221_v9 }
 0x539   : > { %v3201_v16 = vrot.slane %v3193_v18, %v7221_v9  ;;  %v3208_v39 = vrot.slane %v3194_v46, %v7221_v9 }
 0x53a   : > { %v3156_v19 = vpop.permute.xlu1 %3155  ;;  %v3158_v55 = vpop.permute.xlu0 %3157 }
 0x53b   : > { %v3209_v43 = vcombine.low %v3185_v15, %v3201_v16  ;;  %v3210_v38 = vcombine.high %v3185_v15, %v3201_v16  ;;  %v3225_v53 = vcombine.low %v3192_v48, %v3208_v39  ;;  %v3226_v4 = vcombine.high %v3192_v48, %v3208_v39  ;;  %4998 = vbcast.lane.b32.xlu1 %v4996_v17, 256  ;;  %v8146_v2 = vpop.eup %6920 }
 0x53c   : > { %v3261_v22 = vcombine.low %v8067_v58, %v3156_v19  ;;  %v3262_v36 = vcombine.high %v8067_v58, %v3156_v19  ;;  %v3329_v50 = vcombine.low %v8065_v59, %v3158_v55  ;;  %v3330_v37 = vcombine.high %v8065_v59, %v3158_v55  ;;  %4991 = vbcast.lane.b32.xlu0 %v4989_v28, 256 }
 0x53d   : > { %v8117_v12 = vrot.slane %v3209_v43, %v7479_v29  ;;  %v8120_v52 = vrot.slane %v3210_v38, %v7479_v29  ;;  %v8123_v0 = vrot.slane %v3225_v53, %v7479_v29  ;;  %v8126_v60 = vrot.slane %v3226_v4, %v7479_v29  ;;  %8877 = vst [vmem:[#allocation20_spill] sm:$0xff] %v8146_v2 }
 0x53e   : > { %v3260_v58 = vrot.slane %v3246_v35, %v7221_v9  ;;  %v3269_v41 = vrot.slane %v3261_v22, %v7221_v9  ;;  %v3276_v59 = vrot.slane %v3262_v36, %v7221_v9  ;;  %v3160_v40 = vpop.permute.xlu1 %3159  ;;  %v8132_v25 = vpop.permute.xlu0 %3113  ;;  %v3337_v34 = vrot.slane %v3329_v50, %v7221_v9 }
 0x53f   : > { %v3344_v62 = vrot.slane %v3330_v37, %v7221_v9  ;;  %v3321_v15 = vrot.slane %v3313_v42, %v7221_v9  ;;  %v3328_v48 = vrot.slane %v3314_v8, %v7221_v9  ;;  %v3381_v16 = vcombine.low %v7974_v56, %v8097_v1 }
 0x540   : > { %v3277_v18 = vcombine.low %v3253_v14, %v3269_v41  ;;  %v3278_v46 = vcombine.high %v3253_v14, %v3269_v41  ;;  %v3293_v17 = vcombine.low %v3260_v58, %v3276_v59  ;;  %v3294_v28 = vcombine.high %v3260_v58, %v3276_v59 }
 0x541   : > { %v3382_v39 = vcombine.high %v7974_v56, %v8097_v1  ;;  %v3345_v38 = vcombine.low %v3321_v15, %v3337_v34  ;;  %v3346_v53 = vcombine.high %v3321_v15, %v3337_v34  ;;  %v3361_v4 = vcombine.low %v3328_v48, %v3344_v62 }
 0x542   : > { %v8149_v35 = vrot.slane %v3277_v18, %v7479_v29  ;;  %v8152_v19 = vrot.slane %v3278_v46, %v7479_v29  ;;  %v3301_v55 = vrot.slane %v3293_v17, %v7479_v29  ;;  %v3308_v42 = vrot.slane %v3294_v28, %v7479_v29  ;;  %v8156_v43 = vpop.permute.xlu1 %3115  ;;  %v8158_v8 = vpop.permute.xlu0 %3117 }
 0x543   : > { %v3362_v56 = vcombine.high %v3328_v48, %v3344_v62  ;;  %v3721_v1 = vcombine.low %v8117_v12, %v8123_v0  ;;  %v3729_v22 = vcombine.low %v8120_v52, %v8126_v60  ;;  %v8167_v37 = vrot.slane %v3345_v38, %v7479_v29 }
 0x544   : > { %v6463_v36 = vcombine.high %v8149_v35, %v3301_v55  ;;  %v6464_v50 = vcombine.high %v8152_v19, %v3308_v42  ;;  %v8170_v14 = vrot.slane %v3346_v53, %v7479_v29  ;;  %v8173_v58 = vrot.slane %v3361_v4, %v7479_v29 }
 0x545   : > { %v8176_v41 = vrot.slane %v3362_v56, %v7479_v29  ;;  %v3389_v62 = vrot.slane %v3381_v16, %v7221_v9  ;;  %v3397_v17 = vcombine.low %v8075_v44, %v3160_v40  ;;  %v3398_v28 = vcombine.high %v8075_v44, %v3160_v40 }
 0x546   : > { %v8178_v59 = vpop.permute.xlu1 %3119  ;;  %v3138_v34 = vpop.permute.xlu0 %3137  ;;  %v5694_v15 = vrot.slane %v8146_v2, %v8059_v10  ;;  %v5687_v48 = vrot.slane %v8146_v2, %v8062_v11  ;;  %v3396_v38 = vrot.slane %v3382_v39, %v7221_v9  ;;  %v8193_v16 = vrot.slane %v3721_v1, %v7221_v9 }
 0x547   : > { %v8196_v53 = vrot.slane %v3729_v22, %v7221_v9  ;;  %v3737_v4 = vcombine.low %v8149_v35, %v3301_v55  ;;  %v3745_v56 = vcombine.low %v8152_v19, %v3308_v42  ;;  %v3405_v44 = vrot.slane %v3397_v17, %v7221_v9 }
 0x548   : > { %v3412_v40 = vrot.slane %v3398_v28, %v7221_v9  ;;  %5696 = vbcast.lane.b32.xlu0 %v5694_v15, 256  ;;  %5689 = vbcast.lane.b32.xlu1 %v5687_v48, 256  ;;  %v3789_v39 = vcombine.low %v8167_v37, %v8173_v58  ;;  %v3797_v1 = vcombine.low %v8170_v14, %v8176_v41 }
 0x549   : > { %v5715_v35 = vrot.slane %v8146_v2, %v8086_v23  ;;  %v5701_v19 = vrot.slane %v8146_v2, %v8078_v47  ;;  %v3413_v55 = vcombine.low %v3389_v62, %v3405_v44  ;;  %v3414_v42 = vcombine.high %v3389_v62, %v3405_v44 }
 0x54a   : > { %v3140_v6 = vpop.permute.xlu1 %3139  ;;  %v8202_v46 = vpop.permute.xlu0 %3141  ;;  %v3429_v22 = vcombine.low %v3396_v38, %v3412_v40  ;;  %v3430_v17 = vcombine.high %v3396_v38, %v3412_v40  ;;  %v3449_v28 = vcombine.low %v8004_v63, %v3138_v34  ;;  %v3450_v15 = vcombine.high %v8004_v63, %v3138_v34 }
 0x54b   : > { %v3517_v48 = vcombine.low %v8001_v33, %v3140_v6  ;;  %v3518_v18 = vcombine.high %v8001_v33, %v3140_v6  ;;  %v8217_v51 = vrot.slane %v3413_v55, %v7479_v29  ;;  %v8220_v54 = vrot.slane %v3414_v42, %v7479_v29 }
 0x54c   : > { %v8223_v23 = vrot.slane %v3429_v22, %v7479_v29  ;;  %v8226_v62 = vrot.slane %v3430_v17, %v7479_v29  ;;  %5717 = vbcast.lane.b32.xlu0 %v5715_v35, 256  ;;  %v8878_v33 = vcombine.high %v8117_v12, %v8123_v0  ;;  %v8879_v34 = vcombine.high %v8120_v52, %v8126_v60 }
 0x54d   : > { %v8243_v40 = vrot.slane %v3737_v4, %v7221_v9  ;;  %v8246_v35 = vrot.slane %v3745_v56, %v7221_v9  ;;  %5703 = vbcast.lane.b32.xlu1 %v5701_v19, 256  ;;  %v8249_v55 = vrot.slane %v6463_v36, %v7221_v9  ;;  %v8252_v12 = vrot.slane %v6464_v50, %v7221_v9 }
 0x54e   : > { %v8228_v38 = vpop.permute.xlu1 %3143  ;;  %v3162_v63 = vpop.permute.xlu0 %3161  ;;  %v8234_v6 = vrot.slane %v8878_v33, %v7221_v9  ;;  %v8240_v44 = vrot.slane %v8879_v34, %v7221_v9  ;;  %v6467_v0 = vcombine.high %v8217_v51, %v8223_v23  ;;  %v8259_v60 = vrot.slane %v3789_v39, %v7221_v9 }
 0x54f   : > { %v8262_v4 = vrot.slane %v3797_v1, %v7221_v9  ;;  %v3805_v56 = vcombine.low %v8217_v51, %v8223_v23  ;;  %v5708_v36 = vrot.slane %v8146_v2, %v8073_v49  ;;  %v3457_v50 = vrot.slane %v3449_v28, %v7221_v9 }
 0x550   : > { %v3464_v19 = vrot.slane %v3450_v15, %v7221_v9  ;;  %v3525_v42 = vrot.slane %v3517_v48, %v7221_v9  ;;  %v3532_v22 = vrot.slane %v3518_v18, %v7221_v9  ;;  %v3585_v39 = vcombine.low %v8014_v57, %v8202_v46 }
 0x551   : > { %5710 = vbcast.lane.b32.xlu1 %v5708_v36, 256  ;;  %v3586_v1 = vcombine.high %v8014_v57, %v8202_v46  ;;  %v3465_v23 = vcombine.low %v8132_v25, %v3162_v63  ;;  %v3466_v51 = vcombine.high %v8132_v25, %v3162_v63  ;;  %v3813_v28 = vcombine.low %v8220_v54, %v8226_v62 }
 0x552   : > { %v3164_v17 = vpop.permute.xlu1 %3163  ;;  %v3166_v33 = vpop.permute.xlu0 %3165  ;;  %v5722_v15 = vrot.slane %v8146_v2, %v8082_v30  ;;  %v8285_v34 = vrot.slane %v3805_v56, %v7221_v9  ;;  %v3653_v57 = vcombine.low %v8011_v13, %v8228_v38 }
 0x553   : > { %v3533_v18 = vcombine.low %v8156_v43, %v3164_v17  ;;  %v3534_v48 = vcombine.high %v8156_v43, %v3164_v17  ;;  %v3473_v46 = vrot.slane %v3465_v23, %v7221_v9  ;;  %v3480_v25 = vrot.slane %v3466_v51, %v7221_v9 }
 0x554   : > { %v3601_v52 = vcombine.low %v8158_v8, %v3166_v33  ;;  %v3602_v30 = vcombine.high %v8158_v8, %v3166_v33 }
 0x555   : > { %v3541_v63 = vrot.slane %v3533_v18, %v7221_v9  ;;  %v3548_v36 = vrot.slane %v3534_v48, %v7221_v9  ;;  %5724 = vbcast.lane.b32.xlu1 %v5722_v15, 256  ;;  %v3481_v43 = vcombine.low %v3457_v50, %v3473_v46  ;;  %v3482_v17 = vcombine.high %v3457_v50, %v3473_v46 }
 0x556   : > { %v3497_v56 = vcombine.low %v3464_v19, %v3480_v25  ;;  %v3498_v10 = vcombine.high %v3464_v19, %v3480_v25  ;;  %v8326_v48 = vrot.slane %v3813_v28, %v7221_v9  ;;  %v8880_v46 = vcombine.high %v8167_v37, %v8173_v58 }
 0x557   : > { %v3549_v49 = vcombine.low %v3525_v42, %v3541_v63  ;;  %v3550_v11 = vcombine.high %v3525_v42, %v3541_v63  ;;  %v3565_v47 = vcombine.low %v3532_v22, %v3548_v36  ;;  %v3566_v27 = vcombine.high %v3532_v22, %v3548_v36 }
 0x558   : > { %v8296_v23 = vrot.slane %v3481_v43, %v7479_v29  ;;  %v8299_v51 = vrot.slane %v3482_v17, %v7479_v29  ;;  %v8302_v18 = vrot.slane %v3497_v56, %v7479_v29  ;;  %v8305_v8 = vrot.slane %v3498_v10, %v7479_v29 }
 0x559   : > { %v8308_v50 = vrot.slane %v3549_v49, %v7479_v29  ;;  %v8311_v19 = vrot.slane %v3550_v11, %v7479_v29  ;;  %v8314_v42 = vrot.slane %v3565_v47, %v7479_v29  ;;  %v8317_v22 = vrot.slane %v3566_v27, %v7479_v29 }
 0x55a   : > { %v3609_v10 = vrot.slane %v3601_v52, %v7221_v9  ;;  %v3616_v49 = vrot.slane %v3602_v30, %v7221_v9  ;;  %v3753_v47 = vcombine.low %v8193_v16, %v8196_v53  ;;  %v8338_v25 = vrot.slane %v8880_v46, %v7221_v9  ;;  %v3168_v46 = vpop.permute.xlu1 %3167 }
 0x55b   : > { %v8881_v30 = vcombine.high %v8170_v14, %v8176_v41  ;;  %v3593_v28 = vrot.slane %v3585_v39, %v7221_v9  ;;  %v3600_v63 = vrot.slane %v3586_v1, %v7221_v9  ;;  %v8349_v36 = vrot.slane %v6467_v0, %v7221_v9 }
 0x55c   : > { %v3654_v43 = vcombine.high %v8011_v13, %v8228_v38  ;;  %v3661_v37 = vrot.slane %v3653_v57, %v7221_v9  ;;  %v3857_v58 = vcombine.low %v8296_v23, %v8302_v18  ;;  %v3761_v39 = vrot.slane %v3753_v47, %v7479_v29 }
 0x55d   : > { %v8344_v52 = vrot.slane %v8881_v30, %v7221_v9  ;;  %v3617_v17 = vcombine.low %v3593_v28, %v3609_v10  ;;  %v3618_v56 = vcombine.high %v3593_v28, %v3609_v10  ;;  %v3633_v14 = vcombine.low %v3600_v63, %v3616_v49 }
 0x55e   : > { %v3634_v41 = vcombine.high %v3600_v63, %v3616_v49  ;;  %v3769_v1 = vcombine.low %v8243_v40, %v8246_v35  ;;  %v3821_v0 = vcombine.low %v8259_v60, %v8262_v4  ;;  %v3837_v13 = vcombine.low %v8285_v34, %v8326_v48 }
 0x55f   : > { %v8364_v38 = vrot.slane %v3617_v17, %v7479_v29  ;;  %v8367_v57 = vrot.slane %v3618_v56, %v7479_v29  ;;  %v8370_v10 = vrot.slane %v3633_v14, %v7479_v29  ;;  %v3669_v63 = vcombine.low %v8178_v59, %v3168_v46 }
 0x560   : > { %v8373_v49 = vrot.slane %v3634_v41, %v7479_v29  ;;  %v3777_v47 = vrot.slane %v3769_v1, %v7479_v29  ;;  %v3829_v30 = vrot.slane %v3821_v0, %v7479_v29  ;;  %v3845_v28 = vrot.slane %v3837_v13, %v7479_v29 }
 0x561   : > { %v3873_v17 = vcombine.low %v8308_v50, %v8314_v42  ;;  %v3881_v56 = vcombine.low %v8311_v19, %v8317_v22  ;;  %v6473_v14 = vcombine.high %v8364_v38, %v8370_v10  ;;  %v3668_v13 = vrot.slane %v3654_v43, %v7221_v9 }
 0x562   : > { %v3785_v27 = vcombine.low %v3761_v39, %v3777_v47  ;;  %v3853_v1 = vcombine.low %v3829_v30, %v3845_v28  ;;  %v3786_v11 = vcombine.high %v3761_v39, %v3777_v47  ;;  %v3854_v0 = vcombine.high %v3829_v30, %v3845_v28 }
 0x563   : > { %v3865_v15 = vcombine.low %v8299_v51, %v8305_v8  ;;  %v3925_v33 = vcombine.low %v8364_v38, %v8370_v10  ;;  %v3933_v26 = vcombine.low %v8367_v57, %v8373_v49  ;;  %v3670_v5 = vcombine.high %v8178_v59, %v3168_v46 }
 0x564   : > { %v6814_v2 = vpack.c.bf16 %v3853_v1, %v3785_v27  ;;  %v6820_v7 = vpack.c.bf16 %v3854_v0, %v3786_v11  ;;  %v3677_v41 = vrot.slane %v3669_v63, %v7221_v9  ;;  %v8397_v39 = vrot.slane %v3857_v58, %v7221_v9 }
 0x565   : > { %v8400_v43 = vrot.slane %v3873_v17, %v7221_v9  ;;  %v8403_v47 = vrot.slane %v3881_v56, %v7221_v9  ;;  %v3754_v38 = vcombine.high %v8193_v16, %v8196_v53  ;;  %v3684_v11 = vrot.slane %v3670_v5, %v7221_v9 }
 0x566   : > { %6815 = vmatpush3.bf16.msra.mxu0 %v6814_v2  ;;  %6821 = vmatpush3.bf16.msra.mxu1 %v6820_v7  ;;  %v3685_v27 = vcombine.low %v3661_v37, %v3677_v41  ;;  %v3686_v59 = vcombine.high %v3661_v37, %v3677_v41  ;;  %v8409_v46 = vrot.slane %v3865_v15, %v7221_v9  ;;  %v8882_v30 = vmov 0.0|0.0  }
 0x567   : > { %v8412_v58 = vrot.slane %v3925_v33, %v7221_v9  ;;  %v8415_v10 = vrot.slane %v3933_v26, %v7221_v9  ;;  %6816 = vmatprep.subr.bf16.mxu0 %v8882_v30  ;;  %6822 = vmatprep.subr.bf16.mxu1 %v8882_v30  ;;  %v3701_v5 = vcombine.low %v3668_v13, %v3684_v11 }
 0x568   : > { %v3693_v2 = vrot.slane %v3685_v27, %v7479_v29  ;;  %v3700_v7 = vrot.slane %v3686_v59, %v7479_v29  ;;  %v3702_v16 = vcombine.high %v3668_v13, %v3684_v11  ;;  %v8883_v53 = vcombine.high %v8220_v54, %v8226_v62 }
 0x569   : > { %v8884_v26 = vcombine.high %v8296_v23, %v8302_v18  ;;  %v3905_v37 = vcombine.low %v8400_v43, %v8403_v47  ;;  %v3770_v28 = vcombine.high %v8243_v40, %v8246_v35  ;;  %v3709_v63 = vrot.slane %v3701_v5, %v7479_v29 }
 0x56a   : > { %v8425_v15 = vrot.slane %v8883_v53, %v7221_v9  ;;  %v3716_v17 = vrot.slane %v3702_v16, %v7479_v29  ;;  %v3822_v54 = vcombine.high %v8259_v60, %v8262_v4  ;;  %v3838_v62 = vcombine.high %v8285_v34, %v8326_v48 }
 0x56b   : > { %v8431_v33 = vrot.slane %v8884_v26, %v7221_v9  ;;  %v3889_v23 = vcombine.low %v8397_v39, %v8409_v46  ;;  %v3957_v18 = vcombine.low %v8412_v58, %v8415_v10  ;;  %v3768_v56 = vrot.slane %v3754_v38, %v7479_v29 }
 0x56c   : > { %v3784_v40 = vrot.slane %v3770_v28, %v7479_v29  ;;  %v3941_v35 = vcombine.low %v3693_v2, %v3709_v63  ;;  %v3949_v41 = vcombine.low %v3700_v7, %v3716_v17  ;;  %v6475_v1 = vcombine.high %v3693_v2, %v3709_v63 }
 0x56d   : > { %v6476_v0 = vcombine.high %v3700_v7, %v3716_v17  ;;  %v3836_v60 = vrot.slane %v3822_v54, %v7479_v29  ;;  %v3852_v4 = vrot.slane %v3838_v62, %v7479_v29  ;;  %v8885_v48 = vcombine.high %v8299_v51, %v8305_v8 }
 0x56e   : > { %v3787_v13 = vcombine.low %v3768_v56, %v3784_v40  ;;  %v3788_v34 = vcombine.high %v3768_v56, %v3784_v40  ;;  %v8458_v38 = vrot.slane %v3941_v35, %v7221_v9  ;;  %v8461_v27 = vrot.slane %v3949_v41, %v7221_v9 }
 0x56f   : > { %v8455_v11 = vrot.slane %v8885_v48, %v7221_v9  ;;  %v3913_v59 = vrot.slane %v3905_v37, %v7479_v29  ;;  %v8886_v2 = vcombine.high %v8308_v50, %v8314_v42  ;;  %v8887_v51 = vcombine.high %v8311_v19, %v8317_v22 }
 0x570   : > { %v3855_v5 = vcombine.low %v3836_v60, %v3852_v4  ;;  %v3856_v16 = vcombine.high %v3836_v60, %v3852_v4  ;;  %v8477_v53 = vrot.slane %v6473_v14, %v7221_v9  ;;  %v3897_v26 = vrot.slane %v3889_v23, %v7479_v29 }
 0x571   : > { %v8468_v7 = vrot.slane %v8886_v2, %v7221_v9  ;;  %v8474_v8 = vrot.slane %v8887_v51, %v7221_v9  ;;  %v3973_v37 = vcombine.low %v8458_v38, %v8461_v27  ;;  %v4025_v50 = vcombine.low %v8234_v6, %v8240_v44 }
 0x572   : > { %v8888_v42 = vcombine.high %v8367_v57, %v8373_v49  ;;  %v3965_v22 = vrot.slane %v3957_v18, %v7479_v29  ;;  %v8491_v28 = vpack.c.bf16 %v3855_v5, %v3787_v13  ;;  %v8493_v14 = vpack.c.bf16 %v3856_v16, %v3788_v34 }
 0x573   : > { %v3921_v63 = vcombine.low %v3897_v26, %v3913_v59  ;;  %v3981_v17 = vrot.slane %v3973_v37, %v7479_v29  ;;  %v3922_v54 = vcombine.high %v3897_v26, %v3913_v59  ;;  %v4041_v62 = vcombine.low %v8249_v55, %v8252_v12 }
 0x574   : > { %v8488_v19 = vrot.slane %v8888_v42, %v7221_v9  ;;  %v4093_v23 = vcombine.low %v8338_v25, %v8344_v52  ;;  %v4109_v57 = vcombine.low %v8349_v36, %v8425_v15  ;;  %v4161_v49 = vcombine.low %v8431_v33, %v8455_v11 }
 0x575   : > { %v4177_v18 = vcombine.low %v8468_v7, %v8474_v8  ;;  %v4220_v56 = vrot.slane %v6475_v1, %v7221_v9  ;;  %v4228_v40 = vrot.slane %v6476_v0, %v7221_v9  ;;  %v3989_v35 = vcombine.low %v3965_v22, %v3981_v17 }
 0x576   : > { %v3990_v41 = vcombine.high %v3965_v22, %v3981_v17  ;;  %v4033_v13 = vrot.slane %v4025_v50, %v7479_v29  ;;  %v4049_v60 = vrot.slane %v4041_v62, %v7479_v29  ;;  %v4101_v4 = vrot.slane %v4093_v23, %v7479_v29 }
 0x577   : > { %v4117_v34 = vrot.slane %v4109_v57, %v7479_v29  ;;  %v6817_v48 = vpack.c.bf16 %v3989_v35, %v3921_v63  ;;  %v4169_v2 = vrot.slane %v4161_v49, %v7479_v29  ;;  %v4185_v0 = vrot.slane %v4177_v18, %v7479_v29 }
 0x578   : > { %v6823_v59 = vpack.c.bf16 %v3990_v41, %v3922_v54  ;;  %v4057_v51 = vcombine.low %v4033_v13, %v4049_v60  ;;  %v4058_v16 = vcombine.high %v4033_v13, %v4049_v60  ;;  %v4229_v26 = vcombine.low %v8477_v53, %v8488_v19 }
 0x579   : > { %v4125_v5 = vcombine.low %v4101_v4, %v4117_v34  ;;  %v4126_v1 = vcombine.high %v4101_v4, %v4117_v34  ;;  %6818 = vmatpush3.bf16.msra.mxu0 %v6817_v48  ;;  %v4245_v37 = vcombine.low %v4220_v56, %v4228_v40  ;;  %v4026_v22 = vcombine.high %v8234_v6, %v8240_v44 }
 0x57a   : > { %6824 = vmatpush3.bf16.msra.mxu1 %v6823_v59  ;;  %6825 = vmatprep.subr.bf16.mxu0 %v8882_v30  ;;  %v4193_v63 = vcombine.low %v4169_v2, %v4185_v0  ;;  %v4237_v17 = vrot.slane %v4229_v26, %v7479_v29  ;;  %v4194_v62 = vcombine.high %v4169_v2, %v4185_v0 }
 0x57b   : > { %6831 = vmatprep.subr.bf16.mxu1 %v8882_v30  ;;  %v8518_v50 = vpack.c.bf16 %v4125_v5, %v4057_v51  ;;  %v8520_v42 = vpack.c.bf16 %v4126_v1, %v4058_v16  ;;  %v4253_v54 = vrot.slane %v4245_v37, %v7479_v29  ;;  %v4040_v23 = vrot.slane %v4026_v22, %v7479_v29 }
 0x57c   : > { %v4042_v57 = vcombine.high %v8249_v55, %v8252_v12  ;;  %v4094_v49 = vcombine.high %v8338_v25, %v8344_v52  ;;  %v4110_v18 = vcombine.high %v8349_v36, %v8425_v15  ;;  %v4162_v6 = vcombine.high %v8431_v33, %v8455_v11 }
 0x57d   : > { %v4261_v35 = vcombine.low %v4237_v17, %v4253_v54  ;;  %v4262_v41 = vcombine.high %v4237_v17, %v4253_v54  ;;  %v4178_v44 = vcombine.high %v8468_v7, %v8474_v8  ;;  %v4230_v12 = vcombine.high %v8477_v53, %v8488_v19 }
 0x57e   : > { %v4056_v13 = vrot.slane %v4042_v57, %v7479_v29  ;;  %v4108_v60 = vrot.slane %v4094_v49, %v7479_v29  ;;  %v4124_v55 = vrot.slane %v4110_v18, %v7479_v29  ;;  %v4176_v36 = vrot.slane %v4162_v6, %v7479_v29 }
 0x57f   : > { %v8542_v25 = vpack.c.bf16 %v4261_v35, %v4193_v63  ;;  %v8544_v52 = vpack.c.bf16 %v4262_v41, %v4194_v62  ;;  %v4192_v15 = vrot.slane %v4178_v44, %v7479_v29  ;;  %v4246_v34 = vcombine.high %v4220_v56, %v4228_v40 }
 0x580   : > { %v4059_v33 = vcombine.low %v4040_v23, %v4056_v13  ;;  %v4127_v11 = vcombine.low %v4108_v60, %v4124_v55  ;;  %v4060_v7 = vcombine.high %v4040_v23, %v4056_v13  ;;  %v4128_v8 = vcombine.high %v4108_v60, %v4124_v55 }
 0x581   : > { %v4195_v4 = vcombine.low %v4176_v36, %v4192_v15  ;;  %v4196_v48 = vcombine.high %v4176_v36, %v4192_v15  ;;  %v4244_v53 = vrot.slane %v4230_v12, %v7479_v29  ;;  %v4260_v19 = vrot.slane %v4246_v34, %v7479_v29 }
 0x582   : > { %v8548_v59 = vpack.c.bf16 %v4127_v11, %v4059_v33  ;;  %v8550_v2 = vpack.c.bf16 %v4128_v8, %v4060_v7  ;;  %v3974_v23 = vcombine.high %v8458_v38, %v8461_v27  ;;  %v3958_v41 = vcombine.high %v8412_v58, %v8415_v10 }
 0x583   : > { %v4263_v51 = vcombine.low %v4244_v53, %v4260_v19  ;;  %v4264_v5 = vcombine.high %v4244_v53, %v4260_v19  ;;  %v8889_v8 = vmov 0.0  }
 0x584   : > { %v3988_v38 = vrot.slane %v3974_v23, %v7479_v29  ;;  %v3972_v13 = vrot.slane %v3958_v41, %v7479_v29 }
 0x585   : > { %v8554_v16 = vpack.c.bf16 %v4263_v51, %v4195_v4  ;;  %v8556_v1 = vpack.c.bf16 %v4264_v5, %v4196_v48  ;;  %v8892_v5 = vld [vmem:[#allocation17_spill] sm:$0xff] }
 0x586   : > { %v3991_v12 = vcombine.low %v3972_v13, %v3988_v38 }
 0x5a1   : > { %v4957_v0 = vpop.permute.xlu1 %4956  ;;  %v4950_v26 = vpop.permute.xlu0 %4949 }
 0x5a2   : > { %v5001_v37 = vsub.f32 %v7940_v32, %v4957_v0  ;;  %v5000_v56 = vsub.f32 %v7936_v21, %v4950_v26  ;;  %v3906_v32 = vcombine.high %v8400_v43, %v8403_v47 }
 0x5a4   : > { %v5010_v40 = vmul.f32 1.442695, %v5001_v37  ;;  %v5008_v22 = vmul.f32 1.442695, %v5000_v56  ;;  %v3920_v44 = vrot.slane %v3906_v32, %v7479_v29 }
 0x5a5   : > { %v4971_v63 = vpop.permute.xlu1 %4970  ;;  %v4964_v54 = vpop.permute.xlu0 %4963 }
 0x5a6   : > { %6922 = vpow2.f32 %v5010_v40  ;;  %v5003_v17 = vsub.f32 %v7946_v45, %v4971_v63  ;;  %v5002_v62 = vsub.f32 %v7944_v3, %v4964_v54  ;;  %v3890_v3 = vcombine.high %v8397_v39, %v8409_v46 }
 0x5a7   : > { %6924 = vpow2.f32 %v5008_v22  ;;  %v3992_v39 = vcombine.high %v3972_v13, %v3988_v38 }
 0x5a8   : > { %v5012_v57 = vmul.f32 1.442695, %v5002_v62  ;;  %v5014_v18 = vmul.f32 1.442695, %v5003_v17  ;;  %v3904_v10 = vrot.slane %v3890_v3, %v7479_v29  ;;  %v8893_v17 = vld [vmem:[#allocation10_spill] sm:$0xff] }
 0x5a9   : > { %v4985_v49 = vpop.permute.xlu1 %4984  ;;  %v4978_v35 = vpop.permute.xlu0 %4977 }
 0x5aa   : > { %v5005_v21 = vsub.f32 %v7954_v31, %v4985_v49  ;;  %6926 = vpow2.f32 %v5012_v57  ;;  %v5004_v45 = vsub.f32 %v7952_v24, %v4978_v35  ;;  %v3923_v15 = vcombine.low %v3904_v10, %v3920_v44 }
 0x5ab   : > { %6928 = vpow2.f32 %v5014_v18 }
 0x5ac   : > { %v5016_v27 = vmul.f32 1.442695, %v5004_v45  ;;  %v5018_v43 = vmul.f32 1.442695, %v5005_v21  ;;  %v6829_v7 = vpack.c.bf16 %v3991_v12, %v3923_v15 }
 0x5ad   : > { %v4999_v6 = vpop.permute.xlu1 %4998 }
 0x5ae   : > { %v5007_v31 = vsub.f32 %v7962_v20, %v4999_v6  ;;  %v4992_v47 = vpop.permute.xlu0 %4991  ;;  %6930 = vpow2.f32 %v5016_v27 }
 0x5af   : > { %v5006_v58 = vsub.f32 %v7960_v61, %v4992_v47  ;;  %6932 = vpow2.f32 %v5018_v43  ;;  %v3924_v61 = vcombine.high %v3904_v10, %v3920_v44  ;;  %v5024_v43 = vld [vmem:[#allocation4] sm:$0xff] }
 0x5b0   : > { %v6923_v24 = vpop.eup %6922  ;;  %v5022_v36 = vmul.f32 1.442695, %v5007_v31 }
 0x5b1   : > { %v6925_v46 = vpop.eup %6924  ;;  %v5020_v60 = vmul.f32 1.442695, %v5006_v58  ;;  %6710 = vmatmul.mubr.msk.f32.vlgmr.msra.gmra.mrb[16].mxu1 %vm1251_vm2, %v6923_v24  ;;  %v5029_v55 = vsel %vm1251_vm2, %v6923_v24, 0.0  ;;  %v6835_v33 = vpack.c.bf16 %v3992_v39, %v3924_v61  ;;  %v5741_v39 = vld [vmem:[#allocation5 + $0x8] sm:$0xff] }
 0x5b2   : > { %6699 = vmatmul.mubr.msk.f32.vlgmr.msra.gmra.mrb[16].mxu0 %vm1251_vm2, %v6925_v46  ;;  %6833 = vmatpush3.bf16.msra.mxu1 %v8493_v14  ;;  %v5026_v20 = vsel %vm1251_vm2, %v6925_v46, 0.0  ;;  %v5740_v46 = vld [vmem:[#allocation5] sm:$0xff] }
 0x5b3   : > { %6934 = vpow2.f32 %v5020_v60  ;;  %6827 = vmatpush3.bf16.msra.mxu0 %v8491_v28  ;;  %5030 = vadd.xlane.f32.xlu1 %v5029_v55 }
 0x5b4   : > { %5027 = vadd.xlane.f32.xlu0 %v5026_v20  ;;  %6828 = vmatprep.subr.bf16.mxu0 %v8882_v30  ;;  %v6927_v11 = vpop.eup %6926  ;;  %6936 = vpow2.f32 %v5022_v36 }
 0x5b5   : > { %6834 = vmatprep.subr.bf16.mxu1 %v8882_v30  ;;  %6720 = vmatprep.mubr.msk.f32.mxu0 %vm7011_vm3, %v8889_v8  ;;  %v5032_v14 = vsel %vm1251_vm2, %v6927_v11, 0.0  ;;  %v6929_v28 = vpop.eup %6928 }
 0x5b6   : > { %6836 = vmatpush3.bf16.msra.mxu1 %v6835_v33  ;;  %6731 = vmatprep.mubr.msk.f32.mxu1 %vm7011_vm3, %v8889_v8  ;;  %v5035_v48 = vsel %vm1251_vm2, %v6929_v28, 0.0 }
 0x5b7   : > { %6830 = vmatpush3.bf16.msra.mxu0 %v6829_v7  ;;  %6843 = vmatprep.subr.bf16.mxu1 %v8882_v30  ;;  %v5742_v7 = vld [vmem:[#allocation5 + $0x10] sm:$0xff] }
 0x5b8   : > { %5033 = vadd.xlane.f32.xlu0 %v5032_v14  ;;  %6837 = vmatprep.subr.bf16.mxu0 %v8882_v30  ;;  %v6931_v4 = vpop.eup %6930 }
 0x5b9   : > { %6732 = vmatmul.mubr.msk.f32.vlgmr.msra.gmra.mrb[18].mxu1 %vm1251_vm2, %v6929_v28  ;;  %v5038_v34 = vsel %vm1251_vm2, %v6931_v4, 0.0  ;;  %v6933_v53 = vpop.eup %6932 }
 0x5ba   : > { %6721 = vmatmul.mubr.msk.f32.vlgmr.msra.gmra.mrb[18].mxu0 %vm1251_vm2, %v6927_v11  ;;  %6845 = vmatpush3.bf16.msra.mxu1 %v8520_v42  ;;  %v5690_v0 = vpop.permute.xlu1 %5689  ;;  %v5697_v37 = vpop.permute.xlu0 %5696  ;;  %v5743_v11 = vld [vmem:[#allocation5 + $0x18] sm:$0xff] }
 0x5bb   : > { %6839 = vmatpush3.bf16.msra.mxu0 %v8518_v50  ;;  %5039 = vadd.xlane.f32.xlu1 %v5038_v34  ;;  %v5041_v50 = vsel %vm1251_vm2, %v6933_v53, 0.0  ;;  %v5749_v60 = vmul.f32 %v5741_v39, %v5697_v37  ;;  %v5748_v55 = vmul.f32 %v5740_v46, %v5690_v0 }
 0x5bc   : > { %5036 = vadd.xlane.f32.xlu0 %v5035_v48  ;;  %6840 = vmatprep.subr.bf16.mxu0 %v8882_v30 }
 0x5bd   : > { %v6935_v19 = vpop.eup %6934  ;;  %6846 = vmatprep.subr.bf16.mxu1 %v8882_v30  ;;  %6742 = vmatprep.mubr.msk.f32.mxu0 %vm7011_vm3, %v8889_v8 }
 0x5be   : > { %6848 = vmatpush3.bf16.msra.mxu1 %v8544_v52  ;;  %v5044_v42 = vsel %vm1251_vm2, %v6935_v19, 0.0  ;;  %6753 = vmatprep.mubr.msk.f32.mxu1 %vm7011_vm3, %v8889_v8  ;;  %v6937_v51 = vpop.eup %6936  ;;  %v5718_v40 = vpop.permute.xlu0 %5717 }
 0x5bf   : > { %6842 = vmatpush3.bf16.msra.mxu0 %v8542_v25  ;;  %5045 = vadd.xlane.f32.xlu1 %v5044_v42  ;;  %v5047_v52 = vsel %vm1251_vm2, %v6937_v51, 0.0  ;;  %v8890_v25 = vld [vmem:[#allocation18_spill] sm:$0xff]  ;;  %v5704_v26 = vpop.permute.xlu1 %5703  ;;  %v5745_v42 = vld [vmem:[#allocation5 + $0x28] sm:$0xff] }
 0x5c0   : > { %5042 = vadd.xlane.f32.xlu0 %v5041_v50  ;;  %6849 = vmatprep.subr.bf16.mxu0 %v8882_v30  ;;  %v5750_v14 = vmul.f32 %v5742_v7, %v5704_v26  ;;  %v5744_v50 = vld [vmem:[#allocation5 + $0x20] sm:$0xff]  ;;  %v5747_v26 = vld [vmem:[#allocation5 + $0x38] sm:$0xff] }
 0x5c1   : > { %6754 = vmatmul.mubr.msk.f32.vlgmr.msra.gmra.mrb[20].mxu1 %vm1251_vm2, %v6933_v53  ;;  %6855 = vmatprep.subr.bf16.mxu1 %v8882_v30 }
 0x5c2   : > { %6743 = vmatmul.mubr.msk.f32.vlgmr.msra.gmra.mrb[20].mxu0 %vm1251_vm2, %v6931_v4  ;;  %6857 = vmatpush3.bf16.msra.mxu1 %v8550_v2 }
 0x5c3   : > { %6851 = vmatpush3.bf16.msra.mxu0 %v8548_v59  ;;  %6858 = vmatprep.subr.bf16.mxu1 %v8882_v30  ;;  %v8891_v59 = vld [vmem:[#allocation20_spill] sm:$0xff]  ;;  %v5711_v56 = vpop.permute.xlu1 %5710 }
 0x5c4   : > { %5048 = vadd.xlane.f32.xlu0 %v5047_v52  ;;  %6852 = vmatprep.subr.bf16.mxu0 %v8882_v30  ;;  %v5736_v2 = vrot.slane %v8891_v59, %v8890_v25  ;;  %v5729_v30 = vrot.slane %v8891_v59, %v8892_v5  ;;  %v5025_v13 = vmul.f32 %v8891_v59, %v5024_v43 }
 0x5c5   : > { %6764 = vmatprep.mubr.msk.f32.mxu0 %vm7011_vm3, %v8889_v8  ;;  %6775 = vmatprep.mubr.msk.f32.mxu1 %vm7011_vm3, %v8889_v8  ;;  %v5751_v8 = vmul.f32 %v5743_v11, %v5711_v56  ;;  %v5752_v52 = vmul.f32 %v5744_v50, %v5718_v40  ;;  %v5746_v56 = vld [vmem:[#allocation5 + $0x30] sm:$0xff] }
 0x5c6   : > { %6860 = vmatpush3.bf16.msra.mxu1 %v8556_v1 }
 0x5c7   : > { %6854 = vmatpush3.bf16.msra.mxu0 %v8554_v16  ;;  %v5725_v1 = vpop.permute.xlu1 %5724 }
 0x5c9   : > { %6776 = vmatmul.mubr.msk.f32.vlgmr.msra.gmra.mrb[22].mxu1 %vm1251_vm2, %v6937_v51  ;;  %v5753_v51 = vmul.f32 %v5745_v42, %v5725_v1 }
 0x5ca   : > { %6765 = vmatmul.mubr.msk.f32.vlgmr.msra.gmra.mrb[22].mxu0 %vm1251_vm2, %v6935_v19 }
 0x5d0   : > { %5738 = vbcast.lane.b32.xlu1 %v5736_v2, 256 }
 0x5da   : > { %5731 = vbcast.lane.b32.xlu0 %v5729_v30, 256 }
 0x640   : > { %v5031_v16 = vpop.xlane.xlu1 %5030 }
 0x641   : > { %v5028_v22 = vpop.xlane.xlu0 %5027  ;;  %v5065_v54 = vrot.slane %v5031_v16, %v8893_v17 }
 0x642   : > { %v5061_v62 = vrot.slane %v5028_v22, %v8893_v17 }
 0x644   : > { %v5090_v32 = vsel %vm4925_vm5, %v5065_v54, %v5061_v62 }
 0x645   : > { %v5034_v63 = vpop.xlane.xlu0 %5033 }
 0x646   : > { %v5069_v23 = vrot.slane %v5034_v63, %v8893_v17 }
 0x648   : > { %v5040_v57 = vpop.xlane.xlu1 %5039  ;;  %v5091_v21 = vsel %vm4927_vm6, %v5069_v23, %v5090_v32  ;;  %v8894_v32 = vld [vmem:[#allocation13_spill] sm:$0xff] (!%p6493_p6) }
 0x649   : > { %v5037_v49 = vpop.xlane.xlu0 %5036  ;;  %v5077_v35 = vrot.slane %v5040_v57, %v8893_v17 }
 0x64a   : > { %v5073_v18 = vrot.slane %v5037_v49, %v8893_v17 }
 0x64c   : > { %v5092_v41 = vsel %vm4929_vm7, %v5073_v18, %v5091_v21  ;;  %v5046_v45 = vpop.xlane.xlu1 %5045  ;;  %v8895_v21 = vld [vmem:[#allocation11_spill] sm:$0xff] (!%p6493_p6) }
 0x64d   : > { %v5043_v3 = vpop.xlane.xlu0 %5042  ;;  %v5085_v27 = vrot.slane %v5046_v45, %v8893_v17  ;;  %v5093_v6 = vsel %vm4931_vm8, %v5077_v35, %v5092_v41  ;;  %v8896_v41 = vld [vmem:[#allocation14_spill] sm:$0xff] (!%p6493_p6) }
 0x64e   : > { %v5081_v38 = vrot.slane %v5043_v3, %v8893_v17  ;;  %v8897_v3 = vld [vmem:[#allocation12_spill] sm:$0xff] (!%p6493_p6) }
 0x650   : > { %v5094_v44 = vsel %vm4933_vm9, %v5081_v38, %v5093_v6  ;;  %v5739_v37 = vpop.permute.xlu1 %5738 }
 0x651   : > { %v5049_v31 = vpop.xlane.xlu0 %5048  ;;  %v5095_v58 = vsel %vm4935_vm10, %v5085_v27, %v5094_v44  ;;  %v5755_v16 = vmul.f32 %v5747_v26, %v5739_v37  ;;  %v8898_v27 = vld [vmem:[#allocation16_spill] sm:$0xff] (!%p6493_p6)  ;;  %v8899_v44 = vld [vmem:[#allocation15_spill] sm:$0xff] (!%p6493_p6) }
 0x652   : > { %v5089_v47 = vrot.slane %v5049_v31, %v8893_v17  ;;  %v8900_v31 = vld [vmem:[#allocation18_spill] sm:$0xff] (!%p6493_p6) }
 0x654   : > { %v5096_v24 = vsel %vm4937_vm11, %v5089_v47, %v5095_v58 }
 0x655   : > { %v5098_v10 = vadd.f32 %v5096_v24, %v5025_v13  ;;  %v5732_v22 = vpop.permute.xlu0 %5731  ;;  %v8901_v13 = vld [vmem:[#allocation17_spill] sm:$0xff] (!%p6493_p6) }
 0x656   : > { %v5754_v63 = vmul.f32 %v5746_v56, %v5732_v22 }
 0x657   : > { %5099 = vst.msk [vmem:[#allocation4] sm:$0xff] %vm4273_vm4, %v5098_v10 }
 0x65e   : > { %v5777_v57 = vld [vmem:[#allocation4] sm:$0xff] (!%p6493_p6) }
 0x65f   : > { %6938 = vrcp.f32 (!%p6493_p6), %v5777_v57 }
 0x669   : > { %v6939_v49 = vpop.eup (!%p6493_p6), %6938 }
 0x66a   : > { %v5805_v18 = vrot.slane (!%p6493_p6), %v6939_v49, %v8894_v32  ;;  %v5791_v35 = vrot.slane (!%p6493_p6), %v6939_v49, %v8895_v21  ;;  %v5812_v45 = vrot.slane (!%p6493_p6), %v6939_v49, %v8896_v41  ;;  %v5798_v38 = vrot.slane (!%p6493_p6), %v6939_v49, %v8897_v3 }
 0x66b   : > { %v5826_v6 = vrot.slane (!%p6493_p6), %v6939_v49, %v8898_v27  ;;  %v5819_v43 = vrot.slane (!%p6493_p6), %v6939_v49, %v8899_v44  ;;  %v5840_v47 = vrot.slane (!%p6493_p6), %v6939_v49, %v8900_v31  ;;  %v5833_v58 = vrot.slane (!%p6493_p6), %v6939_v49, %v8901_v13 }
 0x66c   : > { %5807 = vbcast.lane.b32.xlu1 (!%p6493_p6), %v5805_v18, 256  ;;  %5793 = vbcast.lane.b32.xlu0 (!%p6493_p6), %v5791_v35, 256 }
 0x670   : > { %5814 = vbcast.lane.b32.xlu1 (!%p6493_p6), %v5812_v45, 256  ;;  %5800 = vbcast.lane.b32.xlu0 (!%p6493_p6), %v5798_v38, 256 }
 0x674   : > { %5828 = vbcast.lane.b32.xlu1 (!%p6493_p6), %v5826_v6, 256  ;;  %5821 = vbcast.lane.b32.xlu0 (!%p6493_p6), %v5819_v43, 256 }
 0x678   : > { %5842 = vbcast.lane.b32.xlu1 (!%p6493_p6), %v5840_v47, 256  ;;  %5835 = vbcast.lane.b32.xlu0 (!%p6493_p6), %v5833_v58, 256 }
 0x684   : > { %v5242_v12 = vpop.f32.mrb[16].mxu1 }
 0x685   : > { %v5169_v36 = vpop.f32.mrb[16].mxu0  ;;  %v5757_v20 = vadd.f32 %v5749_v60, %v5242_v12  ;;  %v6711_v61 = vpop.f32.mrb[17].mxu1 }
 0x686   : > { %v5756_v15 = vadd.f32 %v5748_v55, %v5169_v36  ;;  %v6700_v33 = vpop.f32.mrb[17].mxu0 }
 0x687   : > { %5765 = vst.msk [vmem:[#allocation5 + $0x8] sm:$0xff] %vm4273_vm4, %v5757_v20 }
 0x688   : > { %5764 = vst.msk [vmem:[#allocation5] sm:$0xff] %vm4273_vm4, %v5756_v15 }
 0x68c   : > { %v5388_v28 = vpop.f32.mrb[18].mxu1 }
 0x68d   : > { %v5315_v4 = vpop.f32.mrb[18].mxu0  ;;  %v5759_v34 = vadd.f32 %v5751_v8, %v5388_v28  ;;  %v6733_v48 = vpop.f32.mrb[19].mxu1 }
 0x68e   : > { %v5758_v53 = vadd.f32 %v5750_v14, %v5315_v4  ;;  %v6722_v19 = vpop.f32.mrb[19].mxu0  ;;  %v5781_v36 = vld [vmem:[#allocation5 + $0x8] sm:$0xff] (!%p6493_p6) }
 0x68f   : > { %5767 = vst.msk [vmem:[#allocation5 + $0x18] sm:$0xff] %vm4273_vm4, %v5759_v34  ;;  %v5780_v10 = vld [vmem:[#allocation5] sm:$0xff] (!%p6493_p6) }
 0x690   : > { %5766 = vst.msk [vmem:[#allocation5 + $0x10] sm:$0xff] %vm4273_vm4, %v5758_v53 }
 0x694   : > { %v5534_v25 = vpop.f32.mrb[20].mxu1 }
 0x695   : > { %v5461_v59 = vpop.f32.mrb[20].mxu0  ;;  %v5761_v2 = vadd.f32 %v5753_v51, %v5534_v25  ;;  %v6755_v5 = vpop.f32.mrb[21].mxu1 }
 0x696   : > { %v5760_v30 = vadd.f32 %v5752_v52, %v5461_v59  ;;  %v6744_v0 = vpop.f32.mrb[21].mxu0  ;;  %v5783_v12 = vld [vmem:[#allocation5 + $0x18] sm:$0xff] (!%p6493_p6) }
 0x697   : > { %5769 = vst.msk [vmem:[#allocation5 + $0x28] sm:$0xff] %vm4273_vm4, %v5761_v2  ;;  %v5782_v24 = vld [vmem:[#allocation5 + $0x10] sm:$0xff] (!%p6493_p6) }
 0x698   : > { %5768 = vst.msk [vmem:[#allocation5 + $0x20] sm:$0xff] %vm4273_vm4, %v5760_v30 }
 0x69a   : > { %5776 = sbr.rel (%p6493_p6) target bundleno = 2451 (0x993), region = 84 }
 0x69c   : > { %v5680_v17 = vpop.f32.mrb[22].mxu1 }
 0x69d   : > { %v5607_v54 = vpop.f32.mrb[22].mxu0  ;;  %v5763_v1 = vadd.f32 %v5755_v16, %v5680_v17  ;;  %v6777_v40 = vpop.f32.mrb[23].mxu1 }
 0x69e   : > { %v5762_v62 = vadd.f32 %v5754_v63, %v5607_v54  ;;  %v6766_v23 = vpop.f32.mrb[23].mxu0  ;;  %v5785_v42 = vld [vmem:[#allocation5 + $0x28] sm:$0xff] (!%p6493_p6) }
 0x69f   : > { %5771 = vst.msk [vmem:[#allocation5 + $0x38] sm:$0xff] %vm4273_vm4, %v5763_v1  ;;  %v5784_v59 = vld [vmem:[#allocation5 + $0x20] sm:$0xff] (!%p6493_p6) }
 0x6a0   : > { %5770 = vst.msk [vmem:[#allocation5 + $0x30] sm:$0xff] %vm4273_vm4, %v5762_v62 }
 0x6a6   : > { %v5787_v2 = vld [vmem:[#allocation5 + $0x38] sm:$0xff] }
 0x6a7   : > { %v5786_v5 = vld [vmem:[#allocation5 + $0x30] sm:$0xff] }
 0x6de   : > { %v5808_v39 = vpop.permute.xlu1 %5807  ;;  %v5794_v46 = vpop.permute.xlu0 %5793 }
 0x6df   : > { %v5846_v60 = vmul.f32 %v5808_v39, %v5782_v24  ;;  %v5844_v55 = vmul.f32 %v5794_v46, %v5780_v10 }
 0x6e1   : > { %v5852_v15 = vcombine.low %v5844_v55, %v5846_v60  ;;  %v5853_v33 = vcombine.high %v5844_v55, %v5846_v60 }
 0x6e2   : > { %v5815_v20 = vpop.permute.xlu1 %5814  ;;  %v5801_v61 = vpop.permute.xlu0 %5800 }
 0x6e3   : > { %v5847_v11 = vmul.f32 %v5815_v20, %v5783_v12  ;;  %v5845_v7 = vmul.f32 %v5801_v61, %v5781_v36  ;;  %v5860_v34 = vrot.slane %v5852_v15, %v7221_v9  ;;  %v5867_v48 = vrot.slane %v5853_v33, %v7221_v9  ;;  %v6156_v20 = vld [vmem:[%s8777_s7] sm:$0xff]  ;;  %v6157_v61 = vld [vmem:[%s8777_s7 + $0x8] sm:$0xff] }
 0x6e5   : > { %v5868_v8 = vcombine.low %v5845_v7, %v5847_v11  ;;  %v5869_v14 = vcombine.high %v5845_v7, %v5847_v11 }
 0x6e6   : > { %v5829_v28 = vpop.permute.xlu1 %5828  ;;  %v5822_v4 = vpop.permute.xlu0 %5821 }
 0x6e7   : > { %v5876_v53 = vrot.slane %v5868_v8, %v7221_v9  ;;  %v5883_v19 = vrot.slane %v5869_v14, %v7221_v9  ;;  %v5849_v16 = vmul.f32 %v5829_v28, %v5785_v42  ;;  %v5848_v63 = vmul.f32 %v5822_v4, %v5784_v59  ;;  %v6158_v8 = vld [vmem:[%s8777_s7 + $0x10] sm:$0xff]  ;;  %v6159_v14 = vld [vmem:[%s8777_s7 + $0x18] sm:$0xff] }
 0x6e9   : > { %v5884_v50 = vcombine.low %v5860_v34, %v5876_v53  ;;  %v5885_v51 = vcombine.high %v5860_v34, %v5876_v53  ;;  %v5900_v52 = vcombine.low %v5867_v48, %v5883_v19  ;;  %v5901_v25 = vcombine.high %v5867_v48, %v5883_v19 }
 0x6ea   : > { %v5843_v30 = vpop.permute.xlu1 %5842  ;;  %v5836_v0 = vpop.permute.xlu0 %5835  ;;  %v6861_v53 = vpack.c.bf16 %v6157_v61, %v6156_v20  ;;  %v6865_v19 = vpack.c.bf16 %v6159_v14, %v6158_v8 }
 0x6eb   : > { %v5892_v26 = vrot.slane %v5884_v50, %v7479_v29  ;;  %v5899_v37 = vrot.slane %v5885_v51, %v7479_v29  ;;  %v5908_v56 = vrot.slane %v5900_v52, %v7479_v29  ;;  %v5915_v22 = vrot.slane %v5901_v25, %v7479_v29 }
 0x6ec   : > { %v5851_v17 = vmul.f32 %v5843_v30, %v5787_v2  ;;  %v5850_v54 = vmul.f32 %v5836_v0, %v5786_v5  ;;  %6862 = vmatprep.subr.bf16.mxu0 %v6861_v53 }
 0x6ed   : > { %v5988_v1 = vcombine.low %v5892_v26, %v5899_v37  ;;  %v6494_v40 = vcombine.high %v5892_v26, %v5899_v37  ;;  %v6004_v62 = vcombine.low %v5908_v56, %v5915_v22  ;;  %v6495_v23 = vcombine.high %v5908_v56, %v5915_v22  ;;  %6864 = vmatpush3.bf16.msra.mxu0 %v6861_v53 }
 0x6ee   : > { %v5936_v57 = vcombine.low %v5849_v16, %v5851_v17  ;;  %v5937_v49 = vcombine.high %v5849_v16, %v5851_v17  ;;  %v5920_v32 = vcombine.low %v5848_v63, %v5850_v54  ;;  %v5921_v18 = vcombine.high %v5848_v63, %v5850_v54  ;;  %6866 = vmatprep.subr.bf16.mxu0 %v6865_v19 }
 0x6ef   : > { %v5995_v21 = vrot.slane %v5988_v1, %v7221_v9  ;;  %v6003_v35 = vrot.slane %v6494_v40, %v7221_v9  ;;  %v6011_v41 = vrot.slane %v6004_v62, %v7221_v9  ;;  %v6019_v45 = vrot.slane %v6495_v23, %v7221_v9 }
 0x6f0   : > { %v5944_v3 = vrot.slane %v5936_v57, %v7221_v9  ;;  %v5951_v38 = vrot.slane %v5937_v49, %v7221_v9  ;;  %v5928_v27 = vrot.slane %v5920_v32, %v7221_v9  ;;  %v5935_v6 = vrot.slane %v5921_v18, %v7221_v9 }
 0x6f1   : > { %v6020_v44 = vcombine.low %v5995_v21, %v6003_v35  ;;  %v6036_v43 = vcombine.low %v6011_v41, %v6019_v45  ;;  %v6021_v31 = vcombine.high %v5995_v21, %v6003_v35  ;;  %v6037_v47 = vcombine.high %v6011_v41, %v6019_v45  ;;  %6868 = vmatpush3.bf16.msra.mxu0 %v6865_v19  ;;  %v6498_v41 = vld [vmem:[%s8781_s11] ss:$0 sm:$0xff] }
 0x6f2   : > { %v5952_v13 = vcombine.low %v5928_v27, %v5944_v3  ;;  %v5953_v58 = vcombine.high %v5928_v27, %v5944_v3  ;;  %v5968_v24 = vcombine.low %v5935_v6, %v5951_v38  ;;  %v5969_v10 = vcombine.high %v5935_v6, %v5951_v38  ;;  %v6249_v3 = vld [vmem:[%s8770_s0 + $0x8] sm:$0xff]  ;;  %v6248_v6 = vld [vmem:[%s8770_s0] sm:$0xff] }
 0x6f3   : > { %v6028_v39 = vrot.slane %v6020_v44, %v7479_v29  ;;  %v6044_v46 = vrot.slane %v6036_v43, %v7479_v29  ;;  %v6035_v33 = vrot.slane %v6021_v31, %v7479_v29  ;;  %v6051_v11 = vrot.slane %v6037_v47, %v7479_v29 }
 0x6f4   : > { %v5960_v60 = vrot.slane %v5952_v13, %v7479_v29  ;;  %v5967_v55 = vrot.slane %v5953_v58, %v7479_v29  ;;  %v5976_v12 = vrot.slane %v5968_v24, %v7479_v29  ;;  %v5983_v36 = vrot.slane %v5969_v10, %v7479_v29 }
 0x6f5   : > { %v6053_v15 = vcombine.high %v6028_v39, %v6044_v46  ;;  %v6052_v7 = vcombine.low %v6028_v39, %v6044_v46  ;;  %v6054_v25 = vcombine.low %v6035_v33, %v6051_v11  ;;  %v6055_v37 = vcombine.high %v6035_v33, %v6051_v11 }
 0x6f6   : > { %v6056_v28 = vcombine.low %v5960_v60, %v5967_v55  ;;  %v6496_v4 = vcombine.high %v5960_v60, %v5967_v55  ;;  %v6072_v34 = vcombine.low %v5976_v12, %v5983_v36  ;;  %v6497_v48 = vcombine.high %v5976_v12, %v5983_v36 }
 0x6f7   : > { %6126 = vrot.lane.b32.xlu0 %v6053_v15, %s7013_s28 }
 0x6f8   : > { %v6063_v42 = vrot.slane %v6056_v28, %v7221_v9  ;;  %v6071_v50 = vrot.slane %v6496_v4, %v7221_v9  ;;  %v6079_v51 = vrot.slane %v6072_v34, %v7221_v9  ;;  %v6087_v52 = vrot.slane %v6497_v48, %v7221_v9  ;;  %v6501_v28 = vld [vmem:[%s8782_s12] ss:$0 sm:$0xff] }
 0x6f9   : > { %v6502_v34 = vld [vmem:[%s8783_s13] ss:$0 sm:$0xff] }
 0x6fa   : > { %v6088_v59 = vcombine.low %v6063_v42, %v6071_v50  ;;  %v6104_v2 = vcombine.low %v6079_v51, %v6087_v52  ;;  %v6089_v5 = vcombine.high %v6063_v42, %v6071_v50  ;;  %v6105_v30 = vcombine.high %v6079_v51, %v6087_v52 }
 0x6fb   : > { %6134 = vrot.lane.b32.xlu0 %v6054_v25, %s7014_s18 }
 0x6fc   : > { %v6096_v0 = vrot.slane %v6088_v59, %v7479_v29  ;;  %v6112_v26 = vrot.slane %v6104_v2, %v7479_v29  ;;  %v6103_v22 = vrot.slane %v6089_v5, %v7479_v29  ;;  %v6119_v9 = vrot.slane %v6105_v30, %v7479_v29 }
 0x6fe   : > { %v6121_v56 = vcombine.high %v6096_v0, %v6112_v26  ;;  %v6120_v16 = vcombine.low %v6096_v0, %v6112_v26  ;;  %v6122_v63 = vcombine.low %v6103_v22, %v6119_v9  ;;  %v6123_v17 = vcombine.high %v6103_v22, %v6119_v9 }
 0x6ff   : > { %6142 = vrot.lane.b32.xlu0 %v6055_v37, %s7015_s2 }
 0x700   : > { %6128 = vrot.lane.b32.xlu1 %v6121_v56, %s7013_s28 }
 0x704   : > { %6136 = vrot.lane.b32.xlu1 %v6122_v63, %s7014_s18 }
 0x708   : > { %6144 = vrot.lane.b32.xlu1 %v6123_v17, %s7015_s2 }
 0x769   : > { %v6127_v54 = vpop.permute.xlu0 %6126 }
 0x76a   : > { %v6148_v40 = vsel %vm4273_vm4, %v6052_v7, %v6127_v54 }
 0x76d   : > { %v6135_v1 = vpop.permute.xlu0 %6134 }
 0x76e   : > { %v6151_v62 = vsel %vm6150_vm12, %v6148_v40, %v6135_v1 }
 0x771   : > { %v6143_v23 = vpop.permute.xlu0 %6142 }
 0x772   : > { %v6129_v57 = vpop.permute.xlu1 %6128  ;;  %v6154_v49 = vsel %vm6153_vm13, %v6151_v62, %v6143_v23 }
 0x773   : > { %6786 = vmatprep.mubr.msk.f32.mxu0 %vm1251_vm2, %v6154_v49  ;;  %v6149_v32 = vsel %vm4273_vm4, %v6120_v16, %v6129_v57 }
 0x776   : > { %v6137_v29 = vpop.permute.xlu1 %6136 }
 0x777   : > { %v6152_v18 = vsel %vm6150_vm12, %v6149_v32, %v6137_v29 }
 0x77a   : > { %v6145_v21 = vpop.permute.xlu1 %6144 }
 0x77b   : > { %v6155_v35 = vsel %vm6153_vm13, %v6152_v18, %v6145_v21 }
 0x77c   : > { %6787 = vmatmul.mubr.msk.f32.vlgmr.msra.gmra.mrb[0].mxu0 %vm1251_vm2, %v6155_v35 }
 0x84f   : > { %v6788_v45 = vpop.f32.mrb[0].mxu0 }
 0x850   : > { %v6245_v38 = vadd.f32 %v6788_v45, %v6498_v41  ;;  %v6239_v27 = vpop.f32.mrb[1].mxu0 }
 0x851   : > { %v6240_v44 = vadd.f32 %v6498_v41, %v6239_v27 }
 0x852   : > { %v6251_v43 = vadd.f32 %v6249_v3, %v6245_v38 }
 0x853   : > { %v6250_v31 = vadd.f32 %v6248_v6, %v6240_v44 }
 0x854   : > { %v6255_v47 = vsel %vm1251_vm2, %v6251_v43, 0.0 }
 0x855   : > { %6256 = vadd.xlane.f32.xlu1 %v6255_v47  ;;  %v6252_v13 = vsel %vm1251_vm2, %v6250_v31, 0.0 }
 0x856   : > { %6253 = vadd.xlane.f32.xlu0 %v6252_v13 }
 0x8e2   : > { %v6257_v58 = vpop.xlane.xlu1 %6256 }
 0x8e3   : > { %v6260_v24 = vmul.f32 0.03125, %v6257_v58  ;;  %v6254_v10 = vpop.xlane.xlu0 %6253 }
 0x8e4   : > { %v6259_v39 = vmul.f32 0.03125, %v6254_v10 }
 0x8e5   : > { %v6262_v46 = vsub.f32 %v6251_v43, %v6260_v24 }
 0x8e6   : > { %v6261_v60 = vsub.f32 %v6250_v31, %v6259_v39 }
 0x8e7   : > { %v6264_v36 = vmul.f32 %v6262_v46, %v6262_v46 }
 0x8e8   : > { %v6263_v55 = vmul.f32 %v6261_v60, %v6261_v60 }
 0x8e9   : > { %v6268_v20 = vsel %vm1251_vm2, %v6264_v36, 0.0 }
 0x8ea   : > { %v6265_v12 = vsel %vm1251_vm2, %v6263_v55, 0.0 }
 0x8eb   : > { %6266 = vadd.xlane.f32.xlu0 %v6265_v12 }
 0x8ef   : > { %6269 = vadd.xlane.f32.xlu0 %v6268_v20 }
 0x978   : > { %v6267_v61 = vpop.xlane.xlu0 %6266 }
 0x979   : > { %v6271_v15 = vmul.f32 0.03125, %v6267_v61 }
 0x97b   : > { %v6273_v33 = vadd.f32 1e-05, %v6271_v15 }
 0x97c   : > { %v6270_v11 = vpop.xlane.xlu0 %6269 }
 0x97d   : > { %6940 = vrsqrt.f32 %v6273_v33  ;;  %v6272_v7 = vmul.f32 0.03125, %v6270_v11 }
 0x97f   : > { %v6274_v8 = vadd.f32 1e-05, %v6272_v7 }
 0x981   : > { %6942 = vrsqrt.f32 %v6274_v8 }
 0x987   : > { %v6941_v14 = vpop.eup %6940 }
 0x988   : > { %v6277_v4 = vmul.f32 %v6941_v14, %v6261_v60 }
 0x98a   : > { %v6286_v48 = vmul.f32 %v6501_v28, %v6277_v4 }
 0x98b   : > { %v6943_v53 = vpop.eup %6942 }
 0x98c   : > { %v6295_v19 = vadd.f32 %v6502_v34, %v6286_v48  ;;  %v6278_v42 = vmul.f32 %v6943_v53, %v6262_v46 }
 0x98e   : > { %6297 = vst.msk [vmem:[#allocation6] sm:$0xff] %vm1251_vm2, %v6295_v19  ;;  %v6287_v50 = vmul.f32 %v6501_v28, %v6278_v42 }
 0x990   : > { %v6296_v51 = vadd.f32 %v6502_v34, %v6287_v50 }
 0x992   : > { %6298 = vst.msk [vmem:[#allocation6 + $0x8] sm:$0xff] %vm1251_vm2, %v6296_v51 }
 0x993 PF: > { %s8902_s27 = sadd.s32 4294967295, %s6996_s15   ;;  %s7016_s18 = smov [#allocation6]  }
 0x994   : > { %p8735_p7 = scmp.eq.s32.totalorder %s8902_s27, 1  ;;  %s6308_s2 = sshll.u32 %s7016_s18, 4  ;;  %s6309_s2 = int_to_ptr.vmem [resolvable:$true] %s6308_s2 }
 0x995   : > { %s6944_s20 = scalar_lea.vmem %s6309_s2, 256  ;;  %p6951_p11 = scmp.lt.s32.totalorder %s6309_s2, %s6309_s2 }
 0x996   : > { %p6945_p8 = scmp.ne.s32.totalorder %s6309_s2, %s6944_s20  ;;  %p6952_p12 = scmp.lt.s32.totalorder %s6944_s20, %s6944_s20 }
 0x998   : > { %p6946_p9 = pnand %p6945_p8, %p8735_p7  ;;  %p6953_p13 = por %p6952_p12, %p6951_p11 }
 0x99a   : > { %p6947_p10 = pneg %p6946_p9 }
 0x99c   : > { %p6954_p0 = pnand %p6953_p13, %p6947_p10 }
 0x99e   : > { %6957 = shalt.err (!%p6954_p0)
}
 0x99f   : > { %s6958_s29 = scalar_lea.hbm %s8784_s14, 256 }
 0x9a0   : > { %p6959_p1 = scmp.ne.s32.totalorder %s8784_s14, %s6958_s29  ;;  %p6964_p4 = scmp.lt.u32.totalorder %s6958_s29, %s8784_s14 }
 0x9a2   : > { %p6960_p2 = pnand %p6959_p1, %p8735_p7 }
 0x9a4   : > { %p6961_p3 = pneg %p6960_p2 }
 0x9a6   : > { %p6966_p5 = pnand %p6964_p4, %p6961_p3 }
 0x9a8   : > { %6969 = shalt.err (!%p6966_p5)
}
 0x9a9   : > { %s7017_s26 = smov 128   ;;  %s7018_s16 = smov 8  }
 0x9aa   : > { %6870 = dma.vmem_to_hbm [thread:$0]  (%p8735_p7), %s6309_s2, 256, %s8784_s14, [#allocation7], %s7017_s26, %s7017_s26, %s7018_s16  }
 0x9ab   : > { %6983 = dma.done.wait (%p8735_p7), [#allocation7], 256  }
 0x9ac   : > { %6985 = vsyncadd (%p8735_p7), [#allocation7], 4294967040 }
 0x9ad PF: > { %s25_s15 = sadd.s32 1, %s6996_s15   ;;  %s8904_s29 = smov %s6992_s30 }
 0x9ae   : > { %p22_p6 = scmp.ge.s32.totalorder %s25_s15, 4   ;;  %s8905_s30 = smov %s8907_s17 }
 0x9b0   :  { %24 = sbr.rel (!%p22_p6) target bundleno = 4 (0x4), region = 121 }
 0x9b7   :  { %6324 = vsyncpa [#allocation7], 1 }
 0x9b8   :  { %6326 = vsyncpa [#allocation7 + $0x1], 1 }

</bundles_post_ra>
